<compile_context>
chip_gen: v5e
topology: v5e:2x2
jax: 0.10.0
libtpu: 0.0.40
codegen_flags: <defaults>
</compile_context>

<pallas_src>
import functools

import jax
import jax.numpy as jnp
from jax.experimental import pallas as pl
from jax.experimental.pallas import tpu as pltpu
import numpy as np

LANE = 128
_VMEM_LIMIT = 32 * 1024 * 1024   # fits v7x default scoped VMEM; plenty on v5e/v6e


def _round_up(x, m):
    return (x + m - 1) // m * m


# ----------------------------------------------------------------------------
# Pallas kernels
# ----------------------------------------------------------------------------

def _packed_cmatmul_kernel(a_ref, w_ref, b_ref, o_ref, *, relu):
    # a: (tm, 2K) bf16 packed [real | imag] columns
    # w: (2K, Np) bf16 packed [[wr, wi], [-wi, wr]] (lane-padded)
    # b: (1, Np) f32 packed [br-bi | br+bi]
    acc = jnp.dot(a_ref[...], w_ref[...], preferred_element_type=jnp.float32)
    out = acc + b_ref[...]
    if relu:                      # complex_relu == relu on real / imag halves
        out = jnp.maximum(out, 0.0)
    o_ref[...] = out


def _packed_cmatmul_atan2_kernel(a_ref, wr_ref, wi_ref, br_ref, bi_ref, o_ref):
    # Final-layer fusion: compute cr, ci and emit atan2(ci, cr) directly
    # (saves a full HBM round trip of the u1 real/imag tensors).
    a = a_ref[...]
    cr = jnp.dot(a, wr_ref[...], preferred_element_type=jnp.float32) + br_ref[...]
    ci = jnp.dot(a, wi_ref[...], preferred_element_type=jnp.float32) + bi_ref[...]
    o_ref[...] = jnp.arctan2(ci, cr)


def _polar_kernel(amp_ref, ph_ref, re_ref, im_ref):
    a = amp_ref[...]
    p = ph_ref[...]
    re_ref[...] = a * jnp.cos(p)
    im_ref[...] = a * jnp.sin(p)


# ----------------------------------------------------------------------------
# Tiled pallas_call wrappers
# ----------------------------------------------------------------------------

def _matmul_grid_call(kernel, a, ws, bs, n_lanes, tm_target=512):
    """a: (M, K2) f32; ws: list of (K2, n_lanes) f32; bs: list of (n_lanes,) f32."""
    m, k2 = a.shape
    k2p = _round_up(k2, 16)                       # bf16 sublane-friendly K
    m_pad = _round_up(max(m, 16), 16)
    tm = min(tm_target, m_pad)
    m_pad = _round_up(m_pad, tm)

    a_p = jnp.zeros((m_pad, k2p), jnp.bfloat16).at[:m, :k2].set(a.astype(jnp.bfloat16))
    ws_p = [jnp.zeros((k2p, n_lanes), jnp.bfloat16).at[:k2, :].set(w.astype(jnp.bfloat16))
            for w in ws]
    bs_p = [b.reshape(1, n_lanes).astype(jnp.float32) for b in bs]

    a_spec = pl.BlockSpec((tm, k2p), lambda i: (i, 0))
    w_spec = pl.BlockSpec((k2p, n_lanes), lambda i: (0, 0))   # grid-invariant, resident
    b_spec = pl.BlockSpec((1, n_lanes), lambda i: (0, 0))
    o_spec = pl.BlockSpec((tm, n_lanes), lambda i: (i, 0))

    out = pl.pallas_call(
        kernel,
        grid=(m_pad // tm,),
        in_specs=[a_spec] + [w_spec] * len(ws_p) + [b_spec] * len(bs_p),
        out_specs=o_spec,
        out_shape=jax.ShapeDtypeStruct((m_pad, n_lanes), jnp.float32),
        compiler_params=pltpu.CompilerParams(
            dimension_semantics=("parallel",),        # shards M across v7x's 2 TCs
            vmem_limit_bytes=_VMEM_LIMIT),
    )(a_p, *ws_p, *bs_p)
    return out[:m]


def packed_complex_matmul(a_cat, wr, wi, br, bi, relu):
    """a_cat: (M, 2K) = [real cols | imag cols]; wr/wi: (K, N); br/bi: (N,)."""
    k, n = wr.shape
    n_lanes = _round_up(2 * n, LANE)
    w_block = jnp.zeros((2 * k, n_lanes), jnp.float32)
    w_block = w_block.at[:k, :n].set(wr).at[:k, n:2 * n].set(wi)
    w_block = w_block.at[k:, :n].set(-wi).at[k:, n:2 * n].set(wr)
    b_block = jnp.zeros((n_lanes,), jnp.float32)
    b_block = b_block.at[:n].set(br - bi).at[n:2 * n].set(br + bi)
    kern = functools.partial(_packed_cmatmul_kernel, relu=relu)
    out = _matmul_grid_call(kern, a_cat, [w_block], [b_block], n_lanes)
    return out[:, :n], out[:, n:2 * n]


def packed_complex_matmul_atan2(a_cat, wr, wi, br, bi):
    """Like packed_complex_matmul but returns atan2(ci, cr) (final-layer fusion)."""
    k, n = wr.shape
    n_lanes = _round_up(n, LANE)
    wr_blk = jnp.zeros((2 * k, n_lanes), jnp.float32).at[:k, :n].set(wr).at[k:, :n].set(-wi)
    wi_blk = jnp.zeros((2 * k, n_lanes), jnp.float32).at[:k, :n].set(wi).at[k:, :n].set(wr)
    br_blk = jnp.zeros((n_lanes,), jnp.float32).at[:n].set(br - bi)
    bi_blk = jnp.zeros((n_lanes,), jnp.float32).at[:n].set(br + bi)
    out = _matmul_grid_call(_packed_cmatmul_atan2_kernel, a_cat,
                            [wr_blk, wi_blk], [br_blk, bi_blk], n_lanes)
    return out[:, :n]


def _elementwise(kernel, n_out, *xs, lane=512, tile_rows=256):
    """Lane-dense (multiple of 128), grid-tiled elementwise pallas_call."""
    shape = xs[0].shape
    length = xs[0].size
    rows = _round_up(pl.cdiv(length, lane), 8)
    tr = min(tile_rows, rows)
    rows = _round_up(rows, tr)
    total = rows * lane
    flat = [jnp.pad(x.reshape(-1), (0, total - length)).reshape(rows, lane) for x in xs]

    spec = pl.BlockSpec((tr, lane), lambda i: (i, 0))
    if n_out == 1:
        out_specs = spec
        out_shape = jax.ShapeDtypeStruct((rows, lane), jnp.float32)
    else:
        out_specs = tuple(spec for _ in range(n_out))
        out_shape = tuple(jax.ShapeDtypeStruct((rows, lane), jnp.float32)
                          for _ in range(n_out))
    outs = pl.pallas_call(
        kernel, grid=(rows // tr,),
        in_specs=[spec] * len(flat),
        out_specs=out_specs,
        out_shape=out_shape,
        compiler_params=pltpu.CompilerParams(
            dimension_semantics=("parallel",), vmem_limit_bytes=_VMEM_LIMIT),
    )(*flat)
    if n_out == 1:
        outs = (outs,)
    res = tuple(o.reshape(-1)[:length].reshape(shape) for o in outs)
    return res if n_out > 1 else res[0]


def polar_to_complex(amp, phase):
    return _elementwise(_polar_kernel, 2, amp, phase)


# ----------------------------------------------------------------------------
# Convolution glue (im2col in plain JAX) + complex conv / conv-transpose
# ----------------------------------------------------------------------------
# TODO(synk): im2col + NHWC<->NCHW reshapes are plain-JAX glue; fully in-kernel
# im2col (halo'd VMEM block + k*k shifted dots) is a further optimization.

def _im2col(x, k, stride, pad):
    """x: (B, C, H, W) -> (B*Hout*Wout, C*k*k) with columns ordered (c, ky, kx)."""
    b, c, h, w = x.shape
    hout = (h + 2 * pad - k) // stride + 1
    wout = (w + 2 * pad - k) // stride + 1
    xp = jnp.pad(x, ((0, 0), (0, 0), (pad, pad), (pad, pad))).transpose(0, 2, 3, 1)
    patches = []
    for i in range(k):
        for j in range(k):
            patches.append(xp[:, i:i + stride * hout:stride, j:j + stride * wout:stride, :])
    col = jnp.stack(patches, axis=-1)                 # (B, Hout, Wout, C, k*k)
    return col.reshape(b * hout * wout, c * k * k), hout, wout


def complex_conv2d(xr, xi, wr, wi, br, bi, stride, pad, relu):
    # xr/xi: (B, Cin, H, W); wr/wi: (Cout, Cin, k, k); br/bi: (Cout,)
    b = xr.shape[0]
    cout, cin, k, _ = wr.shape
    x_cat = jnp.concatenate([xr, xi], axis=1)         # [real chans | imag chans]
    col, hout, wout = _im2col(x_cat, k, stride, pad)  # (M, 2*Cin*k*k)
    wmat_r = wr.transpose(1, 2, 3, 0).reshape(cin * k * k, cout)
    wmat_i = wi.transpose(1, 2, 3, 0).reshape(cin * k * k, cout)
    or_, oi_ = packed_complex_matmul(col, wmat_r, wmat_i, br, bi, relu)
    or_ = or_.reshape(b, hout, wout, cout).transpose(0, 3, 1, 2)
    oi_ = oi_.reshape(b, hout, wout, cout).transpose(0, 3, 1, 2)
    return or_, oi_


def complex_conv2d_atan2(xr, xi, wr, wi, br, bi, stride, pad):
    b = xr.shape[0]
    cout, cin, k, _ = wr.shape
    x_cat = jnp.concatenate([xr, xi], axis=1)
    col, hout, wout = _im2col(x_cat, k, stride, pad)
    wmat_r = wr.transpose(1, 2, 3, 0).reshape(cin * k * k, cout)
    wmat_i = wi.transpose(1, 2, 3, 0).reshape(cin * k * k, cout)
    phase = packed_complex_matmul_atan2(col, wmat_r, wmat_i, br, bi)
    return phase.reshape(b, hout, wout, cout).transpose(0, 3, 1, 2)


def _deconv_as_conv_weights(w):
    """ConvTranspose2d(k=4, stride=2, pad=1) weight (Cin, Cout, 4, 4) ->
    equivalent stride-1 pad-1 3x3 conv weight (4*Cout, Cin, 3, 3), one output
    channel group per output phase (py, px) in {0,1}^2 (output-phase decomposition)."""
    cin, cout, k, _ = w.shape
    assert k == 4, "decomposition specialized to kernel 4, stride 2, padding 1"
    wc = w.transpose(1, 0, 2, 3)                                  # (Cout, Cin, 4, 4)
    row_taps = (((0, 3), (1, 1)), ((1, 2), (2, 0)))               # [py] -> ((a, ky), ...)
    col_taps = (((0, 3), (1, 1)), ((1, 2), (2, 0)))               # [px] -> ((b, kx), ...)
    phases = []
    for py in (0, 1):
        for px in (0, 1):
            k3 = jnp.zeros((cout, cin, 3, 3), w.dtype)
            for (a, ky) in row_taps[py]:
                for (bb, kx) in col_taps[px]:
                    k3 = k3.at[:, :, a, bb].set(wc[:, :, ky, kx])
            phases.append(k3)
    return jnp.concatenate(phases, axis=0)                        # (4*Cout, Cin, 3, 3)


def _interleave_phases(x, cout):
    """x: (B, 4*Cout, H, W) channel blocks [ee, eo, oe, oo] -> (B, Cout, 2H, 2W)."""
    b, _, h, w = x.shape
    x = x.reshape(b, 2, 2, cout, h, w)          # (B, py, px, co, H, W)
    x = x.transpose(0, 3, 4, 1, 5, 2)           # (B, co, H, py, W, px)
    return x.reshape(b, cout, 2 * h, 2 * w)


def complex_conv_transpose2d(xr, xi, wr, wi, br, bi, relu, fuse_atan2=False):
    # wr/wi: (Cin, Cout, 4, 4), stride=2, padding=1 (MW_CANet's only config).
    cout = wr.shape[1]
    wr3 = _deconv_as_conv_weights(wr)
    wi3 = _deconv_as_conv_weights(wi)
    br4 = jnp.tile(br, 4)
    bi4 = jnp.tile(bi, 4)
    if fuse_atan2:
        ph = complex_conv2d_atan2(xr, xi, wr3, wi3, br4, bi4, stride=1, pad=1)
        return _interleave_phases(ph, cout)
    or_, oi_ = complex_conv2d(xr, xi, wr3, wi3, br4, bi4, stride=1, pad=1, relu=relu)
    return _interleave_phases(or_, cout), _interleave_phases(oi_, cout)


# ----------------------------------------------------------------------------
# propagation_ASM (FFT + spectrum multiply in plain JAX; no Pallas FFT primitive,
# and the complex spectrum multiply is left to XLA fusion)
# ----------------------------------------------------------------------------

def propagation_ASM(ur, ui, Hr, Hi, linear_conv=True):
    n, c, h, w = ur.shape
    ph, pw = h // 2, w // 2
    if linear_conv:
        ur = jnp.pad(ur, ((0, 0), (0, 0), (ph, ph), (pw, pw)))
        ui = jnp.pad(ui, ((0, 0), (0, 0), (ph, ph), (pw, pw)))
    u = ur + 1j * ui
    U1 = jnp.fft.fftn(jnp.fft.ifftshift(u, axes=(-2, -1)), axes=(-2, -1), norm='ortho')
    Hc = (Hr + 1j * Hi).astype(jnp.complex64)
    U2 = Hc * U1
    u_out = jnp.fft.fftshift(jnp.fft.ifftn(U2, axes=(-2, -1), norm='ortho'), axes=(-2, -1))
    if linear_conv:
        u_out = u_out[..., ph:ph + h, pw:pw + w]
    return jnp.real(u_out).astype(jnp.float32), jnp.imag(u_out).astype(jnp.float32)


# ----------------------------------------------------------------------------
# CCNN2 + MW_CANet forward
# ----------------------------------------------------------------------------

def ccnn2_forward(p, xr, xi):
    o1r, o1i = complex_conv2d(xr, xi, *p['d1'], stride=2, pad=1, relu=True)
    o2r, o2i = complex_conv2d(o1r, o1i, *p['d2'], stride=2, pad=1, relu=True)
    o3r, o3i = complex_conv2d(o2r, o2i, *p['d3'], stride=2, pad=1, relu=True)
    u3r, u3i = complex_conv_transpose2d(o3r, o3i, *p['u3'], relu=True)
    u2r, u2i = complex_conv_transpose2d(u3r + o2r, u3i + o2i, *p['u2'], relu=True)
    # Final layer: no relu, atan2(imag, real) fused into the matmul epilogue.
    holophase = complex_conv_transpose2d(u2r + o1r, u2i + o1i, *p['u1'],
                                         relu=False, fuse_atan2=True)
    return holophase


@functools.partial(jax.jit, static_argnums=(4,))
def mw_canet_forward(params, amp, phase, z, pad, pitch, wavelength, Hr, Hi):
    # target_complex = complex(amp*cos(phase), amp*sin(phase)) — unused downstream,
    # kept for parity with the reference forward (XLA will DCE it).
    _t_r, _t_i = polar_to_complex(amp, phase)

    # TODO(synk): the inner `MW_CANet(in_channels=1, channels=10)` phase predictor is
    # recursive / undefined in the reference source; using a single deterministic 3x3
    # real-valued conv as the phase-prediction stand-in.
    zw = jnp.zeros_like(params['pp_w'])
    zb = jnp.zeros_like(params['pp_b'])
    pp_r, _ = complex_conv2d(amp, jnp.zeros_like(amp), params['pp_w'], zw,
                             params['pp_b'], zb, stride=1, pad=1, relu=False)
    predict_phase = pp_r

    pc_r, pc_i = polar_to_complex(amp, predict_phase)
    slm_r, slm_i = propagation_ASM(pc_r, pc_i, Hr, Hi, linear_conv=pad)
    holophase = ccnn2_forward(params, slm_r, slm_i)
    return holophase, predict_phase


# ----------------------------------------------------------------------------
# Deterministic parameter init
# ----------------------------------------------------------------------------

def init_params(key):
    keys = iter(jax.random.split(key, 64))

    def w(shape):
        return 0.1 * jax.random.normal(next(keys), shape, jnp.float32)

    def cconv(cout, cin, k):   # (wr, wi, br, bi)
        return (w((cout, cin, k, k)), w((cout, cin, k, k)), w((cout,)), w((cout,)))

    def cconvT(cin, cout, k):  # ConvTranspose2d weight layout (cin, cout, k, k)
        return (w((cin, cout, k, k)), w((cin, cout, k, k)), w((cout,)), w((cout,)))

    return {
        'd1': cconv(4, 1, 3),
        'd2': cconv(8, 4, 3),
        'd3': cconv(16, 8, 3),
        'u3': cconvT(16, 8, 4),
        'u2': cconvT(8, 4, 4),
        'u1': cconvT(4, 1, 4),
        'pp_w': w((1, 1, 3, 3)),
        'pp_b': w((1,)),
    }


# ----------------------------------------------------------------------------
# Main
# ----------------------------------------------------------------------------

if __name__ == "__main__":
    key = jax.random.PRNGKey(0)
    k_amp, k_ph, k_par = jax.random.split(key, 3)

    B, C, Himg, Wimg = 2, 1, 16, 16
    amp = jax.random.uniform(k_amp, (B, C, Himg, Wimg), jnp.float32)
    phase = jax.random.uniform(k_ph, (B, C, Himg, Wimg), jnp.float32,
                               minval=-np.pi, maxval=np.pi)

    z = 0.02
    pad = True
    pitch = 6.4e-6
    wavelength = 520e-9

    # Precomputed ASM transfer function H (for the zero-padded 2x grid).
    Hs, Ws = 2 * Himg, 2 * Wimg
    fy = jnp.fft.fftfreq(Hs, d=pitch)
    fx = jnp.fft.fftfreq(Ws, d=pitch)
    FX, FY = jnp.meshgrid(fx, fy, indexing='xy')
    under = 1.0 / wavelength ** 2 - FX ** 2 - FY ** 2
    band = (under > 0).astype(jnp.float32)
    phase_H = 2.0 * jnp.pi * z * jnp.sqrt(jnp.maximum(under, 0.0))
    Hr = (jnp.cos(phase_H) * band).reshape(1, 1, Hs, Ws).astype(jnp.float32)
    Hi = (jnp.sin(phase_H) * band).reshape(1, 1, Hs, Ws).astype(jnp.float32)

    params = init_params(k_par)

    holophase, predict_phase = mw_canet_forward(
        params, amp, phase, z, pad, pitch, wavelength, Hr, Hi)

    jax.block_until_ready(holophase)
    jax.block_until_ready(predict_phase)
    assert holophase.shape == (B, C, Himg, Wimg)
    assert predict_phase.shape == (B, C, Himg, Wimg)
    print("KERNEL_OK")
</pallas_src>

<mosaic_0001>
module attributes {stable_mosaic.version = 11 : i64} {
  func.func @_packed_cmatmul_kernel(%arg0: i32, %arg1: memref<512x32xbf16, #tpu.memory_space<vmem>>, %arg2: memref<32x128xbf16, #tpu.memory_space<vmem>>, %arg3: memref<1x128xf32, #tpu.memory_space<vmem>>, %arg4: memref<512x128xf32, #tpu.memory_space<vmem>>) attributes {dimension_semantics = [#tpu.dimension_semantics<parallel>], iteration_bounds = array<i64: 1>, scalar_prefetch = 0 : i64, scratch_operands = 0 : i64, tpu.core_type = #tpu.core_type<tc>, window_params = [{transform_indices = @transform_0, window_bounds = array<i64: 512, 32>}, {pipeline_mode = #tpu.pipeline_mode<synchronous>, transform_indices = @transform_1, window_bounds = array<i64: 32, 128>}, {pipeline_mode = #tpu.pipeline_mode<synchronous>, transform_indices = @transform_2, window_bounds = array<i64: 1, 128>}, {transform_indices = @transform_3, window_bounds = array<i64: 512, 128>}]} {
    %c0 = arith.constant 0 : index
    %c0_0 = arith.constant 0 : index
    %0 = vector.load %arg1[%c0, %c0_0] : memref<512x32xbf16, #tpu.memory_space<vmem>>, vector<512x32xbf16>
    %c0_1 = arith.constant 0 : index
    %c0_2 = arith.constant 0 : index
    %1 = vector.load %arg2[%c0_1, %c0_2] : memref<32x128xbf16, #tpu.memory_space<vmem>>, vector<32x128xbf16>
    %cst = arith.constant dense<0.000000e+00> : vector<512x128xf32>
    %2 = tpu.matmul %0, %1, %cst {dimension_numbers = #tpu.dot_dimension_numbers<[1], [0], [0], [1], [0, 0, 1, 1], [], []>} : vector<512x32xbf16>, vector<32x128xbf16>, vector<512x128xf32> -> vector<512x128xf32>
    %c0_3 = arith.constant 0 : index
    %c0_4 = arith.constant 0 : index
    %3 = vector.load %arg3[%c0_3, %c0_4] : memref<1x128xf32, #tpu.memory_space<vmem>>, vector<1x128xf32>
    %4 = vector.broadcast %3 : vector<1x128xf32> to vector<512x128xf32>
    %5 = arith.addf %2, %4 : vector<512x128xf32>
    %c0_5 = arith.constant 0 : index
    %c0_6 = arith.constant 0 : index
    %6 = vector.load %arg4[%c0_5, %c0_6] : memref<512x128xf32, #tpu.memory_space<vmem>>, vector<512x128xf32>
    tpu.vector_store %arg4[%c0_5, %c0_6], %5 {strides = array<i32>} : memref<512x128xf32, #tpu.memory_space<vmem>>, vector<512x128xf32>,
    return
  }
  func.func @transform_0(%arg0: i32) -> (i32, i32) {
    %c0_i32 = arith.constant 0 : i32
    %c0_i32_0 = arith.constant 0 : i32
    return %arg0, %c0_i32 : i32, i32
  }
  func.func @transform_1(%arg0: i32) -> (i32, i32) {
    %c0_i32 = arith.constant 0 : i32
    %c0_i32_0 = arith.constant 0 : i32
    %c0_i32_1 = arith.constant 0 : i32
    return %c0_i32, %c0_i32_0 : i32, i32
  }
  func.func @transform_2(%arg0: i32) -> (i32, i32) {
    %c0_i32 = arith.constant 0 : i32
    %c0_i32_0 = arith.constant 0 : i32
    %c0_i32_1 = arith.constant 0 : i32
    return %c0_i32, %c0_i32_0 : i32, i32
  }
  func.func @transform_3(%arg0: i32) -> (i32, i32) {
    %c0_i32 = arith.constant 0 : i32
    %c0_i32_0 = arith.constant 0 : i32
    return %arg0, %c0_i32 : i32, i32
  }
}

module attributes {stable_mosaic.version = 11 : i64} {
  func.func @_polar_kernel(%arg0: i32, %arg1: memref<8x512xf32, #tpu.memory_space<vmem>>, %arg2: memref<8x512xf32, #tpu.memory_space<vmem>>, %arg3: memref<8x512xf32, #tpu.memory_space<vmem>>, %arg4: memref<8x512xf32, #tpu.memory_space<vmem>>) attributes {dimension_semantics = [#tpu.dimension_semantics<parallel>], iteration_bounds = array<i64: 1>, scalar_prefetch = 0 : i64, scratch_operands = 0 : i64, tpu.core_type = #tpu.core_type<tc>, window_params = [{transform_indices = @transform_0, window_bounds = array<i64: 8, 512>}, {transform_indices = @transform_1, window_bounds = array<i64: 8, 512>}, {transform_indices = @transform_2, window_bounds = array<i64: 8, 512>}, {transform_indices = @transform_3, window_bounds = array<i64: 8, 512>}]} {
    %c0 = arith.constant 0 : index
    %c0_0 = arith.constant 0 : index
    %0 = vector.load %arg1[%c0, %c0_0] : memref<8x512xf32, #tpu.memory_space<vmem>>, vector<8x512xf32>
    %c0_1 = arith.constant 0 : index
    %c0_2 = arith.constant 0 : index
    %1 = vector.load %arg2[%c0_1, %c0_2] : memref<8x512xf32, #tpu.memory_space<vmem>>, vector<8x512xf32>
    %2 = math.cos %1 : vector<8x512xf32>
    %3 = arith.mulf %0, %2 : vector<8x512xf32>
    %c0_3 = arith.constant 0 : index
    %c0_4 = arith.constant 0 : index
    %4 = vector.load %arg3[%c0_3, %c0_4] : memref<8x512xf32, #tpu.memory_space<vmem>>, vector<8x512xf32>
    tpu.vector_store %arg3[%c0_3, %c0_4], %3 {strides = array<i32>} : memref<8x512xf32, #tpu.memory_space<vmem>>, vector<8x512xf32>,
    %5 = math.sin %1 : vector<8x512xf32>
    %6 = arith.mulf %0, %5 : vector<8x512xf32>
    %c0_5 = arith.constant 0 : index
    %c0_6 = arith.constant 0 : index
    %7 = vector.load %arg4[%c0_5, %c0_6] : memref<8x512xf32, #tpu.memory_space<vmem>>, vector<8x512xf32>
    tpu.vector_store %arg4[%c0_5, %c0_6], %6 {strides = array<i32>} : memref<8x512xf32, #tpu.memory_space<vmem>>, vector<8x512xf32>,
    return
  }
  func.func @transform_0(%arg0: i32) -> (i32, i32) {
    %c0_i32 = arith.constant 0 : i32
    %c0_i32_0 = arith.constant 0 : i32
    return %arg0, %c0_i32 : i32, i32
  }
  func.func @transform_1(%arg0: i32) -> (i32, i32) {
    %c0_i32 = arith.constant 0 : i32
    %c0_i32_0 = arith.constant 0 : i32
    return %arg0, %c0_i32 : i32, i32
  }
  func.func @transform_2(%arg0: i32) -> (i32, i32) {
    %c0_i32 = arith.constant 0 : i32
    %c0_i32_0 = arith.constant 0 : i32
    return %arg0, %c0_i32 : i32, i32
  }
  func.func @transform_3(%arg0: i32) -> (i32, i32) {
    %c0_i32 = arith.constant 0 : i32
    %c0_i32_0 = arith.constant 0 : i32
    return %arg0, %c0_i32 : i32, i32
  }
}

module attributes {stable_mosaic.version = 11 : i64} {
  func.func @_packed_cmatmul_kernel(%arg0: i32, %arg1: memref<128x32xbf16, #tpu.memory_space<vmem>>, %arg2: memref<32x128xbf16, #tpu.memory_space<vmem>>, %arg3: memref<1x128xf32, #tpu.memory_space<vmem>>, %arg4: memref<128x128xf32, #tpu.memory_space<vmem>>) attributes {dimension_semantics = [#tpu.dimension_semantics<parallel>], iteration_bounds = array<i64: 1>, scalar_prefetch = 0 : i64, scratch_operands = 0 : i64, tpu.core_type = #tpu.core_type<tc>, window_params = [{transform_indices = @transform_0, window_bounds = array<i64: 128, 32>}, {pipeline_mode = #tpu.pipeline_mode<synchronous>, transform_indices = @transform_1, window_bounds = array<i64: 32, 128>}, {pipeline_mode = #tpu.pipeline_mode<synchronous>, transform_indices = @transform_2, window_bounds = array<i64: 1, 128>}, {transform_indices = @transform_3, window_bounds = array<i64: 128, 128>}]} {
    %c0 = arith.constant 0 : index
    %c0_0 = arith.constant 0 : index
    %0 = vector.load %arg1[%c0, %c0_0] : memref<128x32xbf16, #tpu.memory_space<vmem>>, vector<128x32xbf16>
    %c0_1 = arith.constant 0 : index
    %c0_2 = arith.constant 0 : index
    %1 = vector.load %arg2[%c0_1, %c0_2] : memref<32x128xbf16, #tpu.memory_space<vmem>>, vector<32x128xbf16>
    %cst = arith.constant dense<0.000000e+00> : vector<128x128xf32>
    %2 = tpu.matmul %0, %1, %cst {dimension_numbers = #tpu.dot_dimension_numbers<[1], [0], [0], [1], [0, 0, 1, 1], [], []>} : vector<128x32xbf16>, vector<32x128xbf16>, vector<128x128xf32> -> vector<128x128xf32>
    %c0_3 = arith.constant 0 : index
    %c0_4 = arith.constant 0 : index
    %3 = vector.load %arg3[%c0_3, %c0_4] : memref<1x128xf32, #tpu.memory_space<vmem>>, vector<1x128xf32>
    %4 = vector.broadcast %3 : vector<1x128xf32> to vector<128x128xf32>
    %5 = arith.addf %2, %4 : vector<128x128xf32>
    %cst_5 = arith.constant 0.000000e+00 : f32
    %6 = vector.broadcast %cst_5 : f32 to vector<128x128xf32>
    %7 = arith.maximumf %5, %6 : vector<128x128xf32>
    %c0_6 = arith.constant 0 : index
    %c0_7 = arith.constant 0 : index
    %8 = vector.load %arg4[%c0_6, %c0_7] : memref<128x128xf32, #tpu.memory_space<vmem>>, vector<128x128xf32>
    tpu.vector_store %arg4[%c0_6, %c0_7], %7 {strides = array<i32>} : memref<128x128xf32, #tpu.memory_space<vmem>>, vector<128x128xf32>,
    return
  }
  func.func @transform_0(%arg0: i32) -> (i32, i32) {
    %c0_i32 = arith.constant 0 : i32
    %c0_i32_0 = arith.constant 0 : i32
    return %arg0, %c0_i32 : i32, i32
  }
  func.func @transform_1(%arg0: i32) -> (i32, i32) {
    %c0_i32 = arith.constant 0 : i32
    %c0_i32_0 = arith.constant 0 : i32
    %c0_i32_1 = arith.constant 0 : i32
    return %c0_i32, %c0_i32_0 : i32, i32
  }
  func.func @transform_2(%arg0: i32) -> (i32, i32) {
    %c0_i32 = arith.constant 0 : i32
    %c0_i32_0 = arith.constant 0 : i32
    %c0_i32_1 = arith.constant 0 : i32
    return %c0_i32, %c0_i32_0 : i32, i32
  }
  func.func @transform_3(%arg0: i32) -> (i32, i32) {
    %c0_i32 = arith.constant 0 : i32
    %c0_i32_0 = arith.constant 0 : i32
    return %arg0, %c0_i32 : i32, i32
  }
}

module attributes {stable_mosaic.version = 11 : i64} {
  func.func @_packed_cmatmul_kernel(%arg0: i32, %arg1: memref<32x80xbf16, #tpu.memory_space<vmem>>, %arg2: memref<80x128xbf16, #tpu.memory_space<vmem>>, %arg3: memref<1x128xf32, #tpu.memory_space<vmem>>, %arg4: memref<32x128xf32, #tpu.memory_space<vmem>>) attributes {dimension_semantics = [#tpu.dimension_semantics<parallel>], iteration_bounds = array<i64: 1>, scalar_prefetch = 0 : i64, scratch_operands = 0 : i64, tpu.core_type = #tpu.core_type<tc>, window_params = [{transform_indices = @transform_0, window_bounds = array<i64: 32, 80>}, {pipeline_mode = #tpu.pipeline_mode<synchronous>, transform_indices = @transform_1, window_bounds = array<i64: 80, 128>}, {pipeline_mode = #tpu.pipeline_mode<synchronous>, transform_indices = @transform_2, window_bounds = array<i64: 1, 128>}, {transform_indices = @transform_3, window_bounds = array<i64: 32, 128>}]} {
    %c0 = arith.constant 0 : index
    %c0_0 = arith.constant 0 : index
    %0 = vector.load %arg1[%c0, %c0_0] : memref<32x80xbf16, #tpu.memory_space<vmem>>, vector<32x80xbf16>
    %c0_1 = arith.constant 0 : index
    %c0_2 = arith.constant 0 : index
    %1 = vector.load %arg2[%c0_1, %c0_2] : memref<80x128xbf16, #tpu.memory_space<vmem>>, vector<80x128xbf16>
    %cst = arith.constant dense<0.000000e+00> : vector<32x128xf32>
    %2 = tpu.matmul %0, %1, %cst {dimension_numbers = #tpu.dot_dimension_numbers<[1], [0], [0], [1], [0, 0, 1, 1], [], []>} : vector<32x80xbf16>, vector<80x128xbf16>, vector<32x128xf32> -> vector<32x128xf32>
    %c0_3 = arith.constant 0 : index
    %c0_4 = arith.constant 0 : index
    %3 = vector.load %arg3[%c0_3, %c0_4] : memref<1x128xf32, #tpu.memory_space<vmem>>, vector<1x128xf32>
    %4 = vector.broadcast %3 : vector<1x128xf32> to vector<32x128xf32>
    %5 = arith.addf %2, %4 : vector<32x128xf32>
    %cst_5 = arith.constant 0.000000e+00 : f32
    %6 = vector.broadcast %cst_5 : f32 to vector<32x128xf32>
    %7 = arith.maximumf %5, %6 : vector<32x128xf32>
    %c0_6 = arith.constant 0 : index
    %c0_7 = arith.constant 0 : index
    %8 = vector.load %arg4[%c0_6, %c0_7] : memref<32x128xf32, #tpu.memory_space<vmem>>, vector<32x128xf32>
    tpu.vector_store %arg4[%c0_6, %c0_7], %7 {strides = array<i32>} : memref<32x128xf32, #tpu.memory_space<vmem>>, vector<32x128xf32>,
    return
  }
  func.func @transform_0(%arg0: i32) -> (i32, i32) {
    %c0_i32 = arith.constant 0 : i32
    %c0_i32_0 = arith.constant 0 : i32
    return %arg0, %c0_i32 : i32, i32
  }
  func.func @transform_1(%arg0: i32) -> (i32, i32) {
    %c0_i32 = arith.constant 0 : i32
    %c0_i32_0 = arith.constant 0 : i32
    %c0_i32_1 = arith.constant 0 : i32
    return %c0_i32, %c0_i32_0 : i32, i32
  }
  func.func @transform_2(%arg0: i32) -> (i32, i32) {
    %c0_i32 = arith.constant 0 : i32
    %c0_i32_0 = arith.constant 0 : i32
    %c0_i32_1 = arith.constant 0 : i32
    return %c0_i32, %c0_i32_0 : i32, i32
  }
  func.func @transform_3(%arg0: i32) -> (i32, i32) {
    %c0_i32 = arith.constant 0 : i32
    %c0_i32_0 = arith.constant 0 : i32
    return %arg0, %c0_i32 : i32, i32
  }
}

module attributes {stable_mosaic.version = 11 : i64} {
  func.func @_packed_cmatmul_kernel(%arg0: i32, %arg1: memref<16x144xbf16, #tpu.memory_space<vmem>>, %arg2: memref<144x128xbf16, #tpu.memory_space<vmem>>, %arg3: memref<1x128xf32, #tpu.memory_space<vmem>>, %arg4: memref<16x128xf32, #tpu.memory_space<vmem>>) attributes {dimension_semantics = [#tpu.dimension_semantics<parallel>], iteration_bounds = array<i64: 1>, scalar_prefetch = 0 : i64, scratch_operands = 0 : i64, tpu.core_type = #tpu.core_type<tc>, window_params = [{transform_indices = @transform_0, window_bounds = array<i64: 16, 144>}, {pipeline_mode = #tpu.pipeline_mode<synchronous>, transform_indices = @transform_1, window_bounds = array<i64: 144, 128>}, {pipeline_mode = #tpu.pipeline_mode<synchronous>, transform_indices = @transform_2, window_bounds = array<i64: 1, 128>}, {transform_indices = @transform_3, window_bounds = array<i64: 16, 128>}]} {
    %c0 = arith.constant 0 : index
    %c0_0 = arith.constant 0 : index
    %0 = vector.load %arg1[%c0, %c0_0] : memref<16x144xbf16, #tpu.memory_space<vmem>>, vector<16x144xbf16>
    %c0_1 = arith.constant 0 : index
    %c0_2 = arith.constant 0 : index
    %1 = vector.load %arg2[%c0_1, %c0_2] : memref<144x128xbf16, #tpu.memory_space<vmem>>, vector<144x128xbf16>
    %cst = arith.constant dense<0.000000e+00> : vector<16x128xf32>
    %2 = tpu.matmul %0, %1, %cst {dimension_numbers = #tpu.dot_dimension_numbers<[1], [0], [0], [1], [0, 0, 1, 1], [], []>} : vector<16x144xbf16>, vector<144x128xbf16>, vector<16x128xf32> -> vector<16x128xf32>
    %c0_3 = arith.constant 0 : index
    %c0_4 = arith.constant 0 : index
    %3 = vector.load %arg3[%c0_3, %c0_4] : memref<1x128xf32, #tpu.memory_space<vmem>>, vector<1x128xf32>
    %4 = vector.broadcast %3 : vector<1x128xf32> to vector<16x128xf32>
    %5 = arith.addf %2, %4 : vector<16x128xf32>
    %cst_5 = arith.constant 0.000000e+00 : f32
    %6 = vector.broadcast %cst_5 : f32 to vector<16x128xf32>
    %7 = arith.maximumf %5, %6 : vector<16x128xf32>
    %c0_6 = arith.constant 0 : index
    %c0_7 = arith.constant 0 : index
    %8 = vector.load %arg4[%c0_6, %c0_7] : memref<16x128xf32, #tpu.memory_space<vmem>>, vector<16x128xf32>
    tpu.vector_store %arg4[%c0_6, %c0_7], %7 {strides = array<i32>} : memref<16x128xf32, #tpu.memory_space<vmem>>, vector<16x128xf32>,
    return
  }
  func.func @transform_0(%arg0: i32) -> (i32, i32) {
    %c0_i32 = arith.constant 0 : i32
    %c0_i32_0 = arith.constant 0 : i32
    return %arg0, %c0_i32 : i32, i32
  }
  func.func @transform_1(%arg0: i32) -> (i32, i32) {
    %c0_i32 = arith.constant 0 : i32
    %c0_i32_0 = arith.constant 0 : i32
    %c0_i32_1 = arith.constant 0 : i32
    return %c0_i32, %c0_i32_0 : i32, i32
  }
  func.func @transform_2(%arg0: i32) -> (i32, i32) {
    %c0_i32 = arith.constant 0 : i32
    %c0_i32_0 = arith.constant 0 : i32
    %c0_i32_1 = arith.constant 0 : i32
    return %c0_i32, %c0_i32_0 : i32, i32
  }
  func.func @transform_3(%arg0: i32) -> (i32, i32) {
    %c0_i32 = arith.constant 0 : i32
    %c0_i32_0 = arith.constant 0 : i32
    return %arg0, %c0_i32 : i32, i32
  }
}

module attributes {stable_mosaic.version = 11 : i64} {
  func.func @_packed_cmatmul_kernel(%arg0: i32, %arg1: memref<16x288xbf16, #tpu.memory_space<vmem>>, %arg2: memref<288x128xbf16, #tpu.memory_space<vmem>>, %arg3: memref<1x128xf32, #tpu.memory_space<vmem>>, %arg4: memref<16x128xf32, #tpu.memory_space<vmem>>) attributes {dimension_semantics = [#tpu.dimension_semantics<parallel>], iteration_bounds = array<i64: 1>, scalar_prefetch = 0 : i64, scratch_operands = 0 : i64, tpu.core_type = #tpu.core_type<tc>, window_params = [{transform_indices = @transform_0, window_bounds = array<i64: 16, 288>}, {pipeline_mode = #tpu.pipeline_mode<synchronous>, transform_indices = @transform_1, window_bounds = array<i64: 288, 128>}, {pipeline_mode = #tpu.pipeline_mode<synchronous>, transform_indices = @transform_2, window_bounds = array<i64: 1, 128>}, {transform_indices = @transform_3, window_bounds = array<i64: 16, 128>}]} {
    %c0 = arith.constant 0 : index
    %c0_0 = arith.constant 0 : index
    %0 = vector.load %arg1[%c0, %c0_0] : memref<16x288xbf16, #tpu.memory_space<vmem>>, vector<16x288xbf16>
    %c0_1 = arith.constant 0 : index
    %c0_2 = arith.constant 0 : index
    %1 = vector.load %arg2[%c0_1, %c0_2] : memref<288x128xbf16, #tpu.memory_space<vmem>>, vector<288x128xbf16>
    %cst = arith.constant dense<0.000000e+00> : vector<16x128xf32>
    %2 = tpu.matmul %0, %1, %cst {dimension_numbers = #tpu.dot_dimension_numbers<[1], [0], [0], [1], [0, 0, 1, 1], [], []>} : vector<16x288xbf16>, vector<288x128xbf16>, vector<16x128xf32> -> vector<16x128xf32>
    %c0_3 = arith.constant 0 : index
    %c0_4 = arith.constant 0 : index
    %3 = vector.load %arg3[%c0_3, %c0_4] : memref<1x128xf32, #tpu.memory_space<vmem>>, vector<1x128xf32>
    %4 = vector.broadcast %3 : vector<1x128xf32> to vector<16x128xf32>
    %5 = arith.addf %2, %4 : vector<16x128xf32>
    %cst_5 = arith.constant 0.000000e+00 : f32
    %6 = vector.broadcast %cst_5 : f32 to vector<16x128xf32>
    %7 = arith.maximumf %5, %6 : vector<16x128xf32>
    %c0_6 = arith.constant 0 : index
    %c0_7 = arith.constant 0 : index
    %8 = vector.load %arg4[%c0_6, %c0_7] : memref<16x128xf32, #tpu.memory_space<vmem>>, vector<16x128xf32>
    tpu.vector_store %arg4[%c0_6, %c0_7], %7 {strides = array<i32>} : memref<16x128xf32, #tpu.memory_space<vmem>>, vector<16x128xf32>,
    return
  }
  func.func @transform_0(%arg0: i32) -> (i32, i32) {
    %c0_i32 = arith.constant 0 : i32
    %c0_i32_0 = arith.constant 0 : i32
    return %arg0, %c0_i32 : i32, i32
  }
  func.func @transform_1(%arg0: i32) -> (i32, i32) {
    %c0_i32 = arith.constant 0 : i32
    %c0_i32_0 = arith.constant 0 : i32
    %c0_i32_1 = arith.constant 0 : i32
    return %c0_i32, %c0_i32_0 : i32, i32
  }
  func.func @transform_2(%arg0: i32) -> (i32, i32) {
    %c0_i32 = arith.constant 0 : i32
    %c0_i32_0 = arith.constant 0 : i32
    %c0_i32_1 = arith.constant 0 : i32
    return %c0_i32, %c0_i32_0 : i32, i32
  }
  func.func @transform_3(%arg0: i32) -> (i32, i32) {
    %c0_i32 = arith.constant 0 : i32
    %c0_i32_0 = arith.constant 0 : i32
    return %arg0, %c0_i32 : i32, i32
  }
}

module attributes {stable_mosaic.version = 11 : i64} {
  func.func @_packed_cmatmul_kernel(%arg0: i32, %arg1: memref<32x144xbf16, #tpu.memory_space<vmem>>, %arg2: memref<144x128xbf16, #tpu.memory_space<vmem>>, %arg3: memref<1x128xf32, #tpu.memory_space<vmem>>, %arg4: memref<32x128xf32, #tpu.memory_space<vmem>>) attributes {dimension_semantics = [#tpu.dimension_semantics<parallel>], iteration_bounds = array<i64: 1>, scalar_prefetch = 0 : i64, scratch_operands = 0 : i64, tpu.core_type = #tpu.core_type<tc>, window_params = [{transform_indices = @transform_0, window_bounds = array<i64: 32, 144>}, {pipeline_mode = #tpu.pipeline_mode<synchronous>, transform_indices = @transform_1, window_bounds = array<i64: 144, 128>}, {pipeline_mode = #tpu.pipeline_mode<synchronous>, transform_indices = @transform_2, window_bounds = array<i64: 1, 128>}, {transform_indices = @transform_3, window_bounds = array<i64: 32, 128>}]} {
    %c0 = arith.constant 0 : index
    %c0_0 = arith.constant 0 : index
    %0 = vector.load %arg1[%c0, %c0_0] : memref<32x144xbf16, #tpu.memory_space<vmem>>, vector<32x144xbf16>
    %c0_1 = arith.constant 0 : index
    %c0_2 = arith.constant 0 : index
    %1 = vector.load %arg2[%c0_1, %c0_2] : memref<144x128xbf16, #tpu.memory_space<vmem>>, vector<144x128xbf16>
    %cst = arith.constant dense<0.000000e+00> : vector<32x128xf32>
    %2 = tpu.matmul %0, %1, %cst {dimension_numbers = #tpu.dot_dimension_numbers<[1], [0], [0], [1], [0, 0, 1, 1], [], []>} : vector<32x144xbf16>, vector<144x128xbf16>, vector<32x128xf32> -> vector<32x128xf32>
    %c0_3 = arith.constant 0 : index
    %c0_4 = arith.constant 0 : index
    %3 = vector.load %arg3[%c0_3, %c0_4] : memref<1x128xf32, #tpu.memory_space<vmem>>, vector<1x128xf32>
    %4 = vector.broadcast %3 : vector<1x128xf32> to vector<32x128xf32>
    %5 = arith.addf %2, %4 : vector<32x128xf32>
    %cst_5 = arith.constant 0.000000e+00 : f32
    %6 = vector.broadcast %cst_5 : f32 to vector<32x128xf32>
    %7 = arith.maximumf %5, %6 : vector<32x128xf32>
    %c0_6 = arith.constant 0 : index
    %c0_7 = arith.constant 0 : index
    %8 = vector.load %arg4[%c0_6, %c0_7] : memref<32x128xf32, #tpu.memory_space<vmem>>, vector<32x128xf32>
    tpu.vector_store %arg4[%c0_6, %c0_7], %7 {strides = array<i32>} : memref<32x128xf32, #tpu.memory_space<vmem>>, vector<32x128xf32>,
    return
  }
  func.func @transform_0(%arg0: i32) -> (i32, i32) {
    %c0_i32 = arith.constant 0 : i32
    %c0_i32_0 = arith.constant 0 : i32
    return %arg0, %c0_i32 : i32, i32
  }
  func.func @transform_1(%arg0: i32) -> (i32, i32) {
    %c0_i32 = arith.constant 0 : i32
    %c0_i32_0 = arith.constant 0 : i32
    %c0_i32_1 = arith.constant 0 : i32
    return %c0_i32, %c0_i32_0 : i32, i32
  }
  func.func @transform_2(%arg0: i32) -> (i32, i32) {
    %c0_i32 = arith.constant 0 : i32
    %c0_i32_0 = arith.constant 0 : i32
    %c0_i32_1 = arith.constant 0 : i32
    return %c0_i32, %c0_i32_0 : i32, i32
  }
  func.func @transform_3(%arg0: i32) -> (i32, i32) {
    %c0_i32 = arith.constant 0 : i32
    %c0_i32_0 = arith.constant 0 : i32
    return %arg0, %c0_i32 : i32, i32
  }
}

module attributes {stable_mosaic.version = 11 : i64} {
  func.func @_packed_cmatmul_atan2_kernel(%arg0: i32, %arg1: memref<128x80xbf16, #tpu.memory_space<vmem>>, %arg2: memref<80x128xbf16, #tpu.memory_space<vmem>>, %arg3: memref<80x128xbf16, #tpu.memory_space<vmem>>, %arg4: memref<1x128xf32, #tpu.memory_space<vmem>>, %arg5: memref<1x128xf32, #tpu.memory_space<vmem>>, %arg6: memref<128x128xf32, #tpu.memory_space<vmem>>) attributes {dimension_semantics = [#tpu.dimension_semantics<parallel>], iteration_bounds = array<i64: 1>, scalar_prefetch = 0 : i64, scratch_operands = 0 : i64, tpu.core_type = #tpu.core_type<tc>, window_params = [{transform_indices = @transform_0, window_bounds = array<i64: 128, 80>}, {pipeline_mode = #tpu.pipeline_mode<synchronous>, transform_indices = @transform_1, window_bounds = array<i64: 80, 128>}, {pipeline_mode = #tpu.pipeline_mode<synchronous>, transform_indices = @transform_2, window_bounds = array<i64: 80, 128>}, {pipeline_mode = #tpu.pipeline_mode<synchronous>, transform_indices = @transform_3, window_bounds = array<i64: 1, 128>}, {pipeline_mode = #tpu.pipeline_mode<synchronous>, transform_indices = @transform_4, window_bounds = array<i64: 1, 128>}, {transform_indices = @transform_5, window_bounds = array<i64: 128, 128>}]} {
    %c0 = arith.constant 0 : index
    %c0_0 = arith.constant 0 : index
    %0 = vector.load %arg1[%c0, %c0_0] : memref<128x80xbf16, #tpu.memory_space<vmem>>, vector<128x80xbf16>
    %c0_1 = arith.constant 0 : index
    %c0_2 = arith.constant 0 : index
    %1 = vector.load %arg2[%c0_1, %c0_2] : memref<80x128xbf16, #tpu.memory_space<vmem>>, vector<80x128xbf16>
    %cst = arith.constant dense<0.000000e+00> : vector<128x128xf32>
    %2 = tpu.matmul %0, %1, %cst {dimension_numbers = #tpu.dot_dimension_numbers<[1], [0], [0], [1], [0, 0, 1, 1], [], []>} : vector<128x80xbf16>, vector<80x128xbf16>, vector<128x128xf32> -> vector<128x128xf32>
    %c0_3 = arith.constant 0 : index
    %c0_4 = arith.constant 0 : index
    %3 = vector.load %arg4[%c0_3, %c0_4] : memref<1x128xf32, #tpu.memory_space<vmem>>, vector<1x128xf32>
    %4 = vector.broadcast %3 : vector<1x128xf32> to vector<128x128xf32>
    %5 = arith.addf %2, %4 : vector<128x128xf32>
    %c0_5 = arith.constant 0 : index
    %c0_6 = arith.constant 0 : index
    %6 = vector.load %arg3[%c0_5, %c0_6] : memref<80x128xbf16, #tpu.memory_space<vmem>>, vector<80x128xbf16>
    %cst_7 = arith.constant dense<0.000000e+00> : vector<128x128xf32>
    %7 = tpu.matmul %0, %6, %cst_7 {dimension_numbers = #tpu.dot_dimension_numbers<[1], [0], [0], [1], [0, 0, 1, 1], [], []>} : vector<128x80xbf16>, vector<80x128xbf16>, vector<128x128xf32> -> vector<128x128xf32>
    %c0_8 = arith.constant 0 : index
    %c0_9 = arith.constant 0 : index
    %8 = vector.load %arg5[%c0_8, %c0_9] : memref<1x128xf32, #tpu.memory_space<vmem>>, vector<1x128xf32>
    %9 = vector.broadcast %8 : vector<1x128xf32> to vector<128x128xf32>
    %10 = arith.addf %7, %9 : vector<128x128xf32>
    %11 = math.atan2 %10, %5 : vector<128x128xf32>
    %c0_10 = arith.constant 0 : index
    %c0_11 = arith.constant 0 : index
    %12 = vector.load %arg6[%c0_10, %c0_11] : memref<128x128xf32, #tpu.memory_space<vmem>>, vector<128x128xf32>
    tpu.vector_store %arg6[%c0_10, %c0_11], %11 {strides = array<i32>} : memref<128x128xf32, #tpu.memory_space<vmem>>, vector<128x128xf32>,
    return
  }
  func.func @transform_0(%arg0: i32) -> (i32, i32) {
    %c0_i32 = arith.constant 0 : i32
    %c0_i32_0 = arith.constant 0 : i32
    return %arg0, %c0_i32 : i32, i32
  }
  func.func @transform_1(%arg0: i32) -> (i32, i32) {
    %c0_i32 = arith.constant 0 : i32
    %c0_i32_0 = arith.constant 0 : i32
    %c0_i32_1 = arith.constant 0 : i32
    return %c0_i32, %c0_i32_0 : i32, i32
  }
  func.func @transform_2(%arg0: i32) -> (i32, i32) {
    %c0_i32 = arith.constant 0 : i32
    %c0_i32_0 = arith.constant 0 : i32
    %c0_i32_1 = arith.constant 0 : i32
    return %c0_i32, %c0_i32_0 : i32, i32
  }
  func.func @transform_3(%arg0: i32) -> (i32, i32) {
    %c0_i32 = arith.constant 0 : i32
    %c0_i32_0 = arith.constant 0 : i32
    %c0_i32_1 = arith.constant 0 : i32
    return %c0_i32, %c0_i32_0 : i32, i32
  }
  func.func @transform_4(%arg0: i32) -> (i32, i32) {
    %c0_i32 = arith.constant 0 : i32
    %c0_i32_0 = arith.constant 0 : i32
    %c0_i32_1 = arith.constant 0 : i32
    return %c0_i32, %c0_i32_0 : i32, i32
  }
  func.func @transform_5(%arg0: i32) -> (i32, i32) {
    %c0_i32 = arith.constant 0 : i32
    %c0_i32_0 = arith.constant 0 : i32
    return %arg0, %c0_i32 : i32, i32
  }
}

</mosaic_0001>

<bundles_post_ra>
// kernel: mw_canet_forward.9
= control target key start
LH: loop header
LB: loop body
LE: loop exit
PB: predicated region body
PF: predicated region fallthrough
CT: control target
= control target key end

     0   :  { %v1315_v28 = vmov 683565275   ;;  %v1316_v30 = vmov 2475754826   ;;  %v1317_v32 = vmov 2131351028   ;;  %s1887_s1 = inlined_call_operand.vmem [shape: f32[8,512], index: 1, kind: input, shape index: {}]   ;;  %s1888_s0 = inlined_call_operand.vmem [shape: f32[8,512], index: 0, kind: input, shape index: {}]   ;;  %s1889_s2 = inlined_call_operand.vmem [shape: f32[8,512], index: 2, kind: output, shape index: {0}]   ;;  %s1890_s3 = inlined_call_operand.vmem [shape: f32[8,512], index: 3, kind: output, shape index: {1}]  }
   0x1   :  { %v1345_v0 = vld [vmem:[%s1887_s1] sm:$0xff]  ;;  %v1350_v1 = vld [vmem:[%s1887_s1 + $0x8] sm:$0xff]  ;;  %v1355_v2 = vld [vmem:[%s1887_s1 + $0x10] sm:$0xff]  ;;  %v1318_v34 = vmov 2102212464  }
   0x2   :  { %v21_v3 = vand.u32 2147483647, %v1345_v0  ;;  %v24_v4 = vand.u32 2139095040, %v1345_v0  ;;  %v175_v5 = vand.u32 2147483647, %v1350_v1  ;;  %v178_v6 = vand.u32 2139095040, %v1350_v1 }
   0x3   :  { %v332_v7 = vand.u32 2139095040, %v1355_v2  ;;  %v1319_v36 = vmov 920167782   ;;  %v1320_v45 = vmov 1326507024  }
   0x4   :  { %v25_v8 = vshrl.u32 %v24_v4, 23  ;;  %v28_v9 = vand.u32 8388607, %v21_v3  ;;  %v179_v10 = vshrl.u32 %v178_v6, 23  ;;  %v182_v11 = vand.u32 8388607, %v175_v5 }
   0x5   :  { %v333_v15 = vshrl.u32 %v332_v7, 23 }
   0x6   :  { %v1281_v12 = vadd.s32 4294967169, %v25_v8  ;;  %v29_v13 = vor.u32 8388608, %v28_v9  ;;  %v1284_v14 = vadd.s32 4294967169, %v179_v10  ;;  %v183_v17 = vor.u32 8388608, %v182_v11 }
   0x7   :  { %v1287_v21 = vadd.s32 4294967169, %v333_v15 }
   0x8   :  { %v31_v16 = vadd.s32 1, %v1281_v12  ;;  %v185_v18 = vadd.s32 1, %v1284_v14  ;;  %v1366_v20 = vshll.u32 %v29_v13, 8  ;;  %v1372_v26 = vshll.u32 %v183_v17, 8 }
   0x9   :  { %v1380_v39 = vadd.s32 1, %v1287_v21 }
   0xa   :  { %vm32_vm0 = vcmp.gt.s32.totalorder %v31_v16, 0  ;;  %vm186_vm1 = vcmp.gt.s32.totalorder %v185_v18, 0  ;;  %v70_v38 = vand.u32 65535, %v1366_v20  ;;  %v71_v43 = vshrl.u32 %v1366_v20, 16 }
   0xb   :  { %v33_v19 = vsel %vm32_vm0, %v31_v16, 0  ;;  %v187_v23 = vsel %vm186_vm1, %v185_v18, 0  ;;  %vm340_vm15 = vcmp.gt.s32.totalorder %v1380_v39, 0 }
   0xc   :  { %v35_v22 = vand.u32 31, %v33_v19  ;;  %v1368_v24 = vshrl.u32 %v33_v19, 5  ;;  %v1370_v25 = vand.u32 31, %v187_v23  ;;  %v1400_v56 = vshrl.u32 %v187_v23, 5 }
   0xe   :  { %v36_v27 = vsub.s32 32, %v35_v22  ;;  %v38_v29 = vshll.u32 %v1315_v28, %v35_v22  ;;  %v41_v31 = vshll.u32 %v1316_v30, %v35_v22  ;;  %v44_v33 = vshll.u32 %v1317_v32, %v35_v22 }
   0xf   :  { %v47_v35 = vshll.u32 %v1318_v34, %v35_v22  ;;  %v50_v37 = vshll.u32 %v1319_v36, %v35_v22  ;;  %vm53_vm2 = vcmp.lt.s32.totalorder %v1368_v24, 1  ;;  %vm56_vm3 = vcmp.lt.s32.totalorder %v1368_v24, 4 }
  0x10   :  { %v39_v40 = vshrl.u32 %v1316_v30, %v36_v27  ;;  %v42_v41 = vshrl.u32 %v1317_v32, %v36_v27  ;;  %v45_v42 = vshrl.u32 %v1318_v34, %v36_v27  ;;  %v48_v44 = vshrl.u32 %v1319_v36, %v36_v27 }
  0x11   :  { %v51_v46 = vshrl.u32 %v1320_v45, %v36_v27  ;;  %v1391_v50 = vsub.s32 32, %v1370_v25  ;;  %v37_v51 = vshrl.u32 %v1315_v28, %v36_v27  ;;  %vm55_vm4 = vcmp.lt.s32.totalorder %v1368_v24, 3 }
  0x12   :  { %v40_v47 = vor.u32 %v39_v40, %v38_v29  ;;  %v43_v48 = vor.u32 %v42_v41, %v41_v31  ;;  %v46_v49 = vor.u32 %v45_v42, %v44_v33  ;;  %v49_v52 = vor.u32 %v48_v44, %v47_v35 }
  0x13   :  { %v52_v53 = vor.u32 %v51_v46, %v50_v37  ;;  %vm54_vm5 = vcmp.lt.s32.totalorder %v1368_v24, 2  ;;  %v192_v59 = vshll.u32 %v1315_v28, %v1370_v25  ;;  %v195_v60 = vshll.u32 %v1316_v30, %v1370_v25 }
  0x14   :  { %v61_v54 = vsel %vm53_vm2, %v40_v47, %v43_v48  ;;  %v65_v55 = vsel %vm53_vm2, %v43_v48, %v46_v49  ;;  %v62_v57 = vsel %vm56_vm3, %v49_v52, 920167782  ;;  %v58_v61 = vsel %vm56_vm3, %v46_v49, 2102212464 }
  0x15   :  { %v66_v58 = vsel %vm56_vm3, %v52_v53, 1326507024  ;;  %v63_v62 = vsel %vm55_vm4, %v46_v49, %v62_v57  ;;  %v193_v4 = vshrl.u32 %v1316_v30, %v1391_v50  ;;  %v57_v6 = vsel %vm53_vm2, %v37_v51, %v40_v47 }
  0x16   :  { %v67_v63 = vsel %vm55_vm4, %v49_v52, %v66_v58  ;;  %v64_v7 = vsel %vm54_vm5, %v61_v54, %v63_v62  ;;  %v196_v9 = vshrl.u32 %v1317_v32, %v1391_v50  ;;  %v59_v14 = vsel %vm55_vm4, %v43_v48, %v58_v61 }
  0x17   :  { %v68_v8 = vsel %vm54_vm5, %v65_v55, %v67_v63  ;;  %v94_v12 = vand.u32 65535, %v64_v7  ;;  %v95_v13 = vshrl.u32 %v64_v7, 16  ;;  %v1428_v15 = vor.u32 %v193_v4, %v192_v59 }
  0x18   :  { %v72_v10 = vand.u32 65535, %v68_v8  ;;  %v73_v11 = vshrl.u32 %v68_v8, 16  ;;  %v1430_v16 = vor.u32 %v196_v9, %v195_v60  ;;  %v198_v17 = vshll.u32 %v1317_v32, %v1370_v25 }
  0x19   :  { %v199_v22 = vshrl.u32 %v1318_v34, %v1391_v50  ;;  %v96_v27 = vmul.u32 %v94_v12, %v70_v38  ;;  %v97_v29 = vmul.u32 %v95_v13, %v70_v38  ;;  %v98_v31 = vmul.u32 %v94_v12, %v71_v43 }
  0x1a   :  { %v74_v18 = vmul.u32 %v72_v10, %v70_v38  ;;  %v75_v19 = vmul.u32 %v73_v11, %v70_v38  ;;  %v76_v21 = vmul.u32 %v72_v10, %v71_v43  ;;  %v77_v23 = vmul.u32 %v73_v11, %v71_v43 }
  0x1b   :  { %v99_v40 = vmul.u32 %v95_v13, %v71_v43  ;;  %v100_v42 = vshll.u32 %v97_v29, 16  ;;  %v101_v44 = vshrl.u32 %v97_v29, 16  ;;  %v102_v46 = vshll.u32 %v98_v31, 16 }
  0x1c   :  { %v78_v33 = vshll.u32 %v75_v19, 16  ;;  %v79_v35 = vshrl.u32 %v75_v19, 16  ;;  %v80_v37 = vshll.u32 %v76_v21, 16  ;;  %v81_v41 = vshrl.u32 %v76_v21, 16 }
  0x1d   :  { %v103_v48 = vshrl.u32 %v98_v31, 16  ;;  %v201_v49 = vshll.u32 %v1318_v34, %v1370_v25  ;;  %v1321_v51 = vmov 0   ;;  %vm104_vm7 = vc.u32 %v96_v27, %v100_v42 }
  0x1e   :  { %vm82_vm6 = vc.u32 %v74_v18, %v78_v33  ;;  %v84_v47 = vadd.s32 %v78_v33, %v74_v18  ;;  %v106_v38 = vadd.s32 %v100_v42, %v96_v27  ;;  %v202_v53 = vshrl.u32 %v1319_v36, %v1391_v50 }
  0x1f   :  { %v83_v52 = vsel %vm82_vm6, 1, %v1321_v51  ;;  %v105_v43 = vsel %vm104_vm7, 1, %v1321_v51  ;;  %v204_v55 = vshll.u32 %v1319_v36, %v1370_v25  ;;  %v200_v59 = vor.u32 %v199_v22, %v198_v17 }
  0x20   :  { %v85_v54 = vadd.s32 %v83_v52, %v77_v23  ;;  %vm86_vm8 = vc.u32 %v84_v47, %v80_v37  ;;  %v107_v58 = vadd.s32 %v105_v43, %v99_v40  ;;  %vm108_vm9 = vc.u32 %v106_v38, %v102_v46 }
  0x21   :  { %v87_v57 = vsel %vm86_vm8, 1, %v1321_v51  ;;  %v109_v61 = vsel %vm108_vm9, 1, %v1321_v51  ;;  %v203_v62 = vor.u32 %v202_v53, %v201_v49  ;;  %v205_v63 = vshrl.u32 %v1320_v45, %v1391_v50 }
  0x22   :  { %v89_v60 = vadd.s32 %v87_v57, %v85_v54  ;;  %v1448_v4 = vadd.s32 %v106_v38, %v102_v46  ;;  %v111_v7 = vadd.s32 %v109_v61, %v107_v58  ;;  %vm207_vm10 = vcmp.lt.s32.totalorder %v1400_v56, 1 }
  0x23   :  { %vm209_vm11 = vcmp.lt.s32.totalorder %v1400_v56, 3  ;;  %v206_v8 = vor.u32 %v205_v63, %v204_v55  ;;  %vm208_vm12 = vcmp.lt.s32.totalorder %v1400_v56, 2  ;;  %vm210_vm13 = vcmp.lt.s32.totalorder %v1400_v56, 4 }
  0x24   :  { %v90_v25 = vadd.s32 %v89_v60, %v79_v35  ;;  %v60_v9 = vsel %vm54_vm5, %v57_v6, %v59_v14  ;;  %v112_v10 = vadd.s32 %v111_v7, %v101_v44  ;;  %v215_v11 = vsel %vm207_vm10, %v1428_v15, %v1430_v16 }
  0x25   :  { %v216_v12 = vsel %vm210_vm13, %v203_v62, 920167782  ;;  %v219_v18 = vsel %vm207_vm10, %v1430_v16, %v200_v59  ;;  %v224_v24 = vand.u32 65535, %v1372_v26  ;;  %v220_v19 = vsel %vm210_vm13, %v206_v8, 1326507024 }
  0x26   :  { %v1462_v13 = vadd.s32 %v90_v25, %v81_v41  ;;  %v217_v17 = vsel %vm209_vm11, %v200_v59, %v216_v12  ;;  %v113_v6 = vadd.s32 %v112_v10, %v103_v48  ;;  %v225_v21 = vshrl.u32 %v1372_v26, 16 }
  0x27   :  { %v218_v14 = vsel %vm208_vm12, %v215_v11, %v217_v17  ;;  %v114_v22 = vmul.u32 %v1366_v20, %v60_v9  ;;  %v221_v23 = vsel %vm209_vm11, %v203_v62, %v220_v19  ;;  %v191_v35 = vshrl.u32 %v1315_v28, %v1391_v50 }
  0x28   :  { %vm116_vm14 = vc.u32 %v1462_v13, %v1448_v4  ;;  %v248_v27 = vand.u32 65535, %v218_v14  ;;  %v117_v29 = vadd.s32 1, %v113_v6  ;;  %v222_v31 = vsel %vm208_vm12, %v219_v18, %v221_v23 }
  0x29   :  { %v249_v33 = vshrl.u32 %v218_v14, 16  ;;  %v226_v37 = vand.u32 65535, %v222_v31  ;;  %v227_v40 = vshrl.u32 %v222_v31, 16  ;;  %v212_v41 = vsel %vm210_vm13, %v200_v59, 2102212464 }
  0x2a   :  { %v118_v20 = vsel %vm116_vm14, %v117_v29, %v113_v6  ;;  %v252_v44 = vmul.u32 %v248_v27, %v225_v21  ;;  %v250_v49 = vmul.u32 %v248_v27, %v224_v24  ;;  %v341_v53 = vsel %vm340_vm15, %v1380_v39, 0 }
  0x2b   :  { %v251_v42 = vmul.u32 %v249_v33, %v224_v24  ;;  %v119_v46 = vadd.s32 %v118_v20, %v114_v22  ;;  %v228_v47 = vmul.u32 %v226_v37, %v224_v24  ;;  %v229_v48 = vmul.u32 %v227_v40, %v224_v24 }
  0x2c   :  { %v230_v52 = vmul.u32 %v226_v37, %v225_v21  ;;  %v211_v50 = vsel %vm207_vm10, %v191_v35, %v1428_v15  ;;  %v231_v43 = vmul.u32 %v227_v40, %v225_v21  ;;  %v213_v57 = vsel %vm209_vm11, %v1430_v16, %v212_v41 }
  0x2d   :  { %v254_v38 = vshll.u32 %v251_v42, 16  ;;  %v120_v54 = vadd.s32 536870912, %v119_v46  ;;  %v232_v55 = vshll.u32 %v229_v48, 16  ;;  %v253_v59 = vmul.u32 %v249_v33, %v225_v21 }
  0x2e   :  { %v234_v58 = vshll.u32 %v230_v52, 16  ;;  %v256_v60 = vshll.u32 %v252_v44, 16  ;;  %v233_v39 = vshrl.u32 %v229_v48, 16  ;;  %v255_v9 = vshrl.u32 %v251_v42, 16 }
  0x2f   :  { %v1494_v61 = vshrl.u32 %v120_v54, 30  ;;  %vm236_vm0 = vc.u32 %v228_v47, %v232_v55  ;;  %v238_v62 = vadd.s32 %v232_v55, %v228_v47  ;;  %vm258_vm1 = vc.u32 %v250_v49, %v254_v38 }
  0x30   :  { %v237_v63 = vsel %vm236_vm0, 1, %v1321_v51  ;;  %v259_v7 = vsel %vm258_vm1, 1, %v1321_v51  ;;  %v260_v15 = vadd.s32 %v254_v38, %v250_v49  ;;  %v343_v11 = vand.u32 31, %v341_v53 }
  0x31   :  { %v122_v25 = vshll.u32 %v1494_v61, 30  ;;  %v239_v8 = vadd.s32 %v237_v63, %v231_v43  ;;  %vm240_vm2 = vc.u32 %v238_v62, %v234_v58  ;;  %v261_v10 = vadd.s32 %v259_v7, %v253_v59 }
  0x32   :  { %v241_v16 = vsel %vm240_vm2, 1, %v1321_v51  ;;  %vm262_vm3 = vc.u32 %v260_v15, %v256_v60  ;;  %v235_v17 = vshrl.u32 %v230_v52, 16  ;;  %v257_v6 = vshrl.u32 %v252_v44, 16 }
  0x33   :  { %v1500_v12 = vsub.s32 %v119_v46, %v122_v25  ;;  %v243_v18 = vadd.s32 %v241_v16, %v239_v8  ;;  %v263_v24 = vsel %vm262_vm3, 1, %v1321_v51  ;;  %v1505_v22 = vadd.s32 %v260_v15, %v256_v60 }
  0x34   :  { %v265_v14 = vadd.s32 %v263_v24, %v261_v10  ;;  %v214_v23 = vsel %vm208_vm12, %v211_v50, %v213_v57  ;;  %v1509_v29 = vsub.s32 32, %v343_v11  ;;  %v329_v40 = vand.u32 2147483647, %v1355_v2 }
  0x35   :  { %vm124_vm4 = vcmp.lt.s32.totalorder %v1500_v12, 0  ;;  %v125_v19 = vsub.s32 0, %v1500_v12  ;;  %v244_v21 = vadd.s32 %v243_v18, %v233_v39  ;;  %v268_v20 = vmul.u32 %v1372_v26, %v214_v23 }
  0x36   :  { %v266_v27 = vadd.s32 %v265_v14, %v255_v9  ;;  %v346_v41 = vshll.u32 %v1315_v28, %v343_v11  ;;  %v349_v56 = vshll.u32 %v1316_v30, %v343_v11  ;;  %v347_v44 = vshrl.u32 %v1316_v30, %v1509_v29 }
  0x37   :  { %v126_v31 = vsel %vm124_vm4, %v125_v19, %v1500_v12  ;;  %v1512_v33 = vadd.s32 %v244_v21, %v235_v17  ;;  %v355_v46 = vshll.u32 %v1318_v34, %v343_v11  ;;  %v356_v47 = vshrl.u32 %v1319_v36, %v1509_v29 }
  0x38   :  { %v127_v35 = vclz %v126_v31  ;;  %v267_v37 = vadd.s32 %v266_v27, %v257_v6  ;;  %v350_v26 = vshrl.u32 %v1317_v32, %v1509_v29  ;;  %v352_v49 = vshll.u32 %v1317_v32, %v343_v11 }
  0x39   :  { %vm270_vm5 = vc.u32 %v1512_v33, %v1505_v22  ;;  %v353_v52 = vshrl.u32 %v1318_v34, %v1509_v29  ;;  %v1530_v54 = vshrl.u32 %v341_v53, 5  ;;  %v336_v43 = vand.u32 8388607, %v329_v40 }
  0x3a   :  { %v271_v42 = vadd.s32 1, %v267_v37  ;;  %v1282_v48 = vadd.s32 4294967294, %v127_v35  ;;  %v358_v55 = vshll.u32 %v1319_v36, %v343_v11  ;;  %v359_v57 = vshrl.u32 %v1320_v45, %v1509_v29 }
  0x3b   :  { %v1537_v58 = vor.u32 %v347_v44, %v346_v41  ;;  %v357_v59 = vor.u32 %v356_v47, %v355_v46  ;;  %v1539_v62 = vor.u32 %v350_v26, %v349_v56  ;;  %v1541_v39 = vor.u32 %v353_v52, %v352_v49 }
  0x3c   :  { %v272_v38 = vsel %vm270_vm5, %v271_v42, %v267_v37  ;;  %vm1283_vm6 = vcmp.lt.s32.totalorder %v1282_v48, 0  ;;  %vm361_vm7 = vcmp.lt.s32.totalorder %v1530_v54, 1  ;;  %vm363_vm8 = vcmp.lt.s32.totalorder %v1530_v54, 3 }
  0x3d   :  { %v273_v50 = vadd.s32 %v272_v38, %v268_v20  ;;  %vm364_vm9 = vcmp.lt.s32.totalorder %v1530_v54, 4  ;;  %v337_v63 = vor.u32 8388608, %v336_v43  ;;  %v360_v7 = vor.u32 %v359_v57, %v358_v55 }
  0x3e   :  { %v130_v15 = vsel %vm1283_vm6, 0, %v1282_v48  ;;  %v370_v25 = vsel %vm364_vm9, %v357_v59, 920167782  ;;  %vm362_vm10 = vcmp.lt.s32.totalorder %v1530_v54, 2  ;;  %v369_v9 = vsel %vm361_vm7, %v1537_v58, %v1539_v62 }
  0x3f   :  { %v274_v60 = vadd.s32 536870912, %v273_v50  ;;  %v371_v16 = vsel %vm363_vm8, %v1541_v39, %v370_v25  ;;  %v373_v10 = vsel %vm361_vm7, %v1539_v62, %v1541_v39  ;;  %v135_v11 = vsub.s32 4294967266, %v130_v15 }
  0x40   :  { %v374_v18 = vsel %vm364_vm9, %v360_v7, 1326507024  ;;  %v1565_v24 = vshll.u32 %v337_v63, 8  ;;  %v115_v6 = vadd.s32 %v1448_v4, %v1462_v13  ;;  %v372_v14 = vsel %vm362_vm10, %v369_v9, %v371_v16 }
  0x41   :  { %v1546_v53 = vshrl.u32 %v274_v60, 30  ;;  %v375_v19 = vsel %vm363_vm8, %v357_v59, %v374_v18  ;;  %v131_v31 = vsub.s32 32, %v130_v15  ;;  %v136_v41 = vadd.s32 127, %v135_v11 }
  0x42   :  { %v376_v23 = vsel %vm362_vm10, %v373_v10, %v375_v19  ;;  %v378_v27 = vand.u32 65535, %v1565_v24  ;;  %v379_v35 = vshrl.u32 %v1565_v24, 16  ;;  %v403_v44 = vshrl.u32 %v372_v14, 16 }
  0x43   :  { %v276_v8 = vshll.u32 %v1546_v53, 30  ;;  %v380_v37 = vand.u32 65535, %v376_v23  ;;  %v381_v20 = vshrl.u32 %v376_v23, 16  ;;  %v132_v47 = vshll.u32 %v1500_v12, %v130_v15 }
  0x44   :  { %v133_v48 = vshrl.u32 %v115_v6, %v131_v31  ;;  %v137_v52 = vshll.u32 %v136_v41, 23  ;;  %v269_v43 = vadd.s32 %v1505_v22, %v1512_v33  ;;  %v405_v55 = vmul.u32 %v403_v44, %v378_v27 }
  0x45   :  { %v277_v17 = vsub.s32 %v273_v50, %v276_v8  ;;  %v382_v56 = vmul.u32 %v380_v37, %v378_v27  ;;  %v383_v42 = vmul.u32 %v381_v20, %v378_v27  ;;  %v384_v46 = vmul.u32 %v380_v37, %v379_v35 }
  0x46   :  { %v385_v38 = vmul.u32 %v381_v20, %v379_v35  ;;  %v402_v50 = vand.u32 65535, %v372_v14  ;;  %v134_v7 = vor.u32 %v133_v48, %v132_v47  ;;  %v138_v12 = vor.u32 4788187, %v137_v52 }
  0x47   :  { %vm278_vm11 = vcmp.lt.s32.totalorder %v277_v17, 0  ;;  %v279_v21 = vsub.s32 0, %v277_v17  ;;  %v386_v49 = vshll.u32 %v383_v42, 16  ;;  %v388_v59 = vshll.u32 %v384_v46, 16 }
  0x48   :  { %v406_v9 = vmul.u32 %v402_v50, %v379_v35  ;;  %v404_v10 = vmul.u32 %v402_v50, %v378_v27  ;;  %v408_v22 = vshll.u32 %v405_v55, 16  ;;  %v141_v33 = vcvt.s32.f32 %v134_v7  ;;  %v1590_v27 = vld [vmem:[%s1887_s1 + $0x18] sm:$0xff] }
  0x49   :  { %v280_v4 = vsel %vm278_vm11, %v279_v21, %v277_v17  ;;  %vm390_vm13 = vc.u32 %v382_v56, %v386_v49  ;;  %v392_v63 = vadd.s32 %v386_v49, %v382_v56  ;;  %v387_v6 = vshrl.u32 %v383_v42, 16 }
  0x4a   :  { %v281_v13 = vclz %v280_v4  ;;  %v391_v60 = vsel %vm390_vm13, 1, %v1321_v51  ;;  %v407_v19 = vmul.u32 %v403_v44, %v379_v35  ;;  %v139_v21 = vand.u32 2147483647, %v138_v12 }
  0x4b   :  { %v393_v8 = vadd.s32 %v391_v60, %v385_v38  ;;  %vm394_vm14 = vc.u32 %v392_v63, %v388_v59  ;;  %v410_v37 = vshll.u32 %v406_v9, 16  ;;  %v345_v20 = vshrl.u32 %v1315_v28, %v1509_v29 }
  0x4c   :  { %v1285_v26 = vadd.s32 4294967294, %v281_v13  ;;  %v395_v14 = vsel %vm394_vm14, 1, %v1321_v51  ;;  %vm412_vm15 = vc.u32 %v404_v10, %v408_v22  ;;  %v414_v13 = vadd.s32 %v408_v22, %v404_v10 }
  0x4d   :  { %v397_v31 = vadd.s32 %v395_v14, %v393_v8  ;;  %v413_v35 = vsel %vm412_vm15, 1, %v1321_v51  ;;  %v389_v56 = vshrl.u32 %v384_v46, 16  ;;  %v142_v47 = vmul.f32 %v141_v33, %v139_v21 }
  0x4e   :  { %vm1286_vm12 = vcmp.lt.s32.totalorder %v1285_v26, 0  ;;  %v415_v44 = vadd.s32 %v413_v35, %v407_v19  ;;  %v409_v29 = vshrl.u32 %v405_v55, 16  ;;  %vm416_vm0 = vc.u32 %v414_v13, %v410_v37 }
  0x4f   :  { %v284_v57 = vsel %vm1286_vm12, 0, %v1285_v26  ;;  %v398_v42 = vadd.s32 %v397_v31, %v387_v6  ;;  %v417_v26 = vsel %vm416_vm0, 1, %v1321_v51  ;;  %v486_v49 = vand.u32 2139095040, %v1590_v27 }
  0x50   :  { %v285_v25 = vsub.s32 32, %v284_v57  ;;  %v289_v15 = vsub.s32 4294967266, %v284_v57  ;;  %v286_v16 = vshll.u32 %v277_v17, %v284_v57  ;;  %v366_v17 = vsel %vm364_vm9, %v1541_v39, 2102212464 }
  0x51   :  { %v365_v39 = vsel %vm361_vm7, %v345_v20, %v1537_v58  ;;  %v367_v48 = vsel %vm363_vm8, %v1539_v62, %v366_v17  ;;  %v411_v46 = vshrl.u32 %v406_v9, 16  ;;  %v419_v50 = vadd.s32 %v417_v26, %v415_v44 }
  0x52   :  { %v287_v11 = vshrl.u32 %v269_v43, %v285_v25  ;;  %v290_v18 = vadd.s32 127, %v289_v15  ;;  %v1601_v43 = vadd.s32 %v398_v42, %v389_v56  ;;  %v1603_v55 = vadd.s32 %v414_v13, %v410_v37 }
  0x53   :  { %v487_v57 = vshrl.u32 %v486_v49, 23  ;;  %v143_v59 = vxor.u32 2147483648, %v142_v47  ;;  %v368_v58 = vsel %vm362_vm10, %v365_v39, %v367_v48  ;;  %v420_v60 = vadd.s32 %v419_v50, %v409_v29 }
  0x54   :  { %v291_v23 = vshll.u32 %v290_v18, 23  ;;  %v288_v41 = vor.u32 %v287_v11, %v286_v16  ;;  %vm23_vm1 = vcmp.lt.s32.totalorder %v1345_v0, 0  ;;  %v422_v25 = vmul.u32 %v1565_v24, %v368_v58 }
  0x55   :  { %v1290_v62 = vadd.s32 4294967169, %v487_v57  ;;  %v421_v7 = vadd.s32 %v420_v60, %v411_v46  ;;  %vm424_vm2 = vc.u32 %v1601_v43, %v1603_v55  ;;  %vm1613_vm3 = vcmp.le.f32.partialorder %v21_v3, 0.7853982 }
  0x56   :  { %v292_v4 = vor.u32 4788187, %v291_v23  ;;  %v295_v38 = vcvt.s32.f32 %v288_v41  ;;  %v144_v54 = vsel %vm23_vm1, %v143_v59, %v142_v47  ;;  %vm177_vm5 = vcmp.lt.s32.totalorder %v1350_v1, 0 }
  0x57   :  { %v493_v12 = vadd.s32 1, %v1290_v62  ;;  %v425_v8 = vadd.s32 1, %v421_v7  ;;  %v1623_v10 = vsel %vm1613_vm3, %v1345_v0, %v144_v54  ;;  %v483_v3 = vand.u32 2147483647, %v1590_v27 }
  0x58   :  { %v293_v52 = vand.u32 2147483647, %v292_v4  ;;  %v1628_v6 = vmul.f32 %v1623_v10, %v1623_v10  ;;  %vm1632_vm6 = vcmp.le.f32.partialorder %v175_v5, 0.7853982  ;;  %vm331_vm13 = vcmp.lt.s32.totalorder %v1355_v2, 0 }
  0x59   :  { %vm494_vm4 = vcmp.gt.s32.totalorder %v493_v12, 0  ;;  %v426_v16 = vsel %vm424_vm2, %v425_v8, %v421_v7  ;;  %v490_v23 = vand.u32 8388607, %v483_v3  ;;  %vm1709_vm14 = vcmp.le.f32.partialorder %v329_v40, 0.7853982 }
  0x5a   :  { %v296_v63 = vmul.f32 %v295_v38, %v293_v52  ;;  %v495_v24 = vsel %vm494_vm4, %v493_v12, 0  ;;  %v427_v11 = vadd.s32 %v426_v16, %v422_v25  ;;  %v150_v56 = vmul.f32 -0.001358992, %v1628_v6 }
  0x5b   :  { %v497_v18 = vand.u32 31, %v495_v24  ;;  %v1654_v13 = vshrl.u32 %v495_v24, 5  ;;  %v491_v47 = vor.u32 8388608, %v490_v23 }
  0x5c   :  { %v297_v9 = vxor.u32 2147483648, %v296_v63  ;;  %v428_v22 = vadd.s32 536870912, %v427_v11  ;;  %v1679_v60 = vadd.f32 0.041655596, %v150_v56 }
  0x5d   :  { %v498_v33 = vsub.s32 32, %v497_v18  ;;  %v500_v31 = vshll.u32 %v1315_v28, %v497_v18  ;;  %v503_v37 = vshll.u32 %v1316_v30, %v497_v18  ;;  %v509_v5 = vshll.u32 %v1318_v34, %v497_v18 }
  0x5e   :  { %v298_v19 = vsel %vm177_vm5, %v297_v9, %v296_v63  ;;  %v1638_v21 = vshrl.u32 %v428_v22, 30  ;;  %v506_v42 = vshll.u32 %v1317_v32, %v497_v18  ;;  %v512_v29 = vshll.u32 %v1319_v36, %v497_v18 }
  0x5f   :  { %v501_v20 = vshrl.u32 %v1316_v30, %v498_v33  ;;  %v504_v17 = vshrl.u32 %v1317_v32, %v498_v33  ;;  %v510_v41 = vshrl.u32 %v1319_v36, %v498_v33  ;;  %v1651_v4 = vsel %vm1632_vm6, %v1350_v1, %v298_v19 }
  0x60   :  { %v430_v35 = vshll.u32 %v1638_v21, 30  ;;  %v507_v30 = vshrl.u32 %v1318_v34, %v498_v33  ;;  %v513_v39 = vshrl.u32 %v1320_v45, %v498_v33  ;;  %v1663_v48 = vmul.f32 %v1651_v4, %v1651_v4 }
  0x61   :  { %v502_v26 = vor.u32 %v501_v20, %v500_v31  ;;  %v1665_v49 = vor.u32 %v504_v17, %v503_v37  ;;  %v511_v52 = vor.u32 %v510_v41, %v509_v5  ;;  %vm515_vm8 = vcmp.lt.s32.totalorder %v1654_v13, 1 }
  0x62   :  { %v431_v44 = vsub.s32 %v427_v11, %v430_v35  ;;  %v514_v46 = vor.u32 %v513_v39, %v512_v29  ;;  %v157_v32 = vmul.f32 -0.00019511016, %v1628_v6  ;;  %v508_v34 = vor.u32 %v507_v30, %v506_v42 }
  0x63   :  { %vm518_vm9 = vcmp.lt.s32.totalorder %v1654_v13, 4  ;;  %v145_v36 = vsub.s32 4, %v1494_v61  ;;  %vm517_vm10 = vcmp.lt.s32.totalorder %v1654_v13, 3  ;;  %v1672_v50 = vshll.u32 %v491_v47, 8 }
  0x64   :  { %vm432_vm7 = vcmp.lt.s32.totalorder %v431_v44, 0  ;;  %v433_v38 = vsub.s32 0, %v431_v44  ;;  %v311_v57 = vmul.f32 -0.00019511016, %v1663_v48  ;;  %vm516_vm11 = vcmp.lt.s32.totalorder %v1654_v13, 2 }
  0x65   :  { %v523_v58 = vsel %vm515_vm8, %v502_v26, %v1665_v49  ;;  %v524_v62 = vsel %vm518_vm9, %v511_v52, 920167782  ;;  %v528_v63 = vsel %vm518_vm9, %v514_v46, 1326507024  ;;  %v158_v7 = vadd.f32 0.008332121, %v157_v32 }
  0x66   :  { %v434_v45 = vsel %vm432_vm7, %v433_v38, %v431_v44  ;;  %v525_v12 = vsel %vm517_vm10, %v508_v34, %v524_v62  ;;  %v527_v54 = vsel %vm515_vm8, %v1665_v49, %v508_v34  ;;  %v304_v8 = vmul.f32 -0.001358992, %v1663_v48 }
  0x67   :  { %v435_v59 = vclz %v434_v45  ;;  %v423_v9 = vadd.s32 %v1603_v55, %v1601_v43  ;;  %v526_v16 = vsel %vm516_vm11, %v523_v58, %v525_v12  ;;  %v529_v24 = vsel %vm517_vm10, %v511_v52, %v528_v63 }
  0x68   :  { %v312_v11 = vadd.f32 0.008332121, %v311_v57  ;;  %v532_v18 = vand.u32 65535, %v1672_v50  ;;  %v533_v22 = vshrl.u32 %v1672_v50, 16  ;;  %v499_v23 = vshrl.u32 %v1315_v28, %v498_v33 }
  0x69   :  { %v1288_v25 = vadd.s32 4294967294, %v435_v59  ;;  %v530_v31 = vsel %vm516_vm11, %v527_v54, %v529_v24  ;;  %v557_v37 = vshrl.u32 %v526_v16, 16  ;;  %v556_v17 = vand.u32 65535, %v526_v16 }
  0x6a   :  { %v159_v5 = vmul.f32 %v158_v7, %v1628_v6  ;;  %v305_v41 = vadd.f32 0.041655596, %v304_v8  ;;  %v534_v35 = vand.u32 65535, %v530_v31  ;;  %v535_v56 = vshrl.u32 %v530_v31, 16 }
  0x6b   :  { %vm1289_vm12 = vcmp.lt.s32.totalorder %v1288_v25, 0  ;;  %v313_v42 = vmul.f32 %v312_v11, %v1663_v48  ;;  %v559_v29 = vmul.u32 %v557_v37, %v532_v18  ;;  %v519_v28 = vsel %vm515_vm8, %v499_v23, %v502_v26 }
  0x6c   :  { %v438_v19 = vsel %vm1289_vm12, 0, %v1288_v25  ;;  %v536_v33 = vmul.u32 %v534_v35, %v532_v18  ;;  %v537_v39 = vmul.u32 %v535_v56, %v532_v18  ;;  %v558_v32 = vmul.u32 %v556_v17, %v532_v18 }
  0x6d   :  { %v439_v43 = vsub.s32 32, %v438_v19  ;;  %v440_v55 = vshll.u32 %v431_v44, %v438_v19  ;;  %v443_v20 = vsub.s32 4294967266, %v438_v19  ;;  %v538_v44 = vmul.u32 %v534_v35, %v533_v22 }
  0x6e   :  { %v560_v45 = vmul.u32 %v556_v17, %v533_v22  ;;  %v520_v57 = vsel %vm518_vm9, %v508_v34, 2102212464  ;;  %v539_v59 = vmul.u32 %v535_v56, %v533_v22  ;;  %v540_v58 = vshll.u32 %v537_v39, 16 }
  0x6f   :  { %v441_v30 = vshrl.u32 %v423_v9, %v439_v43  ;;  %v444_v47 = vadd.s32 127, %v443_v20  ;;  %v542_v62 = vshll.u32 %v538_v44, 16  ;;  %v561_v7 = vmul.u32 %v557_v37, %v533_v22 }
  0x70   :  { %v562_v25 = vshll.u32 %v559_v29, 16  ;;  %v541_v12 = vshrl.u32 %v537_v39, 16  ;;  %vm544_vm15 = vc.u32 %v536_v33, %v540_v58  ;;  %v546_v40 = vadd.s32 %v540_v58, %v536_v33 }
  0x71   :  { %v442_v38 = vor.u32 %v441_v30, %v440_v55  ;;  %v445_v46 = vshll.u32 %v444_v47, 23  ;;  %v564_v54 = vshll.u32 %v560_v45, 16  ;;  %v545_v9 = vsel %vm544_vm15, 1, %v1321_v51 }
  0x72   :  { %vm566_vm0 = vc.u32 %v558_v32, %v562_v25  ;;  %v568_v16 = vadd.s32 %v562_v25, %v558_v32  ;;  %v547_v24 = vadd.s32 %v545_v9, %v539_v59  ;;  %vm548_vm2 = vc.u32 %v546_v40, %v542_v62 }
  0x73   :  { %v446_v26 = vor.u32 4788187, %v445_v46  ;;  %v449_v63 = vcvt.s32.f32 %v442_v38  ;;  %v563_v11 = vshrl.u32 %v559_v29, 16  ;;  %v567_v34 = vsel %vm566_vm0, 1, %v1321_v51 }
  0x74   :  { %v549_v19 = vsel %vm548_vm2, 1, %v1321_v51  ;;  %v569_v23 = vadd.s32 %v567_v34, %v561_v7  ;;  %vm570_vm4 = vc.u32 %v568_v16, %v564_v54  ;;  %v521_v22 = vsel %vm517_vm10, %v1665_v49, %v520_v57 }
  0x75   :  { %v447_v8 = vand.u32 2147483647, %v446_v26  ;;  %v543_v31 = vshrl.u32 %v538_v44, 16  ;;  %v551_v37 = vadd.s32 %v549_v19, %v547_v24  ;;  %v571_v43 = vsel %vm570_vm4, 1, %v1321_v51 }
  0x76   :  { %v152_v55 = vmul.f32 %v1679_v60, %v1628_v6  ;;  %v565_v17 = vshrl.u32 %v560_v45, 16  ;;  %v573_v35 = vadd.s32 %v571_v43, %v569_v23  ;;  %v160_v56 = vadd.f32 -0.16666654, %v159_v5 }
  0x77   :  { %v450_v18 = vmul.f32 %v449_v63, %v447_v8  ;;  %v306_v30 = vmul.f32 %v305_v41, %v1663_v48  ;;  %v552_v47 = vadd.s32 %v551_v37, %v541_v12  ;;  %v1725_v29 = vadd.s32 %v568_v16, %v564_v54 }
  0x78   :  { %v314_v33 = vadd.f32 -0.16666654, %v313_v42  ;;  %v522_v39 = vsel %vm516_vm11, %v519_v28, %v521_v22  ;;  %v574_v51 = vadd.s32 %v573_v35, %v563_v11  ;;  %v146_v60 = vsel %vm23_vm1, %v145_v36, %v1494_v61 }
  0x79   :  { %v451_v20 = vxor.u32 2147483648, %v450_v18  ;;  %v1739_v41 = vadd.s32 %v552_v47, %v543_v31  ;;  %v153_v42 = vadd.f32 -0.4999988, %v152_v55  ;;  %v299_v44 = vsub.s32 4, %v1546_v53 }
  0x7a   :  { %v575_v46 = vadd.s32 %v574_v51, %v565_v17  ;;  %v161_v13 = vmul.f32 %v160_v56, %v1628_v6  ;;  %v307_v28 = vadd.f32 -0.4999988, %v306_v30  ;;  %v576_v32 = vmul.u32 %v1672_v50, %v522_v39 }
  0x7b   :  { %v452_v49 = vsel %vm331_vm13, %v451_v20, %v450_v18  ;;  %vm578_vm7 = vc.u32 %v1739_v41, %v1725_v29  ;;  %v315_v0 = vmul.f32 %v314_v33, %v1663_v48  ;;  %v1749_v57 = vsel %vm1613_vm3, 0, %v146_v60 }
  0x7c   :  { %v455_v5 = vsel %vm1709_vm14, %v1355_v2, %v452_v49  ;;  %v579_v45 = vadd.s32 1, %v575_v46  ;;  %v453_v59 = vsub.s32 4, %v1638_v21  ;;  %v154_v63 = vmul.f32 %v153_v42, %v1628_v6  ;;  %v1312_v42 = vld [vmem:[%s1887_s1] sm:$0xff] }
  0x7d   :  { %v457_v38 = vmul.f32 %v455_v5, %v455_v5  ;;  %v162_v50 = vadd.f32 1.0, %v161_v13  ;;  %v300_v7 = vsel %vm177_vm5, %v299_v44, %v1546_v53  ;;  %v308_v12 = vmul.f32 %v307_v28, %v1663_v48 }
  0x7e   :  { %v580_v26 = vsel %vm578_vm7, %v579_v45, %v575_v46  ;;  %v316_v40 = vadd.f32 1.0, %v315_v0  ;;  %v165_v8 = vand.u32 3, %v1749_v57  ;;  %v302_v16 = vsel %vm1632_vm6, 0, %v300_v7 }
  0x7f   :  { %v458_v61 = vmul.f32 -0.001358992, %v457_v38  ;;  %v465_v36 = vmul.f32 -0.00019511016, %v457_v38  ;;  %v581_v25 = vadd.s32 %v580_v26, %v576_v32  ;;  %v454_v6 = vsel %vm331_vm13, %v453_v59, %v1638_v21 }
  0x80   :  { %v1763_v1 = vadd.f32 1.0, %v154_v63  ;;  %v1766_v53 = vmul.f32 %v162_v50, %v1623_v10  ;;  %v319_v48 = vand.u32 3, %v302_v16  ;;  %v1770_v18 = vadd.f32 1.0, %v308_v12 }
  0x81   :  { %v459_v58 = vadd.f32 0.041655596, %v458_v61  ;;  %v466_v62 = vadd.f32 0.008332121, %v465_v36  ;;  %v582_v9 = vadd.s32 536870912, %v581_v25  ;;  %v1773_v19 = vmul.f32 %v316_v40, %v1651_v4  ;;  %v1314_v61 = vld [vmem:[%s1887_s1 + $0x10] sm:$0xff] }
  0x82   :  { %v456_v2 = vsel %vm1709_vm14, 0, %v454_v6  ;;  %vm167_vm1 = vcmp.eq.s32.totalorder %v165_v8, 0  ;;  %v168_v37 = vxor.u32 2147483648, %v1766_v53  ;;  %vm170_vm3 = vcmp.eq.s32.totalorder %v165_v8, 2  ;;  %v15_v40 = vld [vmem:[%s1888_s0 + $0x10] sm:$0xff] }
  0x83   :  { %v460_v54 = vmul.f32 %v459_v58, %v457_v38  ;;  %v467_v15 = vmul.f32 %v466_v62, %v457_v38  ;;  %v1768_v34 = vshrl.u32 %v582_v9, 30  ;;  %v473_v31 = vand.u32 3, %v456_v2 }
  0x84   :  { %v171_v43 = vxor.u32 2147483648, %v1763_v1  ;;  %vm321_vm5 = vcmp.eq.s32.totalorder %v319_v48, 0  ;;  %v322_v4 = vxor.u32 2147483648, %v1773_v19  ;;  %v325_v52 = vxor.u32 2147483648, %v1770_v18 }
  0x85   :  { %v461_v24 = vadd.f32 -0.4999988, %v460_v54  ;;  %v468_v11 = vadd.f32 -0.16666654, %v467_v15  ;;  %v584_v21 = vshll.u32 %v1768_v34, 30  ;;  %vm324_vm6 = vcmp.eq.s32.totalorder %v319_v48, 2 }
  0x86   :  { %vm475_vm9 = vcmp.eq.s32.totalorder %v473_v31, 0  ;;  %vm478_vm10 = vcmp.eq.s32.totalorder %v473_v31, 2  ;;  %vm166_vm11 = vcmp.lt.s32.totalorder %v165_v8, 2  ;;  %v169_v30 = vsel %vm167_vm1, %v1763_v1, %v168_v37 }
  0x87   :  { %v462_v14 = vmul.f32 %v461_v24, %v457_v38  ;;  %v469_v23 = vmul.f32 %v468_v11, %v457_v38  ;;  %v1782_v55 = vsub.s32 %v581_v25, %v584_v21  ;;  %v172_v47 = vsel %vm170_vm3, %v171_v43, %v1766_v53  ;;  %v1313_v38 = vld [vmem:[%s1887_s1 + $0x8] sm:$0xff]  ;;  %v13_v25 = vld [vmem:[%s1888_s0] sm:$0xff] }
  0x88   :  { %vm320_vm12 = vcmp.lt.s32.totalorder %v319_v48, 2  ;;  %v323_v49 = vsel %vm321_vm5, %v1770_v18, %v322_v4  ;;  %v326_v39 = vsel %vm324_vm6, %v325_v52, %v1773_v19  ;;  %vm474_vm13 = vcmp.lt.s32.totalorder %v473_v31, 2 }
  0x89   :  { %v1778_v22 = vadd.f32 1.0, %v462_v14  ;;  %v470_v10 = vadd.f32 1.0, %v469_v23  ;;  %vm586_vm8 = vcmp.lt.s32.totalorder %v1782_v55, 0  ;;  %v587_v35 = vsub.s32 0, %v1782_v55 }
  0x8a   :  { %vm164_vm14 = vweird.f32 %v1312_v42  ;;  %v173_v44 = vsel %vm166_vm11, %v169_v30, %v172_v47  ;;  %vm318_vm15 = vweird.f32 %v1313_v38  ;;  %v327_v13 = vsel %vm320_vm12, %v323_v49, %v326_v39 }
  0x8b   :  { %v1786_v20 = vmul.f32 %v470_v10, %v455_v5  ;;  %v479_v17 = vxor.u32 2147483648, %v1778_v22  ;;  %v588_v33 = vsel %vm586_vm8, %v587_v35, %v1782_v55  ;;  %v789_v28 = vadd.s32 3, %v1749_v57 }
  0x8c   :  { %v589_v51 = vclz %v588_v33  ;;  %v944_v32 = vadd.s32 3, %v302_v16  ;;  %v1099_v0 = vadd.s32 3, %v456_v2  ;;  %vm472_vm0 = vweird.f32 %v1314_v61 }
  0x8d   :  { %v476_v56 = vxor.u32 2147483648, %v1786_v20  ;;  %v480_v5 = vsel %vm478_vm10, %v479_v17, %v1786_v20  ;;  %v577_v45 = vadd.s32 %v1725_v29, %v1739_v41  ;;  %v174_v59 = vsel %vm164_vm14, nan, %v173_v44  ;;  %v14_v29 = vld [vmem:[%s1888_s0 + $0x8] sm:$0xff] }
  0x8e   :  { %v1291_v46 = vadd.s32 4294967294, %v589_v51  ;;  %v790_v62 = vand.u32 3, %v789_v28  ;;  %v945_v26 = vand.u32 3, %v944_v32  ;;  %v328_v57 = vsel %vm318_vm15, nan, %v327_v13 }
  0x8f   :  { %v477_v60 = vsel %vm475_vm9, %v1778_v22, %v476_v56  ;;  %v1100_v12 = vand.u32 3, %v1099_v0  ;;  %v637_v24 = vmul.f32 %v174_v59, %v13_v25  ;;  %v638_v11 = vmul.f32 %v328_v57, %v14_v29 }
  0x90   :  { %v481_v36 = vsel %vm474_vm13, %v477_v60, %v480_v5  ;;  %vm1292_vm2 = vcmp.lt.s32.totalorder %v1291_v46, 0  ;;  %vm792_vm4 = vcmp.eq.s32.totalorder %v790_v62, 0  ;;  %vm795_vm7 = vcmp.eq.s32.totalorder %v790_v62, 2 }
  0x91   :  { %v592_v58 = vsel %vm1292_vm2, 0, %v1291_v46  ;;  %v482_v41 = vsel %vm472_vm0, nan, %v481_v36  ;;  %vm791_vm1 = vcmp.lt.s32.totalorder %v790_v62, 2  ;;  %v794_v8 = vsel %vm792_vm4, %v1763_v1, %v168_v37  ;;  %641 = vst [vmem:[%s1889_s2] sm:$0xff] %v637_v24 }
  0x92   :  { %v593_v63 = vsub.s32 32, %v592_v58  ;;  %v594_v50 = vshll.u32 %v1782_v55, %v592_v58  ;;  %v597_v7 = vsub.s32 4294967266, %v592_v58  ;;  %v797_v9 = vsel %vm795_vm7, %v171_v43, %v1766_v53  ;;  %642 = vst [vmem:[%s1889_s2 + $0x8] sm:$0xff] %v638_v11 }
  0x93   :  { %vm946_vm3 = vcmp.lt.s32.totalorder %v945_v26, 2  ;;  %vm947_vm5 = vcmp.eq.s32.totalorder %v945_v26, 0  ;;  %vm950_vm6 = vcmp.eq.s32.totalorder %v945_v26, 2  ;;  %v639_v48 = vmul.f32 %v482_v41, %v15_v40  ;;  %v16_v26 = vld [vmem:[%s1888_s0 + $0x18] sm:$0xff] }
  0x94   :  { %v595_v54 = vshrl.u32 %v577_v45, %v593_v63  ;;  %v598_v15 = vadd.s32 127, %v597_v7  ;;  %v798_v14 = vsel %vm791_vm1, %v794_v8, %v797_v9  ;;  %v949_v23 = vsel %vm947_vm5, %v1770_v18, %v322_v4 }
  0x95   :  { %v952_v2 = vsel %vm950_vm6, %v325_v52, %v1773_v19  ;;  %v799_v53 = vsel %vm164_vm14, nan, %v798_v14  ;;  %vm1101_vm8 = vcmp.lt.s32.totalorder %v1100_v12, 2  ;;  %vm1102_vm9 = vcmp.eq.s32.totalorder %v1100_v12, 0  ;;  %643 = vst [vmem:[%s1889_s2 + $0x10] sm:$0xff] %v639_v48 }
  0x96   :  { %v596_v16 = vor.u32 %v595_v54, %v594_v50  ;;  %v599_v6 = vshll.u32 %v598_v15, 23  ;;  %v953_v10 = vsel %vm946_vm3, %v949_v23, %v952_v2  ;;  %vm1105_vm10 = vcmp.eq.s32.totalorder %v1100_v12, 2 }
  0x97   :  { %v954_v31 = vsel %vm318_vm15, nan, %v953_v10  ;;  %v1104_v19 = vsel %vm1102_vm9, %v1778_v22, %v476_v56  ;;  %v1107_v37 = vsel %vm1105_vm10, %v479_v17, %v1786_v20  ;;  %v1265_v55 = vmul.f32 %v799_v53, %v13_v25 }
  0x98   :  { %v600_v1 = vor.u32 4788187, %v599_v6  ;;  %v603_v21 = vcvt.s32.f32 %v596_v16  ;;  %v1108_v43 = vsel %vm1101_vm8, %v1104_v19, %v1107_v37  ;;  %v1266_v4 = vmul.f32 %v954_v31, %v14_v29 }
  0x99   :  { %v1109_v35 = vsel %vm472_vm0, nan, %v1108_v43  ;;  %vm485_vm11 = vcmp.lt.s32.totalorder %v1590_v27, 0  ;;  %v607_v30 = vsub.s32 4, %v1768_v34  ;;  %1269 = vst [vmem:[%s1890_s3] sm:$0xff] %v1265_v55  ;;  %vm484_vm12 = vcmp.le.f32.partialorder %v483_v3, 0.7853982 }
  0x9a   :  { %v601_v18 = vand.u32 2147483647, %v600_v1  ;;  %v1267_v47 = vmul.f32 %v1109_v35, %v15_v40  ;;  %1270 = vst [vmem:[%s1890_s3 + $0x8] sm:$0xff] %v1266_v4  ;;  %vm626_vm7 = vweird.f32 %v1590_v27 }
  0x9b   :  { %v608_v17 = vsel %vm485_vm11, %v607_v30, %v1768_v34 }
  0x9c   :  { %v604_v52 = vmul.f32 %v603_v21, %v601_v18  ;;  %1271 = vst [vmem:[%s1890_s3 + $0x10] sm:$0xff] %v1267_v47  ;;  %v610_v49 = vsel %vm484_vm12, 0, %v608_v17 }
  0x9d   :  { %v1254_v5 = vadd.s32 3, %v610_v49  ;;  %v627_v13 = vand.u32 3, %v610_v49 }
  0x9e   :  { %v605_v22 = vxor.u32 2147483648, %v604_v52 }
  0x9f   :  { %v1255_v28 = vand.u32 3, %v1254_v5  ;;  %vm632_vm13 = vcmp.eq.s32.totalorder %v627_v13, 2  ;;  %vm628_vm15 = vcmp.lt.s32.totalorder %v627_v13, 2  ;;  %vm629_vm0 = vcmp.eq.s32.totalorder %v627_v13, 0 }
  0xa0   :  { %v606_v20 = vsel %vm485_vm11, %v605_v22, %v604_v52 }
  0xa1   :  { %v609_v56 = vsel %vm484_vm12, %v1590_v27, %v606_v20  ;;  %vm1260_vm14 = vcmp.eq.s32.totalorder %v1255_v28, 2  ;;  %vm1257_vm2 = vcmp.eq.s32.totalorder %v1255_v28, 0  ;;  %vm1256_vm4 = vcmp.lt.s32.totalorder %v1255_v28, 2 }
  0xa2   :  { %v611_v33 = vmul.f32 %v609_v56, %v609_v56 }
  0xa4   :  { %v612_v39 = vmul.f32 -0.001358992, %v611_v33  ;;  %v619_v51 = vmul.f32 -0.00019511016, %v611_v33 }
  0xa6   :  { %v613_v60 = vadd.f32 0.041655596, %v612_v39  ;;  %v620_v3 = vadd.f32 0.008332121, %v619_v51 }
  0xa8   :  { %v614_v42 = vmul.f32 %v613_v60, %v611_v33  ;;  %v621_v44 = vmul.f32 %v620_v3, %v611_v33 }
  0xaa   :  { %v615_v38 = vadd.f32 -0.4999988, %v614_v42  ;;  %v622_v46 = vadd.f32 -0.16666654, %v621_v44 }
  0xac   :  { %v616_v32 = vmul.f32 %v615_v38, %v611_v33  ;;  %v623_v0 = vmul.f32 %v622_v46, %v611_v33 }
  0xae   :  { %v617_v61 = vadd.f32 1.0, %v616_v32  ;;  %v624_v36 = vadd.f32 1.0, %v623_v0 }
  0xb0   :  { %v625_v34 = vmul.f32 %v624_v36, %v609_v56  ;;  %v633_v45 = vxor.u32 2147483648, %v617_v61 }
  0xb2   :  { %v630_v59 = vxor.u32 2147483648, %v625_v34  ;;  %v634_v58 = vsel %vm632_vm13, %v633_v45, %v625_v34  ;;  %v1262_v62 = vsel %vm1260_vm14, %v633_v45, %v625_v34 }
  0xb4   :  { %v631_v57 = vsel %vm629_vm0, %v617_v61, %v630_v59  ;;  %v1259_v63 = vsel %vm1257_vm2, %v617_v61, %v630_v59 }
  0xb5   :  { %v635_v50 = vsel %vm628_vm15, %v631_v57, %v634_v58  ;;  %v1263_v7 = vsel %vm1256_vm4, %v1259_v63, %v1262_v62 }
  0xb6   :  { %v636_v25 = vsel %vm626_vm7, nan, %v635_v50  ;;  %v1264_v29 = vsel %vm626_vm7, nan, %v1263_v7 }
  0xb7   :  { %v640_v41 = vmul.f32 %v636_v25, %v16_v26  ;;  %v1268_v12 = vmul.f32 %v1264_v29, %v16_v26 }
  0xb9   :  { %644 = vst [vmem:[%s1889_s2 + $0x18] sm:$0xff] %v640_v41 }
  0xba   :  { %1272 = vst [vmem:[%s1890_s3 + $0x18] sm:$0xff] %v1268_v12 }

// kernel: mw_canet_forward.8
= control target key start
LH: loop header
LB: loop body
LE: loop exit
PB: predicated region body
PF: predicated region fallthrough
CT: control target
= control target key end

     0   :  { %vm259_vm0 = vcmask 261120   ;;  %s1217_s1 = inlined_call_operand.vmem [shape: bf16[32,128], index: 1, kind: input, shape index: {}]   ;;  %s1218_s0 = inlined_call_operand.vmem [shape: bf16[512,32], index: 0, kind: input, shape index: {}]   ;;  %s1219_s2 = inlined_call_operand.vmem [shape: f32[1,128], index: 2, kind: input, shape index: {}]   ;;  %s1220_s3 = inlined_call_operand.vmem [shape: f32[512,128], index: 3, kind: output, shape index: {}]  }
   0x1   :  { %v794_v0 = vld [vmem:[%s1217_s1 + $0x8] sm:$0xff]  ;;  %v793_v1 = vld [vmem:[%s1217_s1] sm:$0xff]  ;;  %v763_v10 = vld [vmem:[%s1218_s0 + $0x10] sm:$0xff] }
   0x2   :  { %362 = vmatpush.bf16.msra.mxu0 %v794_v0  ;;  %795 = vmatpush.bf16.msra.mxu1 %v794_v0  ;;  %v761_v2 = vld [vmem:[%s1218_s0] sm:$0xff]  ;;  %v762_v6 = vld [vmem:[%s1218_s0 + $0x8] sm:$0xff]  ;;  %v771_v11 = vld [vmem:[%s1218_s0 + $0x50] sm:$0xff] }
   0x3   :  { %796 = vmatpush.bf16.msra.mxu2 %v794_v0  ;;  %797 = vmatpush.bf16.msra.mxu3 %v794_v0  ;;  %v769_v3 = vld [vmem:[%s1218_s0 + $0x40] sm:$0xff]  ;;  %v770_v7 = vld [vmem:[%s1218_s0 + $0x48] sm:$0xff]  ;;  %v779_v12 = vld [vmem:[%s1218_s0 + $0x90] sm:$0xff] }
   0x4   :  { %v777_v4 = vld [vmem:[%s1218_s0 + $0x80] sm:$0xff]  ;;  %v778_v8 = vld [vmem:[%s1218_s0 + $0x88] sm:$0xff]  ;;  %v787_v13 = vld [vmem:[%s1218_s0 + $0xd0] sm:$0xff] }
   0x5   :  { %v785_v5 = vld [vmem:[%s1218_s0 + $0xc0] sm:$0xff]  ;;  %v786_v9 = vld [vmem:[%s1218_s0 + $0xc8] sm:$0xff]  ;;  %v764_v14 = vld [vmem:[%s1218_s0 + $0x18] sm:$0xff] }
   0x6   :  { %363 = vmatpush.bf16.msra.mxu0 %v793_v1  ;;  %798 = vmatpush.bf16.msra.mxu1 %v793_v1  ;;  %v772_v15 = vld [vmem:[%s1218_s0 + $0x58] sm:$0xff]  ;;  %v765_v18 = vld [vmem:[%s1218_s0 + $0x20] sm:$0xff]  ;;  %v766_v22 = vld [vmem:[%s1218_s0 + $0x28] sm:$0xff] }
   0x7   :  { %799 = vmatpush.bf16.msra.mxu2 %v793_v1  ;;  %800 = vmatpush.bf16.msra.mxu3 %v793_v1  ;;  %v780_v16 = vld [vmem:[%s1218_s0 + $0x98] sm:$0xff]  ;;  %v773_v19 = vld [vmem:[%s1218_s0 + $0x60] sm:$0xff]  ;;  %v774_v23 = vld [vmem:[%s1218_s0 + $0x68] sm:$0xff] }
   0x8   :  { %v788_v17 = vld [vmem:[%s1218_s0 + $0xd8] sm:$0xff]  ;;  %v781_v20 = vld [vmem:[%s1218_s0 + $0xa0] sm:$0xff]  ;;  %v782_v24 = vld [vmem:[%s1218_s0 + $0xa8] sm:$0xff] }
   0x9   :  { %729 = vmatmul.msk.bf16.vlgmr.msra.gmra.mxu0 %vm259_vm0, %v761_v2  ;;  %737 = vmatmul.msk.bf16.vlgmr.msra.gmra.mxu1 %vm259_vm0, %v769_v3  ;;  %v789_v21 = vld [vmem:[%s1218_s0 + $0xe0] sm:$0xff]  ;;  %v790_v25 = vld [vmem:[%s1218_s0 + $0xe8] sm:$0xff]  ;;  %v767_v26 = vld [vmem:[%s1218_s0 + $0x30] sm:$0xff] }
   0xa   :  { %745 = vmatmul.msk.bf16.vlgmr.msra.gmra.mxu2 %vm259_vm0, %v777_v4  ;;  %753 = vmatmul.msk.bf16.vlgmr.msra.gmra.mxu3 %vm259_vm0, %v785_v5  ;;  %v775_v27 = vld [vmem:[%s1218_s0 + $0x70] sm:$0xff]  ;;  %v768_v30 = vld [vmem:[%s1218_s0 + $0x38] sm:$0xff]  ;;  %v959_v34 = vld [vmem:[%s1219_s2] ss:$0 sm:$0xff] }
   0xb   :  { %v783_v28 = vld [vmem:[%s1218_s0 + $0xb0] sm:$0xff]  ;;  %v776_v31 = vld [vmem:[%s1218_s0 + $0x78] sm:$0xff] }
   0xc   :  { %v791_v29 = vld [vmem:[%s1218_s0 + $0xf0] sm:$0xff]  ;;  %v784_v32 = vld [vmem:[%s1218_s0 + $0xb8] sm:$0xff] }
   0xd   :  { %v792_v33 = vld [vmem:[%s1218_s0 + $0xf8] sm:$0xff] }
  0x19   :  { %730 = vmatmul.msk.bf16.gmra.mxu0 %vm259_vm0, %v762_v6  ;;  %738 = vmatmul.msk.bf16.gmra.mxu1 %vm259_vm0, %v770_v7 }
  0x1a   :  { %746 = vmatmul.msk.bf16.gmra.mxu2 %vm259_vm0, %v778_v8  ;;  %754 = vmatmul.msk.bf16.gmra.mxu3 %vm259_vm0, %v786_v9 }
  0x29   :  { %731 = vmatmul.msk.bf16.gmra.mxu0 %vm259_vm0, %v763_v10  ;;  %739 = vmatmul.msk.bf16.gmra.mxu1 %vm259_vm0, %v771_v11 }
  0x2a   :  { %747 = vmatmul.msk.bf16.gmra.mxu2 %vm259_vm0, %v779_v12  ;;  %755 = vmatmul.msk.bf16.gmra.mxu3 %vm259_vm0, %v787_v13 }
  0x39   :  { %732 = vmatmul.msk.bf16.gmra.mxu0 %vm259_vm0, %v764_v14  ;;  %740 = vmatmul.msk.bf16.gmra.mxu1 %vm259_vm0, %v772_v15 }
  0x3a   :  { %748 = vmatmul.msk.bf16.gmra.mxu2 %vm259_vm0, %v780_v16  ;;  %756 = vmatmul.msk.bf16.gmra.mxu3 %vm259_vm0, %v788_v17 }
  0x49   :  { %733 = vmatmul.msk.bf16.gmra.mxu0 %vm259_vm0, %v765_v18  ;;  %741 = vmatmul.msk.bf16.gmra.mxu1 %vm259_vm0, %v773_v19 }
  0x4a   :  { %749 = vmatmul.msk.bf16.gmra.mxu2 %vm259_vm0, %v781_v20  ;;  %757 = vmatmul.msk.bf16.gmra.mxu3 %vm259_vm0, %v789_v21 }
  0x59   :  { %734 = vmatmul.msk.bf16.gmra.mxu0 %vm259_vm0, %v766_v22  ;;  %742 = vmatmul.msk.bf16.gmra.mxu1 %vm259_vm0, %v774_v23 }
  0x5a   :  { %750 = vmatmul.msk.bf16.gmra.mxu2 %vm259_vm0, %v782_v24  ;;  %758 = vmatmul.msk.bf16.gmra.mxu3 %vm259_vm0, %v790_v25 }
  0x69   :  { %735 = vmatmul.msk.bf16.gmra.mxu0 %vm259_vm0, %v767_v26  ;;  %743 = vmatmul.msk.bf16.gmra.mxu1 %vm259_vm0, %v775_v27 }
  0x6a   :  { %751 = vmatmul.msk.bf16.gmra.mxu2 %vm259_vm0, %v783_v28  ;;  %759 = vmatmul.msk.bf16.gmra.mxu3 %vm259_vm0, %v791_v29 }
  0x79   :  { %736 = vmatmul.msk.bf16.gmra.mxu0 %vm259_vm0, %v768_v30  ;;  %744 = vmatmul.msk.bf16.gmra.mxu1 %vm259_vm0, %v776_v31 }
  0x7a   :  { %752 = vmatmul.msk.bf16.gmra.mxu2 %vm259_vm0, %v784_v32  ;;  %760 = vmatmul.msk.bf16.gmra.mxu3 %vm259_vm0, %v792_v33 }
  0x86   :  { %v365_v35 = vpop.f32.mrf.mxu0  ;;  %v405_v36 = vpop.f32.mrf.mxu1 }
  0x87   :  { %v366_v37 = vadd.f32 %v959_v34, %v365_v35  ;;  %v406_v38 = vadd.f32 %v959_v34, %v405_v36 }
  0x89   :  { %525 = vst [vmem:[%s1220_s3] sm:$0xff] %v366_v37 }
  0x8a   :  { %541 = vst [vmem:[%s1220_s3 + $0x80] sm:$0xff] %v406_v38 }
  0x8d   :  { %v445_v39 = vpop.f32.mrf.mxu2  ;;  %v485_v40 = vpop.f32.mrf.mxu3 }
  0x8e   :  { %v446_v41 = vadd.f32 %v959_v34, %v445_v39  ;;  %v486_v42 = vadd.f32 %v959_v34, %v485_v40  ;;  %v367_v43 = vpop.f32.mrf.mxu0  ;;  %v407_v44 = vpop.f32.mrf.mxu1 }
  0x8f   :  { %v368_v45 = vadd.f32 %v959_v34, %v367_v43  ;;  %v408_v46 = vadd.f32 %v959_v34, %v407_v44 }
  0x90   :  { %557 = vst [vmem:[%s1220_s3 + $0x100] sm:$0xff] %v446_v41 }
  0x91   :  { %573 = vst [vmem:[%s1220_s3 + $0x180] sm:$0xff] %v486_v42 }
  0x92   :  { %526 = vst [vmem:[%s1220_s3 + $0x8] sm:$0xff] %v368_v45 }
  0x93   :  { %542 = vst [vmem:[%s1220_s3 + $0x88] sm:$0xff] %v408_v46 }
  0x95   :  { %v447_v47 = vpop.f32.mrf.mxu2  ;;  %v487_v48 = vpop.f32.mrf.mxu3 }
  0x96   :  { %v448_v49 = vadd.f32 %v959_v34, %v447_v47  ;;  %v488_v50 = vadd.f32 %v959_v34, %v487_v48  ;;  %v370_v51 = vpop.f32.mrf.mxu0  ;;  %v410_v52 = vpop.f32.mrf.mxu1 }
  0x97   :  { %v371_v53 = vadd.f32 %v959_v34, %v370_v51  ;;  %v411_v54 = vadd.f32 %v959_v34, %v410_v52 }
  0x98   :  { %558 = vst [vmem:[%s1220_s3 + $0x108] sm:$0xff] %v448_v49 }
  0x99   :  { %574 = vst [vmem:[%s1220_s3 + $0x188] sm:$0xff] %v488_v50 }
  0x9a   :  { %527 = vst [vmem:[%s1220_s3 + $0x10] sm:$0xff] %v371_v53 }
  0x9b   :  { %543 = vst [vmem:[%s1220_s3 + $0x90] sm:$0xff] %v411_v54 }
  0x9d   :  { %v450_v55 = vpop.f32.mrf.mxu2  ;;  %v490_v56 = vpop.f32.mrf.mxu3 }
  0x9e   :  { %v451_v57 = vadd.f32 %v959_v34, %v450_v55  ;;  %v491_v58 = vadd.f32 %v959_v34, %v490_v56  ;;  %v372_v59 = vpop.f32.mrf.mxu0  ;;  %v412_v60 = vpop.f32.mrf.mxu1 }
  0x9f   :  { %v373_v61 = vadd.f32 %v959_v34, %v372_v59  ;;  %v413_v62 = vadd.f32 %v959_v34, %v412_v60 }
  0xa0   :  { %559 = vst [vmem:[%s1220_s3 + $0x110] sm:$0xff] %v451_v57 }
  0xa1   :  { %575 = vst [vmem:[%s1220_s3 + $0x190] sm:$0xff] %v491_v58 }
  0xa2   :  { %528 = vst [vmem:[%s1220_s3 + $0x18] sm:$0xff] %v373_v61 }
  0xa3   :  { %544 = vst [vmem:[%s1220_s3 + $0x98] sm:$0xff] %v413_v62 }
  0xa5   :  { %v452_v63 = vpop.f32.mrf.mxu2  ;;  %v492_v0 = vpop.f32.mrf.mxu3 }
  0xa6   :  { %v453_v1 = vadd.f32 %v959_v34, %v452_v63  ;;  %v493_v2 = vadd.f32 %v959_v34, %v492_v0  ;;  %v375_v3 = vpop.f32.mrf.mxu0  ;;  %v415_v4 = vpop.f32.mrf.mxu1 }
  0xa7   :  { %v376_v5 = vadd.f32 %v959_v34, %v375_v3  ;;  %v416_v6 = vadd.f32 %v959_v34, %v415_v4 }
  0xa8   :  { %560 = vst [vmem:[%s1220_s3 + $0x118] sm:$0xff] %v453_v1 }
  0xa9   :  { %576 = vst [vmem:[%s1220_s3 + $0x198] sm:$0xff] %v493_v2 }
  0xaa   :  { %529 = vst [vmem:[%s1220_s3 + $0x20] sm:$0xff] %v376_v5 }
  0xab   :  { %545 = vst [vmem:[%s1220_s3 + $0xa0] sm:$0xff] %v416_v6 }
  0xad   :  { %v455_v7 = vpop.f32.mrf.mxu2  ;;  %v495_v8 = vpop.f32.mrf.mxu3 }
  0xae   :  { %v456_v9 = vadd.f32 %v959_v34, %v455_v7  ;;  %v496_v10 = vadd.f32 %v959_v34, %v495_v8  ;;  %v377_v11 = vpop.f32.mrf.mxu0  ;;  %v417_v12 = vpop.f32.mrf.mxu1 }
  0xaf   :  { %v378_v13 = vadd.f32 %v959_v34, %v377_v11  ;;  %v418_v14 = vadd.f32 %v959_v34, %v417_v12 }
  0xb0   :  { %561 = vst [vmem:[%s1220_s3 + $0x120] sm:$0xff] %v456_v9 }
  0xb1   :  { %577 = vst [vmem:[%s1220_s3 + $0x1a0] sm:$0xff] %v496_v10 }
  0xb2   :  { %530 = vst [vmem:[%s1220_s3 + $0x28] sm:$0xff] %v378_v13 }
  0xb3   :  { %546 = vst [vmem:[%s1220_s3 + $0xa8] sm:$0xff] %v418_v14 }
  0xb5   :  { %v457_v15 = vpop.f32.mrf.mxu2  ;;  %v497_v16 = vpop.f32.mrf.mxu3 }
  0xb6   :  { %v458_v17 = vadd.f32 %v959_v34, %v457_v15  ;;  %v498_v18 = vadd.f32 %v959_v34, %v497_v16  ;;  %v380_v19 = vpop.f32.mrf.mxu0  ;;  %v420_v20 = vpop.f32.mrf.mxu1 }
  0xb7   :  { %v381_v21 = vadd.f32 %v959_v34, %v380_v19  ;;  %v421_v22 = vadd.f32 %v959_v34, %v420_v20 }
  0xb8   :  { %562 = vst [vmem:[%s1220_s3 + $0x128] sm:$0xff] %v458_v17 }
  0xb9   :  { %578 = vst [vmem:[%s1220_s3 + $0x1a8] sm:$0xff] %v498_v18 }
  0xba   :  { %531 = vst [vmem:[%s1220_s3 + $0x30] sm:$0xff] %v381_v21 }
  0xbb   :  { %547 = vst [vmem:[%s1220_s3 + $0xb0] sm:$0xff] %v421_v22 }
  0xbd   :  { %v460_v23 = vpop.f32.mrf.mxu2  ;;  %v500_v24 = vpop.f32.mrf.mxu3 }
  0xbe   :  { %v461_v25 = vadd.f32 %v959_v34, %v460_v23  ;;  %v501_v26 = vadd.f32 %v959_v34, %v500_v24  ;;  %v382_v27 = vpop.f32.mrf.mxu0  ;;  %v422_v28 = vpop.f32.mrf.mxu1 }
  0xbf   :  { %v383_v29 = vadd.f32 %v959_v34, %v382_v27  ;;  %v423_v30 = vadd.f32 %v959_v34, %v422_v28 }
  0xc0   :  { %563 = vst [vmem:[%s1220_s3 + $0x130] sm:$0xff] %v461_v25 }
  0xc1   :  { %579 = vst [vmem:[%s1220_s3 + $0x1b0] sm:$0xff] %v501_v26 }
  0xc2   :  { %532 = vst [vmem:[%s1220_s3 + $0x38] sm:$0xff] %v383_v29 }
  0xc3   :  { %548 = vst [vmem:[%s1220_s3 + $0xb8] sm:$0xff] %v423_v30 }
  0xc5   :  { %v462_v31 = vpop.f32.mrf.mxu2  ;;  %v502_v32 = vpop.f32.mrf.mxu3 }
  0xc6   :  { %v463_v33 = vadd.f32 %v959_v34, %v462_v31  ;;  %v503_v35 = vadd.f32 %v959_v34, %v502_v32  ;;  %v385_v36 = vpop.f32.mrf.mxu0  ;;  %v425_v37 = vpop.f32.mrf.mxu1 }
  0xc7   :  { %v386_v38 = vadd.f32 %v959_v34, %v385_v36  ;;  %v426_v39 = vadd.f32 %v959_v34, %v425_v37 }
  0xc8   :  { %564 = vst [vmem:[%s1220_s3 + $0x138] sm:$0xff] %v463_v33 }
  0xc9   :  { %580 = vst [vmem:[%s1220_s3 + $0x1b8] sm:$0xff] %v503_v35 }
  0xca   :  { %533 = vst [vmem:[%s1220_s3 + $0x40] sm:$0xff] %v386_v38 }
  0xcb   :  { %549 = vst [vmem:[%s1220_s3 + $0xc0] sm:$0xff] %v426_v39 }
  0xcd   :  { %v465_v40 = vpop.f32.mrf.mxu2  ;;  %v505_v41 = vpop.f32.mrf.mxu3 }
  0xce   :  { %v466_v42 = vadd.f32 %v959_v34, %v465_v40  ;;  %v506_v43 = vadd.f32 %v959_v34, %v505_v41  ;;  %v387_v44 = vpop.f32.mrf.mxu0  ;;  %v427_v45 = vpop.f32.mrf.mxu1 }
  0xcf   :  { %v388_v46 = vadd.f32 %v959_v34, %v387_v44  ;;  %v428_v47 = vadd.f32 %v959_v34, %v427_v45 }
  0xd0   :  { %565 = vst [vmem:[%s1220_s3 + $0x140] sm:$0xff] %v466_v42 }
  0xd1   :  { %581 = vst [vmem:[%s1220_s3 + $0x1c0] sm:$0xff] %v506_v43 }
  0xd2   :  { %534 = vst [vmem:[%s1220_s3 + $0x48] sm:$0xff] %v388_v46 }
  0xd3   :  { %550 = vst [vmem:[%s1220_s3 + $0xc8] sm:$0xff] %v428_v47 }
  0xd5   :  { %v467_v48 = vpop.f32.mrf.mxu2  ;;  %v507_v49 = vpop.f32.mrf.mxu3 }
  0xd6   :  { %v468_v50 = vadd.f32 %v959_v34, %v467_v48  ;;  %v508_v51 = vadd.f32 %v959_v34, %v507_v49  ;;  %v390_v52 = vpop.f32.mrf.mxu0  ;;  %v430_v53 = vpop.f32.mrf.mxu1 }
  0xd7   :  { %v391_v54 = vadd.f32 %v959_v34, %v390_v52  ;;  %v431_v55 = vadd.f32 %v959_v34, %v430_v53 }
  0xd8   :  { %566 = vst [vmem:[%s1220_s3 + $0x148] sm:$0xff] %v468_v50 }
  0xd9   :  { %582 = vst [vmem:[%s1220_s3 + $0x1c8] sm:$0xff] %v508_v51 }
  0xda   :  { %535 = vst [vmem:[%s1220_s3 + $0x50] sm:$0xff] %v391_v54 }
  0xdb   :  { %551 = vst [vmem:[%s1220_s3 + $0xd0] sm:$0xff] %v431_v55 }
  0xdd   :  { %v470_v56 = vpop.f32.mrf.mxu2  ;;  %v510_v57 = vpop.f32.mrf.mxu3 }
  0xde   :  { %v471_v58 = vadd.f32 %v959_v34, %v470_v56  ;;  %v511_v59 = vadd.f32 %v959_v34, %v510_v57  ;;  %v392_v60 = vpop.f32.mrf.mxu0  ;;  %v432_v61 = vpop.f32.mrf.mxu1 }
  0xdf   :  { %v393_v62 = vadd.f32 %v959_v34, %v392_v60  ;;  %v433_v63 = vadd.f32 %v959_v34, %v432_v61 }
  0xe0   :  { %567 = vst [vmem:[%s1220_s3 + $0x150] sm:$0xff] %v471_v58 }
  0xe1   :  { %583 = vst [vmem:[%s1220_s3 + $0x1d0] sm:$0xff] %v511_v59 }
  0xe2   :  { %536 = vst [vmem:[%s1220_s3 + $0x58] sm:$0xff] %v393_v62 }
  0xe3   :  { %552 = vst [vmem:[%s1220_s3 + $0xd8] sm:$0xff] %v433_v63 }
  0xe5   :  { %v472_v0 = vpop.f32.mrf.mxu2  ;;  %v512_v1 = vpop.f32.mrf.mxu3 }
  0xe6   :  { %v473_v2 = vadd.f32 %v959_v34, %v472_v0  ;;  %v513_v3 = vadd.f32 %v959_v34, %v512_v1  ;;  %v395_v4 = vpop.f32.mrf.mxu0  ;;  %v435_v5 = vpop.f32.mrf.mxu1 }
  0xe7   :  { %v396_v6 = vadd.f32 %v959_v34, %v395_v4  ;;  %v436_v7 = vadd.f32 %v959_v34, %v435_v5 }
  0xe8   :  { %568 = vst [vmem:[%s1220_s3 + $0x158] sm:$0xff] %v473_v2 }
  0xe9   :  { %584 = vst [vmem:[%s1220_s3 + $0x1d8] sm:$0xff] %v513_v3 }
  0xea   :  { %537 = vst [vmem:[%s1220_s3 + $0x60] sm:$0xff] %v396_v6 }
  0xeb   :  { %553 = vst [vmem:[%s1220_s3 + $0xe0] sm:$0xff] %v436_v7 }
  0xed   :  { %v475_v8 = vpop.f32.mrf.mxu2  ;;  %v515_v9 = vpop.f32.mrf.mxu3 }
  0xee   :  { %v476_v10 = vadd.f32 %v959_v34, %v475_v8  ;;  %v516_v11 = vadd.f32 %v959_v34, %v515_v9  ;;  %v397_v12 = vpop.f32.mrf.mxu0  ;;  %v437_v13 = vpop.f32.mrf.mxu1 }
  0xef   :  { %v398_v14 = vadd.f32 %v959_v34, %v397_v12  ;;  %v438_v15 = vadd.f32 %v959_v34, %v437_v13 }
  0xf0   :  { %569 = vst [vmem:[%s1220_s3 + $0x160] sm:$0xff] %v476_v10 }
  0xf1   :  { %585 = vst [vmem:[%s1220_s3 + $0x1e0] sm:$0xff] %v516_v11 }
  0xf2   :  { %538 = vst [vmem:[%s1220_s3 + $0x68] sm:$0xff] %v398_v14 }
  0xf3   :  { %554 = vst [vmem:[%s1220_s3 + $0xe8] sm:$0xff] %v438_v15 }
  0xf5   :  { %v477_v16 = vpop.f32.mrf.mxu2  ;;  %v517_v17 = vpop.f32.mrf.mxu3 }
  0xf6   :  { %v478_v18 = vadd.f32 %v959_v34, %v477_v16  ;;  %v518_v19 = vadd.f32 %v959_v34, %v517_v17  ;;  %v400_v20 = vpop.f32.mrf.mxu0  ;;  %v440_v21 = vpop.f32.mrf.mxu1 }
  0xf7   :  { %v401_v22 = vadd.f32 %v959_v34, %v400_v20  ;;  %v441_v23 = vadd.f32 %v959_v34, %v440_v21 }
  0xf8   :  { %570 = vst [vmem:[%s1220_s3 + $0x168] sm:$0xff] %v478_v18 }
  0xf9   :  { %586 = vst [vmem:[%s1220_s3 + $0x1e8] sm:$0xff] %v518_v19 }
  0xfa   :  { %539 = vst [vmem:[%s1220_s3 + $0x70] sm:$0xff] %v401_v22 }
  0xfb   :  { %555 = vst [vmem:[%s1220_s3 + $0xf0] sm:$0xff] %v441_v23 }
  0xfd   :  { %v480_v24 = vpop.f32.mrf.mxu2  ;;  %v520_v25 = vpop.f32.mrf.mxu3 }
  0xfe   :  { %v481_v26 = vadd.f32 %v959_v34, %v480_v24  ;;  %v521_v27 = vadd.f32 %v959_v34, %v520_v25  ;;  %v402_v28 = vpop.f32.mrf.mxu0  ;;  %v442_v29 = vpop.f32.mrf.mxu1 }
  0xff   :  { %v403_v30 = vadd.f32 %v959_v34, %v402_v28  ;;  %v443_v31 = vadd.f32 %v959_v34, %v442_v29 }
 0x100   :  { %571 = vst [vmem:[%s1220_s3 + $0x170] sm:$0xff] %v481_v26 }
 0x101   :  { %587 = vst [vmem:[%s1220_s3 + $0x1f0] sm:$0xff] %v521_v27 }
 0x102   :  { %540 = vst [vmem:[%s1220_s3 + $0x78] sm:$0xff] %v403_v30 }
 0x103   :  { %556 = vst [vmem:[%s1220_s3 + $0xf8] sm:$0xff] %v443_v31 }
 0x105   :  { %v482_v32 = vpop.f32.mrf.mxu2  ;;  %v522_v33 = vpop.f32.mrf.mxu3 }
 0x106   :  { %v483_v35 = vadd.f32 %v959_v34, %v482_v32  ;;  %v523_v36 = vadd.f32 %v959_v34, %v522_v33 }
 0x108   :  { %572 = vst [vmem:[%s1220_s3 + $0x178] sm:$0xff] %v483_v35 }
 0x109   :  { %588 = vst [vmem:[%s1220_s3 + $0x1f8] sm:$0xff] %v523_v36 }

// kernel: neg.6
= control target key start
LH: loop header
LB: loop body
LE: loop exit
PB: predicated region body
PF: predicated region fallthrough
CT: control target
= control target key end

     0   :  { %s25_s0 = inlined_call_operand.vmem [shape: f32[9,4], index: 0, kind: input, shape index: {}]   ;;  %s26_s1 = inlined_call_operand.vmem [shape: bf16[9,4], index: 1, kind: output, shape index: {}]  }
   0x1   :  { %v2_v0 = vld [vmem:[%s25_s0] sm:$0xf] }
   0x2   :  { %v5_v1 = vxor.u32 2147483648, %v2_v0 }
   0x4   :  { %v7_v2 = vpack.c.bf16 0.0, %v5_v1 }
   0x6   :  { %8 = vst [vmem:[%s26_s1] sm:$0x3] %v7_v2 }

// kernel: mw_canet_forward.10
= control target key start
LH: loop header
LB: loop body
LE: loop exit
PB: predicated region body
PF: predicated region fallthrough
CT: control target
= control target key end

     0   :  { %vm91_vm0 = vcmask 261120   ;;  %s375_s1 = inlined_call_operand.vmem [shape: bf16[32,128], index: 1, kind: input, shape index: {}]   ;;  %s376_s0 = inlined_call_operand.vmem [shape: bf16[128,32], index: 0, kind: input, shape index: {}]   ;;  %s377_s2 = inlined_call_operand.vmem [shape: f32[1,128], index: 2, kind: input, shape index: {}]   ;;  %s378_s3 = inlined_call_operand.vmem [shape: f32[128,128], index: 3, kind: output, shape index: {}]  }
   0x1   :  { %v258_v0 = vld [vmem:[%s375_s1 + $0x8] sm:$0xff]  ;;  %v257_v1 = vld [vmem:[%s375_s1] sm:$0xff]  ;;  %v251_v3 = vld [vmem:[%s376_s0 + $0x10] sm:$0xff] }
   0x2   :  { %122 = vmatpush.bf16.msra.mxu0 %v258_v0  ;;  %259 = vmatpush.bf16.msra.mxu1 %v258_v0  ;;  %v249_v2 = vld [vmem:[%s376_s0] sm:$0xff]  ;;  %v255_v5 = vld [vmem:[%s376_s0 + $0x30] sm:$0xff]  ;;  %v250_v6 = vld [vmem:[%s376_s0 + $0x8] sm:$0xff] }
   0x3   :  { %260 = vmatpush.bf16.msra.mxu2 %v258_v0  ;;  %261 = vmatpush.bf16.msra.mxu3 %v258_v0  ;;  %v253_v4 = vld [vmem:[%s376_s0 + $0x20] sm:$0xff]  ;;  %v252_v7 = vld [vmem:[%s376_s0 + $0x18] sm:$0xff]  ;;  %v254_v8 = vld [vmem:[%s376_s0 + $0x28] sm:$0xff] }
   0x4   :  { %v256_v9 = vld [vmem:[%s376_s0 + $0x38] sm:$0xff]  ;;  %v265_v10 = vld [vmem:[%s377_s2] ss:$0 sm:$0xff] }
   0x6   :  { %123 = vmatpush.bf16.msra.mxu0 %v257_v1  ;;  %262 = vmatpush.bf16.msra.mxu1 %v257_v1 }
   0x7   :  { %263 = vmatpush.bf16.msra.mxu2 %v257_v1  ;;  %264 = vmatpush.bf16.msra.mxu3 %v257_v1 }
   0x9   :  { %241 = vmatmul.msk.bf16.vlgmr.msra.gmra.mxu0 %vm91_vm0, %v249_v2  ;;  %243 = vmatmul.msk.bf16.vlgmr.msra.gmra.mxu1 %vm91_vm0, %v251_v3 }
   0xa   :  { %245 = vmatmul.msk.bf16.vlgmr.msra.gmra.mxu2 %vm91_vm0, %v253_v4  ;;  %247 = vmatmul.msk.bf16.vlgmr.msra.gmra.mxu3 %vm91_vm0, %v255_v5 }
  0x19   :  { %242 = vmatmul.msk.bf16.gmra.mxu0 %vm91_vm0, %v250_v6  ;;  %244 = vmatmul.msk.bf16.gmra.mxu1 %vm91_vm0, %v252_v7 }
  0x1a   :  { %246 = vmatmul.msk.bf16.gmra.mxu2 %vm91_vm0, %v254_v8  ;;  %248 = vmatmul.msk.bf16.gmra.mxu3 %vm91_vm0, %v256_v9 }
  0x86   :  { %v125_v11 = vpop.f32.mrf.mxu0  ;;  %v135_v12 = vpop.f32.mrf.mxu1 }
  0x87   :  { %v126_v13 = vadd.f32 %v265_v10, %v125_v11  ;;  %v136_v14 = vadd.f32 %v265_v10, %v135_v12 }
  0x89   :  { %v165_v15 = vmax.f32 %v126_v13, 0.0  ;;  %v169_v16 = vmax.f32 %v136_v14, 0.0 }
  0x8b   :  { %181 = vst [vmem:[%s378_s3] sm:$0xff] %v165_v15 }
  0x8c   :  { %185 = vst [vmem:[%s378_s3 + $0x20] sm:$0xff] %v169_v16 }
  0x8d   :  { %v145_v17 = vpop.f32.mrf.mxu2  ;;  %v155_v18 = vpop.f32.mrf.mxu3 }
  0x8e   :  { %v146_v19 = vadd.f32 %v265_v10, %v145_v17  ;;  %v156_v20 = vadd.f32 %v265_v10, %v155_v18  ;;  %v127_v21 = vpop.f32.mrf.mxu0  ;;  %v137_v22 = vpop.f32.mrf.mxu1 }
  0x8f   :  { %v128_v23 = vadd.f32 %v265_v10, %v127_v21  ;;  %v138_v24 = vadd.f32 %v265_v10, %v137_v22 }
  0x90   :  { %v173_v25 = vmax.f32 %v146_v19, 0.0  ;;  %v177_v26 = vmax.f32 %v156_v20, 0.0 }
  0x91   :  { %v166_v27 = vmax.f32 %v128_v23, 0.0  ;;  %v170_v28 = vmax.f32 %v138_v24, 0.0 }
  0x92   :  { %189 = vst [vmem:[%s378_s3 + $0x40] sm:$0xff] %v173_v25 }
  0x93   :  { %193 = vst [vmem:[%s378_s3 + $0x60] sm:$0xff] %v177_v26 }
  0x94   :  { %182 = vst [vmem:[%s378_s3 + $0x8] sm:$0xff] %v166_v27 }
  0x95   :  { %186 = vst [vmem:[%s378_s3 + $0x28] sm:$0xff] %v170_v28  ;;  %v147_v29 = vpop.f32.mrf.mxu2  ;;  %v157_v30 = vpop.f32.mrf.mxu3 }
  0x96   :  { %v148_v31 = vadd.f32 %v265_v10, %v147_v29  ;;  %v158_v32 = vadd.f32 %v265_v10, %v157_v30  ;;  %v130_v33 = vpop.f32.mrf.mxu0  ;;  %v140_v34 = vpop.f32.mrf.mxu1 }
  0x97   :  { %v131_v35 = vadd.f32 %v265_v10, %v130_v33  ;;  %v141_v36 = vadd.f32 %v265_v10, %v140_v34 }
  0x98   :  { %v174_v37 = vmax.f32 %v148_v31, 0.0  ;;  %v178_v38 = vmax.f32 %v158_v32, 0.0 }
  0x99   :  { %v167_v39 = vmax.f32 %v131_v35, 0.0  ;;  %v171_v40 = vmax.f32 %v141_v36, 0.0 }
  0x9a   :  { %190 = vst [vmem:[%s378_s3 + $0x48] sm:$0xff] %v174_v37 }
  0x9b   :  { %194 = vst [vmem:[%s378_s3 + $0x68] sm:$0xff] %v178_v38 }
  0x9c   :  { %183 = vst [vmem:[%s378_s3 + $0x10] sm:$0xff] %v167_v39 }
  0x9d   :  { %187 = vst [vmem:[%s378_s3 + $0x30] sm:$0xff] %v171_v40  ;;  %v150_v41 = vpop.f32.mrf.mxu2  ;;  %v160_v42 = vpop.f32.mrf.mxu3 }
  0x9e   :  { %v151_v43 = vadd.f32 %v265_v10, %v150_v41  ;;  %v161_v44 = vadd.f32 %v265_v10, %v160_v42  ;;  %v132_v45 = vpop.f32.mrf.mxu0  ;;  %v142_v46 = vpop.f32.mrf.mxu1 }
  0x9f   :  { %v133_v47 = vadd.f32 %v265_v10, %v132_v45  ;;  %v143_v48 = vadd.f32 %v265_v10, %v142_v46 }
  0xa0   :  { %v175_v49 = vmax.f32 %v151_v43, 0.0  ;;  %v179_v50 = vmax.f32 %v161_v44, 0.0 }
  0xa1   :  { %v168_v51 = vmax.f32 %v133_v47, 0.0  ;;  %v172_v52 = vmax.f32 %v143_v48, 0.0 }
  0xa2   :  { %191 = vst [vmem:[%s378_s3 + $0x50] sm:$0xff] %v175_v49 }
  0xa3   :  { %195 = vst [vmem:[%s378_s3 + $0x70] sm:$0xff] %v179_v50 }
  0xa4   :  { %184 = vst [vmem:[%s378_s3 + $0x18] sm:$0xff] %v168_v51 }
  0xa5   :  { %188 = vst [vmem:[%s378_s3 + $0x38] sm:$0xff] %v172_v52  ;;  %v152_v53 = vpop.f32.mrf.mxu2  ;;  %v162_v54 = vpop.f32.mrf.mxu3 }
  0xa6   :  { %v153_v55 = vadd.f32 %v265_v10, %v152_v53  ;;  %v163_v56 = vadd.f32 %v265_v10, %v162_v54 }
  0xa8   :  { %v176_v57 = vmax.f32 %v153_v55, 0.0  ;;  %v180_v58 = vmax.f32 %v163_v56, 0.0 }
  0xaa   :  { %192 = vst [vmem:[%s378_s3 + $0x58] sm:$0xff] %v176_v57 }
  0xab   :  { %196 = vst [vmem:[%s378_s3 + $0x78] sm:$0xff] %v180_v58 }

// kernel: mw_canet_forward.11
= control target key start
LH: loop header
LB: loop body
LE: loop exit
PB: predicated region body
PF: predicated region fallthrough
CT: control target
= control target key end

     0   :  { %vm73_vm0 = vcmask 654336   ;;  %s210_s1 = inlined_call_operand.vmem [shape: bf16[80,128], index: 1, kind: input, shape index: {}]   ;;  %s211_s2 = inlined_call_operand.vmem [shape: f32[1,128], index: 2, kind: input, shape index: {}]   ;;  %s212_s0 = inlined_call_operand.vmem [shape: bf16[32,80], index: 0, kind: input, shape index: {}]   ;;  %s213_s3 = inlined_call_operand.vmem [shape: f32[32,128], index: 3, kind: output, shape index: {}]  }
   0x1   :  { %v147_v0 = vld [vmem:[%s210_s1 + $0x20] sm:$0xff]  ;;  %v146_v1 = vld [vmem:[%s210_s1 + $0x18] sm:$0xff]  ;;  %v145_v2 = vld [vmem:[%s210_s1 + $0x10] sm:$0xff] }
   0x2   :  { %83 = vmatpush.bf16.msra.mxu0 %v147_v0  ;;  %148 = vmatpush.bf16.msra.mxu1 %v147_v0  ;;  %v144_v3 = vld [vmem:[%s210_s1 + $0x8] sm:$0xff]  ;;  %v143_v4 = vld [vmem:[%s210_s1] sm:$0xff] }
   0x3   :  { %v141_v5 = vld [vmem:[%s212_s0] sm:$0xff]  ;;  %v142_v6 = vld [vmem:[%s212_s0 + $0x8] sm:$0xff] }
   0x4   :  { %v153_v7 = vld [vmem:[%s211_s2] ss:$0 sm:$0xff] }
   0x6   :  { %84 = vmatpush.bf16.msra.mxu0 %v146_v1  ;;  %149 = vmatpush.bf16.msra.mxu1 %v146_v1 }
   0xa   :  { %85 = vmatpush.bf16.msra.mxu0 %v145_v2  ;;  %150 = vmatpush.bf16.msra.mxu1 %v145_v2 }
   0xe   :  { %86 = vmatpush.bf16.msra.mxu0 %v144_v3  ;;  %151 = vmatpush.bf16.msra.mxu1 %v144_v3 }
  0x12   :  { %87 = vmatpush.bf16.msra.mxu0 %v143_v4  ;;  %152 = vmatpush.bf16.msra.mxu1 %v143_v4 }
  0x15   :  { %139 = vmatmul.msk.bf16.vlgmr.msra.gmra.mxu0 %vm73_vm0, %v141_v5  ;;  %140 = vmatmul.msk.bf16.vlgmr.msra.gmra.mxu1 %vm73_vm0, %v142_v6 }
  0x92   :  { %v89_v8 = vpop.f32.mrf.mxu0  ;;  %v94_v9 = vpop.f32.mrf.mxu1 }
  0x93   :  { %v90_v10 = vadd.f32 %v153_v7, %v89_v8  ;;  %v95_v11 = vadd.f32 %v153_v7, %v94_v9 }
  0x95   :  { %v99_v12 = vmax.f32 %v90_v10, 0.0  ;;  %v101_v13 = vmax.f32 %v95_v11, 0.0 }
  0x97   :  { %103 = vst [vmem:[%s213_s3] sm:$0xff] %v99_v12 }
  0x98   :  { %105 = vst [vmem:[%s213_s3 + $0x10] sm:$0xff] %v101_v13 }
  0x9a   :  { %v91_v14 = vpop.f32.mrf.mxu0  ;;  %v96_v15 = vpop.f32.mrf.mxu1 }
  0x9b   :  { %v92_v16 = vadd.f32 %v153_v7, %v91_v14  ;;  %v97_v17 = vadd.f32 %v153_v7, %v96_v15 }
  0x9d   :  { %v100_v18 = vmax.f32 %v92_v16, 0.0  ;;  %v102_v19 = vmax.f32 %v97_v17, 0.0 }
  0x9f   :  { %104 = vst [vmem:[%s213_s3 + $0x8] sm:$0xff] %v100_v18 }
  0xa0   :  { %106 = vst [vmem:[%s213_s3 + $0x18] sm:$0xff] %v102_v19 }

// kernel: mw_canet_forward.12
= control target key start
LH: loop header
LB: loop body
LE: loop exit
PB: predicated region body
PF: predicated region fallthrough
CT: control target
= control target key end

     0   :  { %vm102_vm0 = vcmask 130048   ;;  %s267_s1 = inlined_call_operand.vmem [shape: bf16[144,128], index: 1, kind: input, shape index: {}]   ;;  %s268_s0 = inlined_call_operand.vmem [shape: bf16[16,144], index: 0, kind: input, shape index: {}]   ;;  %s269_s2 = inlined_call_operand.vmem [shape: f32[1,128], index: 2, kind: input, shape index: {}]   ;;  %s270_s3 = inlined_call_operand.vmem [shape: f32[16,128], index: 3, kind: output, shape index: {}]  }
   0x1   :  { %v196_v0 = vld [vmem:[%s267_s1 + $0x38] sm:$0xff]  ;;  %v195_v1 = vld [vmem:[%s267_s1 + $0x30] sm:$0xff]  ;;  %v197_v2 = vld [vmem:[%s267_s1 + $0x40] sm:$0xff] }
   0x2   :  { %106 = vmatpush.bf16.msra.mxu0 %v196_v0  ;;  %v187_v3 = vld [vmem:[%s268_s0 + $0x4] sm:$0xf]  ;;  %v146_v4 = vld [vmem:[%s268_s0 + $0x8] sm:$0xf0]  ;;  %127 = vmatpush.bf16.msra.mxu1 %v197_v2  ;;  %v192_v8 = vld [vmem:[%s267_s1 + $0x18] sm:$0xff] }
   0x3   :  { %v149_v5 = vor.u32 %v187_v3, %v146_v4  ;;  %v194_v6 = vld [vmem:[%s267_s1 + $0x28] sm:$0xff]  ;;  %v193_v7 = vld [vmem:[%s267_s1 + $0x20] sm:$0xff]  ;;  %v191_v9 = vld [vmem:[%s267_s1 + $0x10] sm:$0xff] }
   0x4   :  { %v190_v10 = vld [vmem:[%s267_s1 + $0x8] sm:$0xff]  ;;  %v189_v11 = vld [vmem:[%s267_s1] sm:$0xff] }
   0x5   :  { %186 = vmatmul.msk.bf16.vlgmr.msra.gmra.mxu1 %vm102_vm0, %v149_v5  ;;  %v144_v12 = vld [vmem:[%s268_s0] sm:$0xf]  ;;  %v188_v13 = vld [vmem:[%s268_s0 + $0x4] sm:$0xf0] }
   0x6   :  { %107 = vmatpush.bf16.msra.mxu0 %v195_v1  ;;  %v145_v14 = vor.u32 %v188_v13, %v144_v12  ;;  %v198_v15 = vld [vmem:[%s269_s2] ss:$0 sm:$0xff] }
   0xa   :  { %108 = vmatpush.bf16.msra.mxu0 %v194_v6 }
   0xe   :  { %109 = vmatpush.bf16.msra.mxu0 %v193_v7 }
  0x12   :  { %110 = vmatpush.bf16.msra.mxu0 %v192_v8 }
  0x16   :  { %111 = vmatpush.bf16.msra.mxu0 %v191_v9 }
  0x1a   :  { %112 = vmatpush.bf16.msra.mxu0 %v190_v10 }
  0x1e   :  { %113 = vmatpush.bf16.msra.mxu0 %v189_v11 }
  0x21   :  { %114 = vmatmul.bf16.vlgmr.msra.gmra.mxu0 %v145_v14 }
  0x82   :  { %v129_v16 = vpop.f32.mrf.mxu1 }
  0x8a   :  { %v131_v23 = vpop.f32.mrf.mxu1 }
  0x9e   :  { %v115_v17 = vpop.f32.mrf.mxu0 }
  0x9f   :  { %v116_v18 = vadd.f32 %v198_v15, %v115_v17 }
  0xa1   :  { %v130_v19 = vadd.f32 %v129_v16, %v116_v18 }
  0xa3   :  { %v134_v20 = vmax.f32 %v130_v19, 0.0 }
  0xa5   :  { %136 = vst [vmem:[%s270_s3] sm:$0xff] %v134_v20 }
  0xa6   :  { %v117_v21 = vpop.f32.mrf.mxu0 }
  0xa7   :  { %v118_v22 = vadd.f32 %v198_v15, %v117_v21 }
  0xa9   :  { %v132_v24 = vadd.f32 %v131_v23, %v118_v22 }
  0xab   :  { %v135_v25 = vmax.f32 %v132_v24, 0.0 }
  0xad   :  { %137 = vst [vmem:[%s270_s3 + $0x8] sm:$0xff] %v135_v25 }

// kernel: mw_canet_forward.13
= control target key start
LH: loop header
LB: loop body
LE: loop exit
PB: predicated region body
PF: predicated region fallthrough
CT: control target
= control target key end

     0   :  { %vm182_vm0 = vcmask 261120   ;;  %s444_s1 = inlined_call_operand.vmem [shape: bf16[288,128], index: 1, kind: input, shape index: {}]   ;;  %s445_s0 = inlined_call_operand.vmem [shape: bf16[16,288], index: 0, kind: input, shape index: {}]   ;;  %s446_s2 = inlined_call_operand.vmem [shape: f32[1,128], index: 2, kind: input, shape index: {}]   ;;  %s447_s3 = inlined_call_operand.vmem [shape: f32[16,128], index: 3, kind: output, shape index: {}]  }
   0x1   :  { %v331_v0 = vld [vmem:[%s444_s1 + $0x38] sm:$0xff]  ;;  %v330_v2 = vld [vmem:[%s444_s1 + $0x30] sm:$0xff]  ;;  %v341_v4 = vld [vmem:[%s444_s1 + $0x88] sm:$0xff] }
   0x2   :  { %v339_v1 = vld [vmem:[%s444_s1 + $0x78] sm:$0xff]  ;;  %186 = vmatpush.bf16.msra.mxu0 %v331_v0  ;;  %v338_v3 = vld [vmem:[%s444_s1 + $0x70] sm:$0xff]  ;;  %220 = vmatpush.bf16.msra.mxu2 %v341_v4  ;;  %v340_v5 = vld [vmem:[%s444_s1 + $0x80] sm:$0xff] }
   0x3   :  { %200 = vmatpush.bf16.msra.mxu1 %v339_v1  ;;  %v246_v6 = vld [vmem:[%s445_s0 + $0x8] sm:$0xf]  ;;  %v323_v7 = vld [vmem:[%s445_s0 + $0x10] sm:$0xf0]  ;;  %v328_v11 = vld [vmem:[%s444_s1 + $0x20] sm:$0xff] }
   0x4   :  { %v329_v8 = vld [vmem:[%s444_s1 + $0x28] sm:$0xff]  ;;  %v247_v10 = vor.u32 %v323_v7, %v246_v6  ;;  %v336_v12 = vld [vmem:[%s444_s1 + $0x60] sm:$0xff]  ;;  %v327_v13 = vld [vmem:[%s444_s1 + $0x18] sm:$0xff] }
   0x5   :  { %v337_v9 = vld [vmem:[%s444_s1 + $0x68] sm:$0xff]  ;;  %v335_v14 = vld [vmem:[%s444_s1 + $0x58] sm:$0xff]  ;;  %v326_v15 = vld [vmem:[%s444_s1 + $0x10] sm:$0xff] }
   0x6   :  { %187 = vmatpush.bf16.msra.mxu0 %v330_v2  ;;  %221 = vmatpush.bf16.msra.mxu2 %v340_v5  ;;  %v334_v16 = vld [vmem:[%s444_s1 + $0x50] sm:$0xff]  ;;  %v325_v17 = vld [vmem:[%s444_s1 + $0x8] sm:$0xff]  ;;  %v324_v19 = vld [vmem:[%s444_s1] sm:$0xff] }
   0x7   :  { %201 = vmatpush.bf16.msra.mxu1 %v338_v3  ;;  %v333_v18 = vld [vmem:[%s444_s1 + $0x48] sm:$0xff]  ;;  %v332_v20 = vld [vmem:[%s444_s1 + $0x40] sm:$0xff]  ;;  %v240_v24 = vld [vmem:[%s445_s0 + $0xc] sm:$0xf0] }
   0x8   :  { %v238_v21 = vld [vmem:[%s445_s0] sm:$0xf]  ;;  %v322_v22 = vld [vmem:[%s445_s0 + $0x8] sm:$0xf0]  ;;  %v321_v23 = vld [vmem:[%s445_s0 + $0x4] sm:$0xf] }
   0x9   :  { %320 = vmatmul.msk.bf16.vlgmr.msra.gmra.mxu2 %vm182_vm0, %v247_v10  ;;  %v239_v25 = vor.u32 %v322_v22, %v238_v21  ;;  %v243_v26 = vor.u32 %v321_v23, %v240_v24  ;;  %v342_v27 = vld [vmem:[%s446_s2] ss:$0 sm:$0xff] }
   0xa   :  { %188 = vmatpush.bf16.msra.mxu0 %v329_v8 }
   0xb   :  { %202 = vmatpush.bf16.msra.mxu1 %v337_v9 }
   0xe   :  { %189 = vmatpush.bf16.msra.mxu0 %v328_v11 }
   0xf   :  { %203 = vmatpush.bf16.msra.mxu1 %v336_v12 }
  0x12   :  { %190 = vmatpush.bf16.msra.mxu0 %v327_v13 }
  0x13   :  { %204 = vmatpush.bf16.msra.mxu1 %v335_v14 }
  0x16   :  { %191 = vmatpush.bf16.msra.mxu0 %v326_v15 }
  0x17   :  { %205 = vmatpush.bf16.msra.mxu1 %v334_v16 }
  0x1a   :  { %192 = vmatpush.bf16.msra.mxu0 %v325_v17 }
  0x1b   :  { %206 = vmatpush.bf16.msra.mxu1 %v333_v18 }
  0x1e   :  { %193 = vmatpush.bf16.msra.mxu0 %v324_v19 }
  0x1f   :  { %207 = vmatpush.bf16.msra.mxu1 %v332_v20 }
  0x21   :  { %194 = vmatmul.bf16.vlgmr.msra.gmra.mxu0 %v239_v25 }
  0x22   :  { %208 = vmatmul.bf16.vlgmr.msra.gmra.mxu1 %v243_v26 }
  0x8c   :  { %v223_v31 = vpop.f32.mrf.mxu2 }
  0x94   :  { %v225_v39 = vpop.f32.mrf.mxu2 }
  0x9e   :  { %v195_v28 = vpop.f32.mrf.mxu0 }
  0x9f   :  { %v209_v29 = vpop.f32.mrf.mxu1  ;;  %v196_v30 = vadd.f32 %v342_v27, %v195_v28 }
  0xa1   :  { %v210_v32 = vadd.f32 %v209_v29, %v196_v30 }
  0xa3   :  { %v224_v33 = vadd.f32 %v223_v31, %v210_v32 }
  0xa5   :  { %v228_v34 = vmax.f32 %v224_v33, 0.0 }
  0xa6   :  { %v197_v35 = vpop.f32.mrf.mxu0 }
  0xa7   :  { %230 = vst [vmem:[%s447_s3] sm:$0xff] %v228_v34  ;;  %v198_v36 = vadd.f32 %v342_v27, %v197_v35  ;;  %v211_v37 = vpop.f32.mrf.mxu1 }
  0xa9   :  { %v212_v38 = vadd.f32 %v211_v37, %v198_v36 }
  0xab   :  { %v226_v40 = vadd.f32 %v225_v39, %v212_v38 }
  0xad   :  { %v229_v41 = vmax.f32 %v226_v40, 0.0 }
  0xaf   :  { %231 = vst [vmem:[%s447_s3 + $0x8] sm:$0xff] %v229_v41 }

// kernel: mw_canet_forward.14
= control target key start
LH: loop header
LB: loop body
LE: loop exit
PB: predicated region body
PF: predicated region fallthrough
CT: control target
= control target key end

     0   :  { %vm113_vm0 = vcmask 130048   ;;  %s334_s1 = inlined_call_operand.vmem [shape: bf16[144,128], index: 1, kind: input, shape index: {}]   ;;  %s335_s0 = inlined_call_operand.vmem [shape: bf16[32,144], index: 0, kind: input, shape index: {}]   ;;  %s336_s2 = inlined_call_operand.vmem [shape: f32[1,128], index: 2, kind: input, shape index: {}]   ;;  %s337_s3 = inlined_call_operand.vmem [shape: f32[32,128], index: 3, kind: output, shape index: {}]  }
   0x1   :  { %v235_v0 = vld [vmem:[%s334_s1 + $0x38] sm:$0xff]  ;;  %v236_v1 = vld [vmem:[%s334_s1 + $0x40] sm:$0xff]  ;;  %v234_v3 = vld [vmem:[%s334_s1 + $0x30] sm:$0xff] }
   0x2   :  { %v224_v2 = vld [vmem:[%s335_s0 + $0x4] sm:$0xf]  ;;  %120 = vmatpush.bf16.msra.mxu0 %v235_v0  ;;  %237 = vmatpush.bf16.msra.mxu2 %v235_v0  ;;  %v174_v4 = vld [vmem:[%s335_s0 + $0x8] sm:$0xf0]  ;;  %v231_v8 = vld [vmem:[%s334_s1 + $0x18] sm:$0xff] }
   0x3   :  { %146 = vmatpush.bf16.msra.mxu1 %v236_v1  ;;  %v177_v5 = vor.u32 %v224_v2, %v174_v4  ;;  %v233_v6 = vld [vmem:[%s334_s1 + $0x28] sm:$0xff]  ;;  %v232_v7 = vld [vmem:[%s334_s1 + $0x20] sm:$0xff]  ;;  %v226_v9 = vld [vmem:[%s335_s0 + $0x14] sm:$0xf] }
   0x4   :  { %v182_v10 = vld [vmem:[%s335_s0 + $0x18] sm:$0xf0]  ;;  %v230_v11 = vld [vmem:[%s334_s1 + $0x10] sm:$0xff]  ;;  %v229_v13 = vld [vmem:[%s334_s1 + $0x8] sm:$0xff] }
   0x5   :  { %v185_v12 = vor.u32 %v226_v9, %v182_v10  ;;  %v228_v14 = vld [vmem:[%s334_s1] sm:$0xff]  ;;  %v225_v16 = vld [vmem:[%s335_s0 + $0x4] sm:$0xf0]  ;;  %v180_v17 = vld [vmem:[%s335_s0 + $0x10] sm:$0xf] }
   0x6   :  { %121 = vmatpush.bf16.msra.mxu0 %v234_v3  ;;  %238 = vmatpush.bf16.msra.mxu2 %v234_v3  ;;  %v172_v15 = vld [vmem:[%s335_s0] sm:$0xf]  ;;  %v227_v18 = vld [vmem:[%s335_s0 + $0x14] sm:$0xf0] }
   0x7   :  { %222 = vmatmul.msk.bf16.vlgmr.msra.gmra.mxu1 %vm113_vm0, %v177_v5  ;;  %v173_v19 = vor.u32 %v225_v16, %v172_v15  ;;  %v181_v20 = vor.u32 %v227_v18, %v180_v17  ;;  %v245_v23 = vld [vmem:[%s336_s2] ss:$0 sm:$0xff] }
   0xa   :  { %122 = vmatpush.bf16.msra.mxu0 %v233_v6  ;;  %239 = vmatpush.bf16.msra.mxu2 %v233_v6 }
   0xe   :  { %123 = vmatpush.bf16.msra.mxu0 %v232_v7  ;;  %240 = vmatpush.bf16.msra.mxu2 %v232_v7 }
  0x12   :  { %124 = vmatpush.bf16.msra.mxu0 %v231_v8  ;;  %241 = vmatpush.bf16.msra.mxu2 %v231_v8 }
  0x16   :  { %125 = vmatpush.bf16.msra.mxu0 %v230_v11  ;;  %242 = vmatpush.bf16.msra.mxu2 %v230_v11 }
  0x17   :  { %223 = vmatmul.msk.bf16.gmra.mxu1 %vm113_vm0, %v185_v12 }
  0x1a   :  { %126 = vmatpush.bf16.msra.mxu0 %v229_v13  ;;  %243 = vmatpush.bf16.msra.mxu2 %v229_v13 }
  0x1e   :  { %127 = vmatpush.bf16.msra.mxu0 %v228_v14  ;;  %244 = vmatpush.bf16.msra.mxu2 %v228_v14 }
  0x21   :  { %128 = vmatmul.bf16.vlgmr.msra.gmra.mxu0 %v173_v19  ;;  %133 = vmatmul.bf16.vlgmr.msra.gmra.mxu2 %v181_v20 }
  0x84   :  { %v148_v21 = vpop.f32.mrf.mxu1 }
  0x8c   :  { %v150_v22 = vpop.f32.mrf.mxu1 }
  0x94   :  { %v153_v28 = vpop.f32.mrf.mxu1 }
  0x9c   :  { %v155_v39 = vpop.f32.mrf.mxu1 }
  0x9e   :  { %v129_v24 = vpop.f32.mrf.mxu0 }
  0x9f   :  { %v130_v25 = vadd.f32 %v245_v23, %v129_v24 }
  0xa1   :  { %v149_v26 = vadd.f32 %v148_v21, %v130_v25 }
  0xa3   :  { %v158_v27 = vmax.f32 %v149_v26, 0.0 }
  0xa4   :  { %v134_v29 = vpop.f32.mrf.mxu2 }
  0xa5   :  { %162 = vst [vmem:[%s337_s3] sm:$0xff] %v158_v27  ;;  %v135_v30 = vadd.f32 %v245_v23, %v134_v29 }
  0xa6   :  { %v131_v31 = vpop.f32.mrf.mxu0 }
  0xa7   :  { %v154_v32 = vadd.f32 %v153_v28, %v135_v30  ;;  %v132_v33 = vadd.f32 %v245_v23, %v131_v31 }
  0xa9   :  { %v160_v34 = vmax.f32 %v154_v32, 0.0  ;;  %v151_v35 = vadd.f32 %v150_v22, %v132_v33 }
  0xab   :  { %164 = vst [vmem:[%s337_s3 + $0x10] sm:$0xff] %v160_v34  ;;  %v159_v36 = vmax.f32 %v151_v35, 0.0 }
  0xac   :  { %v136_v37 = vpop.f32.mrf.mxu2 }
  0xad   :  { %163 = vst [vmem:[%s337_s3 + $0x8] sm:$0xff] %v159_v36  ;;  %v137_v38 = vadd.f32 %v245_v23, %v136_v37 }
  0xaf   :  { %v156_v40 = vadd.f32 %v155_v39, %v137_v38 }
  0xb1   :  { %v161_v41 = vmax.f32 %v156_v40, 0.0 }
  0xb3   :  { %165 = vst [vmem:[%s337_s3 + $0x18] sm:$0xff] %v161_v41 }

// kernel: neg.11
= control target key start
LH: loop header
LB: loop body
LE: loop exit
PB: predicated region body
PF: predicated region fallthrough
CT: control target
= control target key end

     0   :  { %s25_s0 = inlined_call_operand.vmem [shape: f32[36,4], index: 0, kind: input, shape index: {}]   ;;  %s26_s1 = inlined_call_operand.vmem [shape: bf16[36,4], index: 1, kind: output, shape index: {}]  }
   0x1   :  { %v2_v0 = vld [vmem:[%s25_s0] sm:$0xf] }
   0x2   :  { %v5_v1 = vxor.u32 2147483648, %v2_v0 }
   0x4   :  { %v7_v2 = vpack.c.bf16 0.0, %v5_v1 }
   0x6   :  { %8 = vst [vmem:[%s26_s1] sm:$0x3] %v7_v2 }

// kernel: mw_canet_forward.15
= control target key start
LH: loop header
LB: loop body
LE: loop exit
PB: predicated region body
PF: predicated region fallthrough
CT: control target
= control target key end

     0   :  { %vm121_vm0 = vcmask 654336   ;;  %s2780_s1 = inlined_call_operand.vmem [shape: bf16[80,128], index: 1, kind: input, shape index: {}]   ;;  %s2781_s2 = inlined_call_operand.vmem [shape: bf16[80,128], index: 2, kind: input, shape index: {}]   ;;  %s2782_s3 = inlined_call_operand.vmem [shape: f32[1,128], index: 3, kind: input, shape index: {}]   ;;  %s2783_s0 = inlined_call_operand.vmem [shape: bf16[128,80], index: 0, kind: input, shape index: {}]   ;;  %s2784_s4 = inlined_call_operand.vmem [shape: f32[1,128], index: 4, kind: input, shape index: {}]   ;;  %s2785_s5 = inlined_call_operand.vmem [shape: f32[128,128], index: 5, kind: output, shape index: {}]  }
   0x1   :  { %v1368_v0 = vld [vmem:[%s2780_s1 + $0x20] sm:$0xff]  ;;  %v1367_v2 = vld [vmem:[%s2780_s1 + $0x18] sm:$0xff]  ;;  %v1366_v4 = vld [vmem:[%s2780_s1 + $0x10] sm:$0xff] }
   0x2   :  { %v1373_v1 = vld [vmem:[%s2781_s2 + $0x20] sm:$0xff]  ;;  %149 = vmatpush.bf16.msra.mxu0 %v1368_v0  ;;  %1374 = vmatpush.bf16.msra.mxu2 %v1368_v0  ;;  %v1372_v3 = vld [vmem:[%s2781_s2 + $0x18] sm:$0xff]  ;;  %v1371_v5 = vld [vmem:[%s2781_s2 + $0x10] sm:$0xff] }
   0x3   :  { %242 = vmatpush.bf16.msra.mxu1 %v1373_v1  ;;  %1379 = vmatpush.bf16.msra.mxu3 %v1373_v1  ;;  %v1365_v6 = vld [vmem:[%s2780_s1 + $0x8] sm:$0xff]  ;;  %v1364_v8 = vld [vmem:[%s2780_s1] sm:$0xff]  ;;  %v1358_v14 = vld [vmem:[%s2783_s0 + $0x10] sm:$0xff] }
   0x4   :  { %v1370_v7 = vld [vmem:[%s2781_s2 + $0x8] sm:$0xff]  ;;  %v1369_v9 = vld [vmem:[%s2781_s2] sm:$0xff]  ;;  %v1362_v15 = vld [vmem:[%s2783_s0 + $0x30] sm:$0xff] }
   0x5   :  { %v1356_v10 = vld [vmem:[%s2783_s0] sm:$0xff]  ;;  %v1357_v12 = vld [vmem:[%s2783_s0 + $0x8] sm:$0xff]  ;;  %v1359_v16 = vld [vmem:[%s2783_s0 + $0x18] sm:$0xff] }
   0x6   :  { %150 = vmatpush.bf16.msra.mxu0 %v1367_v2  ;;  %1375 = vmatpush.bf16.msra.mxu2 %v1367_v2  ;;  %v1360_v11 = vld [vmem:[%s2783_s0 + $0x20] sm:$0xff]  ;;  %v1361_v13 = vld [vmem:[%s2783_s0 + $0x28] sm:$0xff]  ;;  %v1363_v17 = vld [vmem:[%s2783_s0 + $0x38] sm:$0xff] }
   0x7   :  { %243 = vmatpush.bf16.msra.mxu1 %v1372_v3  ;;  %1380 = vmatpush.bf16.msra.mxu3 %v1372_v3  ;;  %v1527_v18 = vld [vmem:[%s2782_s3] ss:$0 sm:$0xff] }
   0x8   :  { %v1532_v19 = vld [vmem:[%s2784_s4] ss:$0 sm:$0xff] }
   0xa   :  { %151 = vmatpush.bf16.msra.mxu0 %v1366_v4  ;;  %1376 = vmatpush.bf16.msra.mxu2 %v1366_v4 }
   0xb   :  { %244 = vmatpush.bf16.msra.mxu1 %v1371_v5  ;;  %1381 = vmatpush.bf16.msra.mxu3 %v1371_v5 }
   0xe   :  { %152 = vmatpush.bf16.msra.mxu0 %v1365_v6  ;;  %1377 = vmatpush.bf16.msra.mxu2 %v1365_v6 }
   0xf   :  { %245 = vmatpush.bf16.msra.mxu1 %v1370_v7  ;;  %1382 = vmatpush.bf16.msra.mxu3 %v1370_v7 }
  0x12   :  { %153 = vmatpush.bf16.msra.mxu0 %v1364_v8  ;;  %1378 = vmatpush.bf16.msra.mxu2 %v1364_v8 }
  0x13   :  { %246 = vmatpush.bf16.msra.mxu1 %v1369_v9  ;;  %1383 = vmatpush.bf16.msra.mxu3 %v1369_v9 }
  0x15   :  { %1320 = vmatmul.msk.bf16.vlgmr.msra.gmra.mxu0 %vm121_vm0, %v1356_v10  ;;  %1324 = vmatmul.msk.bf16.vlgmr.msra.gmra.mxu2 %vm121_vm0, %v1360_v11 }
  0x16   :  { %1348 = vmatmul.msk.bf16.vlgmr.msra.gmra.mxu1 %vm121_vm0, %v1356_v10  ;;  %1352 = vmatmul.msk.bf16.vlgmr.msra.gmra.mxu3 %vm121_vm0, %v1360_v11  ;;  %v2826_v10 = vmov 0 }
  0x25   :  { %1321 = vmatmul.msk.bf16.gmra.mxu0 %vm121_vm0, %v1357_v12  ;;  %1325 = vmatmul.msk.bf16.gmra.mxu2 %vm121_vm0, %v1361_v13 }
  0x26   :  { %1349 = vmatmul.msk.bf16.gmra.mxu1 %vm121_vm0, %v1357_v12  ;;  %1353 = vmatmul.msk.bf16.gmra.mxu3 %vm121_vm0, %v1361_v13 }
  0x35   :  { %1322 = vmatmul.msk.bf16.gmra.mxu0 %vm121_vm0, %v1358_v14  ;;  %1326 = vmatmul.msk.bf16.gmra.mxu2 %vm121_vm0, %v1362_v15 }
  0x36   :  { %1350 = vmatmul.msk.bf16.gmra.mxu1 %vm121_vm0, %v1358_v14  ;;  %1354 = vmatmul.msk.bf16.gmra.mxu3 %vm121_vm0, %v1362_v15 }
  0x45   :  { %1323 = vmatmul.msk.bf16.gmra.mxu0 %vm121_vm0, %v1359_v16  ;;  %1327 = vmatmul.msk.bf16.gmra.mxu2 %vm121_vm0, %v1363_v17 }
  0x46   :  { %1351 = vmatmul.msk.bf16.gmra.mxu1 %vm121_vm0, %v1359_v16  ;;  %1355 = vmatmul.msk.bf16.gmra.mxu3 %vm121_vm0, %v1363_v17 }
  0x92   :  { %v155_v20 = vpop.f32.mrf.mxu0 }
  0x93   :  { %v1535_v21 = vadd.f32 %v1527_v18, %v155_v20  ;;  %v248_v22 = vpop.f32.mrf.mxu1 }
  0x94   :  { %v1538_v23 = vadd.f32 %v1532_v19, %v248_v22 }
  0x95   :  { %v1541_v24 = vand.u32 2147483647, %v1535_v21  ;;  %vm335_vm1 = vcmp.ne.f32.partialorder %v1535_v21, %v1535_v21 }
  0x96   :  { %v1546_v25 = vand.u32 2147483647, %v1538_v23  ;;  %vm336_vm2 = vcmp.ne.f32.partialorder %v1538_v23, %v1538_v23 }
  0x97   :  { %vm1550_vm3 = vmor %vm335_vm1, %vm336_vm2  ;;  %vm341_vm4 = vcmp.eq.s32.totalorder %v1541_v24, inf }
  0x98   :  { %v291_v27 = vmax.f32 %v1541_v24, %v1546_v25  ;;  %vm342_vm5 = vcmp.eq.s32.totalorder %v1546_v25, inf  ;;  %v175_v28 = vpop.f32.mrf.mxu2  ;;  %v290_v60 = vmin.f32 %v1541_v24, %v1546_v25 }
  0x99   :  { %vm1558_vm6 = vmand %vm341_vm4, %vm342_vm5  ;;  %v1563_v30 = vadd.f32 %v1527_v18, %v175_v28  ;;  %v268_v31 = vpop.f32.mrf.mxu3 }
  0x9a   :  { %1388 = vrcp.f32 %v291_v27  ;;  %v157_v32 = vpop.f32.mrf.mxu0  ;;  %v1571_v34 = vadd.f32 %v1532_v19, %v268_v31  ;;  %vm297_vm13 = vweird.f32 %v291_v27  ;;  %v303_v46 = vand.u32 2147483648, %v291_v27 }
  0x9b   :  { %v1566_v33 = vand.u32 2147483647, %v1563_v30  ;;  %vm815_vm7 = vcmp.ne.f32.partialorder %v1563_v30, %v1563_v30  ;;  %v1574_v35 = vadd.f32 %v1527_v18, %v157_v32  ;;  %v250_v36 = vpop.f32.mrf.mxu1  ;;  %v301_v50 = vand.u32 2147483647, %v291_v27 }
  0x9c   :  { %v1577_v37 = vand.u32 2147483647, %v1571_v34  ;;  %vm816_vm8 = vcmp.ne.f32.partialorder %v1571_v34, %v1571_v34  ;;  %v1587_v40 = vadd.f32 %v1532_v19, %v250_v36  ;;  %v304_v56 = vor.u32 1.1754944e-38, %v303_v46 }
  0x9d   :  { %vm1581_vm9 = vmor %vm815_vm7, %vm816_vm8  ;;  %vm821_vm10 = vcmp.eq.s32.totalorder %v1566_v33, inf  ;;  %v1592_v43 = vand.u32 2147483647, %v1574_v35  ;;  %vm395_vm12 = vcmp.ne.f32.partialorder %v1574_v35, %v1574_v35  ;;  %vm302_vm8 = vcmp.eq.f32.partialorder %v301_v50, 8.507059e+37 }
  0x9e   :  { %v771_v42 = vmax.f32 %v1566_v33, %v1577_v37  ;;  %vm822_vm11 = vcmp.eq.s32.totalorder %v1577_v37, inf  ;;  %v1602_v47 = vand.u32 2147483647, %v1587_v40  ;;  %vm396_vm0 = vcmp.ne.f32.partialorder %v1587_v40, %v1587_v40 }
  0x9f   :  { %vm1597_vm14 = vmand %vm821_vm10, %vm822_vm11  ;;  %vm401_vm2 = vcmp.eq.s32.totalorder %v1592_v43, inf  ;;  %vm2786_vm11 = vcmp.lt.f32.partialorder %v1535_v21, 0.0  ;;  %v770_v15 = vmin.f32 %v1566_v33, %v1577_v37  ;;  %v2787_v46 = vmov 0.0  }
  0xa0   :  { %v1389_v38 = vpop.eup %1388  ;;  %1390 = vrcp.f32 %v771_v42  ;;  %v177_v48 = vpop.f32.mrf.mxu2  ;;  %vm1606_vm1 = vmor %vm395_vm12, %vm396_vm0  ;;  %v1613_v53 = vmax.f32 %v1592_v43, %v1602_v47  ;;  %vm402_vm5 = vcmp.eq.s32.totalorder %v1602_v47, inf  ;;  %v781_v3 = vand.u32 2147483647, %v771_v42 }
  0xa1   :  { %v293_v41 = vmul.f32 %v1389_v38, %v291_v27  ;;  %vm298_vm15 = vweird.f32 %v1389_v38  ;;  %v270_v52 = vpop.f32.mrf.mxu3  ;;  %v1618_v55 = vadd.f32 %v1527_v18, %v177_v48  ;;  %vm1621_vm7 = vmand %vm401_vm2, %vm402_vm5  ;;  %v783_v6 = vand.u32 2147483648, %v771_v42 }
  0xa2   :  { %vm299_vm4 = vmor %vm297_vm13, %vm298_vm15  ;;  %1392 = vrcp.f32 %v1613_v53  ;;  %v1626_v58 = vadd.f32 %v1532_v19, %v270_v52  ;;  %vm331_vm15 = vcmp.lt.s32.totalorder %v1535_v21, 0  ;;  %v160_v11 = vpop.f32.mrf.mxu0  ;;  %v2828_v27 = vmov 0 }
  0xa3   :  { %v294_v44 = vsub.f32 1.0, %v293_v41  ;;  %v1631_v0 = vand.u32 2147483647, %v1618_v55  ;;  %vm875_vm10 = vcmp.ne.f32.partialorder %v1618_v55, %v1618_v55  ;;  %v253_v14 = vpop.f32.mrf.mxu1  ;;  %v784_v20 = vor.u32 1.1754944e-38, %v783_v6 }
  0xa4   :  { %v1639_v4 = vand.u32 2147483647, %v1626_v58  ;;  %vm876_vm13 = vcmp.ne.f32.partialorder %v1626_v58, %v1626_v58  ;;  %v1671_v28 = vadd.f32 %v1527_v18, %v160_v11  ;;  %v361_v32 = vand.u32 2147483647, %v1613_v53 }
  0xa5   :  { %v295_v49 = vmul.f32 %v1389_v38, %v294_v44  ;;  %vm1652_vm0 = vmor %vm875_vm10, %vm876_vm13  ;;  %vm881_vm2 = vcmp.eq.s32.totalorder %v1631_v0, inf  ;;  %vm782_vm10 = vcmp.eq.f32.partialorder %v781_v3, 8.507059e+37  ;;  %v363_v36 = vand.u32 2147483648, %v1613_v53 }
  0xa6   :  { %v1391_v59 = vpop.eup %1390  ;;  %v1650_v9 = vmax.f32 %v1631_v0, %v1639_v4  ;;  %v2827_v10 = vsel %vm1652_vm0, 4294967295, %v2826_v10  ;;  %vm882_vm5 = vcmp.eq.s32.totalorder %v1639_v4, inf  ;;  %2831 = vst [vmem:[#allocation3_spill] sm:$0xff] %v1671_v28  ;;  %v1682_v48 = vsel %vm331_vm15, 3.1415927, %v2787_v46 }
  0xa7   :  { %v296_v54 = vadd.f32 %v1389_v38, %v295_v49  ;;  %v773_v63 = vmul.f32 %v1391_v59, %v771_v42  ;;  %vm778_vm12 = vweird.f32 %v1391_v59  ;;  %vm1666_vm13 = vmand %vm881_vm2, %vm882_vm5  ;;  %v2789_v49 = vmov 0.7853982  }
  0xa8   :  { %v1393_v7 = vpop.eup %1392  ;;  %1394 = vrcp.f32 %v1650_v9  ;;  %v2829_v27 = vsel %vm1666_vm13, 4294967295, %v2828_v27  ;;  %v1687_v50 = vsel %vm2786_vm11, 2.3561945, %v2789_v49  ;;  %vm357_vm2 = vweird.f32 %v1613_v53 }
  0xa9   :  { %v300_v61 = vsel %vm299_vm4, %v1389_v38, %v296_v54  ;;  %v774_v2 = vsub.f32 1.0, %v773_v63  ;;  %vm777_vm4 = vweird.f32 %v771_v42  ;;  %v353_v13 = vmul.f32 %v1393_v7, %v1613_v53  ;;  %2830 = vst [vmem:[#allocation2_spill] sm:$0xff] %v2829_v27 }
  0xaa   :  { %v305_v62 = vsel %vm302_vm8, %v304_v56, %v300_v61  ;;  %vm779_vm8 = vmor %vm777_vm4, %vm778_vm12  ;;  %v1676_v38 = vadd.f32 %v1532_v19, %v253_v14  ;;  %vm358_vm12 = vweird.f32 %v1393_v7  ;;  %v1692_v54 = vand.u32 2147483647, %v1671_v28 }
  0xab   :  { %v1633_v1 = vmul.f32 %v305_v62, %v290_v60  ;;  %v775_v8 = vmul.f32 %v1391_v59, %v774_v2  ;;  %v354_v22 = vsub.f32 1.0, %v353_v13  ;;  %v350_v63 = vmin.f32 %v1592_v43, %v1602_v47  ;;  %vm359_vm15 = vmor %vm357_vm2, %vm358_vm12 }
  0xac   :  { %2832 = vst [vmem:[#allocation4_spill] sm:$0xff] %v1676_v38  ;;  %v364_v2 = vor.u32 1.1754944e-38, %v363_v36  ;;  %v1703_v3 = vand.u32 2147483647, %v1676_v38  ;;  %vm362_vm4 = vcmp.eq.f32.partialorder %v361_v32, 8.507059e+37  ;;  %v180_v36 = vpop.f32.mrf.mxu2  ;;  %vm456_vm12 = vcmp.ne.f32.partialorder %v1676_v38, %v1676_v38 }
  0xad   :  { %v1643_v5 = vmul.f32 %v1633_v1, %v1633_v1  ;;  %v776_v16 = vadd.f32 %v1391_v59, %v775_v8  ;;  %v355_v44 = vmul.f32 %v1393_v7, %v354_v22  ;;  %2833 = vst [vmem:[#allocation5_spill] sm:$0xff] %v1692_v54  ;;  %vm2839_vm13 = vcmp.eq.s32.totalorder %v1692_v54, inf }
  0xae   :  { %v1395_v61 = vpop.eup %1394  ;;  %2834 = vst [vmem:[#allocation6_spill] sm:$0xff] %v1703_v3  ;;  %v1711_v13 = vmax.f32 %v1692_v54, %v1703_v3  ;;  %vm462_vm5 = vcmp.eq.s32.totalorder %v1703_v3, inf }
  0xaf   :  { %v308_v12 = vmul.f32 0.002785687, %v1643_v5  ;;  %v780_v31 = vsel %vm779_vm8, %v1391_v59, %v776_v16  ;;  %v356_v60 = vadd.f32 %v1393_v7, %v355_v44  ;;  %v833_v11 = vmul.f32 %v1395_v61, %v1650_v9  ;;  %vm1747_vm0 = vmand %vm2839_vm13, %vm462_vm5 }
  0xb0   :  { %v785_v42 = vsel %vm782_vm10, %v784_v20, %v780_v31  ;;  %vm455_vm8 = vcmp.ne.f32.partialorder %v1671_v28, %v1671_v28  ;;  %1396 = vrcp.f32 %v1711_v13  ;;  %vm838_vm10 = vweird.f32 %v1395_v61  ;;  %v255_v28 = vpop.f32.mrf.mxu1 }
  0xb1   :  { %v309_v17 = vadd.f32 -0.015866, %v308_v12  ;;  %v1689_v52 = vmul.f32 %v785_v42, %v770_v15  ;;  %v360_v8 = vsel %vm359_vm15, %v1393_v7, %v356_v60  ;;  %v834_v16 = vsub.f32 1.0, %v833_v11 }
  0xb2   :  { %v365_v12 = vsel %vm362_vm4, %v364_v2, %v360_v8  ;;  %v843_v7 = vand.u32 2147483648, %v1650_v9  ;;  %v830_v42 = vmin.f32 %v1631_v0, %v1639_v4  ;;  %vm837_vm15 = vweird.f32 %v1650_v9  ;;  %vm1736_vm4 = vmor %vm455_vm8, %vm456_vm12 }
  0xb3   :  { %v310_v41 = vmul.f32 %v309_v17, %v1643_v5  ;;  %v1698_v62 = vmul.f32 %v1689_v52, %v1689_v52  ;;  %v1713_v15 = vmul.f32 %v365_v12, %v350_v63  ;;  %v841_v17 = vand.u32 2147483647, %v1650_v9  ;;  %vm839_vm11 = vmor %vm837_vm15, %vm838_vm10 }
  0xb4   :  { %v835_v32 = vmul.f32 %v1395_v61, %v834_v16  ;;  %v2835_v63 = vmov 0  ;;  %v1742_v8 = vadd.f32 %v1527_v18, %v180_v36  ;;  %v2840_v9 = vmov 0 }
  0xb5   :  { %v311_v56 = vadd.f32 0.04247222, %v310_v41  ;;  %v788_v53 = vmul.f32 0.002785687, %v1698_v62  ;;  %v1723_v31 = vmul.f32 %v1713_v15, %v1713_v15  ;;  %v2836_v63 = vsel %vm1736_vm4, 4294967295, %v2835_v63 }
  0xb6   :  { %v836_v60 = vadd.f32 %v1395_v61, %v835_v32  ;;  %2837 = vst [vmem:[#allocation7_spill] sm:$0xff] %v2836_v63  ;;  %vm842_vm2 = vcmp.eq.f32.partialorder %v841_v17, 8.507059e+37  ;;  %v2841_v9 = vsel %vm1747_vm0, 4294967295, %v2840_v9  ;;  %vm2843_vm8 = vcmp.lt.s32.totalorder %v1563_v30, 0 }
  0xb7   :  { %v312_v6 = vmul.f32 %v311_v56, %v1643_v5  ;;  %v789_v20 = vadd.f32 -0.015866, %v788_v53  ;;  %v368_v56 = vmul.f32 0.002785687, %v1723_v31  ;;  %2838 = vst [vmem:[#allocation8_spill] sm:$0xff] %v1742_v8  ;;  %vm417_vm13 = vweird.f32 %v1711_v13 }
  0xb8   :  { %v840_v12 = vsel %vm839_vm11, %v1395_v61, %v836_v60  ;;  %2842 = vst [vmem:[#allocation9_spill] sm:$0xff] %v2841_v9  ;;  %v1754_v16 = vsel %vm2843_vm8, 3.1415927, %v2787_v46  ;;  %vm2808_vm11 = vcmp.lt.f32.partialorder %v1563_v30, 0.0  ;;  %v1767_v60 = vand.u32 2147483647, %v1742_v8 }
  0xb9   :  { %v313_v14 = vadd.f32 -0.074975304, %v312_v6  ;;  %v790_v41 = vmul.f32 %v789_v20, %v1698_v62  ;;  %v844_v6 = vor.u32 1.1754944e-38, %v843_v7  ;;  %v369_v53 = vadd.f32 -0.015866, %v368_v56 }
  0xba   :  { %v423_v56 = vand.u32 2147483648, %v1711_v13  ;;  %2844 = vst [vmem:[#allocation10_spill] sm:$0xff] %v1767_v60  ;;  %v410_v46 = vmin.f32 %v1692_v54, %v1703_v3 }
  0xbb   :  { %v314_v22 = vmul.f32 %v313_v14, %v1643_v5  ;;  %v791_v2 = vadd.f32 0.04247222, %v790_v41  ;;  %v1397_v14 = vpop.eup %1396  ;;  %v845_v7 = vsel %vm842_vm2, %v844_v6, %v840_v12  ;;  %v370_v61 = vmul.f32 %v369_v53, %v1723_v31  ;;  %v273_v41 = vpop.f32.mrf.mxu3 }
  0xbc   :  { %v1761_v17 = vmul.f32 %v845_v7, %v830_v42  ;;  %v413_v36 = vmul.f32 %v1397_v14, %v1711_v13  ;;  %vm418_vm12 = vweird.f32 %v1397_v14  ;;  %vm935_vm2 = vcmp.ne.f32.partialorder %v1742_v8, %v1742_v8 }
  0xbd   :  { %v315_v44 = vadd.f32 0.1064488, %v314_v22  ;;  %v792_v20 = vmul.f32 %v791_v2, %v1698_v62  ;;  %v421_v22 = vand.u32 2147483647, %v1711_v13  ;;  %v371_v6 = vadd.f32 0.04247222, %v370_v61  ;;  %vm419_vm5 = vmor %vm417_vm13, %vm418_vm12 }
  0xbe   :  { %v1773_v42 = vmul.f32 %v1761_v17, %v1761_v17  ;;  %v1779_v12 = vadd.f32 %v1532_v19, %v273_v41  ;;  %vm941_vm13 = vcmp.eq.s32.totalorder %v1767_v60, inf }
  0xbf   :  { %v316_v11 = vmul.f32 %v315_v44, %v1643_v5  ;;  %v793_v44 = vadd.f32 -0.074975304, %v792_v20  ;;  %v372_v7 = vmul.f32 %v371_v6, %v1723_v31  ;;  %v2847_v6 = vmov 0 }
  0xc0   :  { %2845 = vst [vmem:[#allocation11_spill] sm:$0xff] %v1779_v12  ;;  %vm936_vm15 = vcmp.ne.f32.partialorder %v1779_v12, %v1779_v12  ;;  %vm422_vm10 = vcmp.eq.f32.partialorder %v421_v22, 8.507059e+37 }
  0xc1   :  { %v317_v32 = vadd.f32 -0.14207031, %v316_v11  ;;  %v414_v11 = vsub.f32 1.0, %v413_v36  ;;  %v794_v53 = vmul.f32 %v793_v44, %v1698_v62  ;;  %v1786_v36 = vand.u32 2147483647, %v1779_v12  ;;  %vm1791_vm8 = vmor %vm935_vm2, %vm936_vm15 }
  0xc2   :  { %v373_v41 = vadd.f32 -0.074975304, %v372_v7  ;;  %v2848_v6 = vsel %vm1791_vm8, 4294967295, %v2847_v6  ;;  %vm325_vm2 = vcmp.gt.f32.partialorder %v1546_v25, %v1541_v24  ;;  %vm333_vm15 = vcmp.eq.f32.partialorder %v1538_v23, 0.0 }
  0xc3   :  { %v318_v2 = vmul.f32 %v317_v32, %v1643_v5  ;;  %v848_v32 = vmul.f32 0.002785687, %v1773_v42  ;;  %v415_v61 = vmul.f32 %v1397_v14, %v414_v11  ;;  %v795_v59 = vadd.f32 0.1064488, %v794_v53  ;;  %2846 = vst [vmem:[#allocation12_spill] sm:$0xff] %v1786_v36 }
  0xc4   :  { %2849 = vst [vmem:[#allocation13_spill] sm:$0xff] %v2848_v6  ;;  %v424_v53 = vor.u32 1.1754944e-38, %v423_v56  ;;  %v1801_v12 = vmax.f32 %v1767_v60, %v1786_v36  ;;  %v374_v7 = vmul.f32 %v373_v41, %v1723_v31  ;;  %v2851_v41 = vmov 0.0  }
  0xc5   :  { %v319_v20 = vadd.f32 0.19993454, %v318_v2  ;;  %v849_v49 = vadd.f32 -0.015866, %v848_v32  ;;  %v416_v2 = vadd.f32 %v1397_v14, %v415_v61  ;;  %v796_v11 = vmul.f32 %v795_v59, %v1698_v62 }
  0xc6   :  { %1398 = vrcp.f32 %v1801_v12  ;;  %v375_v22 = vadd.f32 0.1064488, %v374_v7  ;;  %v901_v54 = vand.u32 2147483647, %v1801_v12 }
  0xc7   :  { %v320_v44 = vmul.f32 %v319_v20, %v1643_v5  ;;  %v850_v32 = vmul.f32 %v849_v49, %v1773_v42  ;;  %v420_v61 = vsel %vm419_vm5, %v1397_v14, %v416_v2  ;;  %v797_v59 = vadd.f32 -0.14207031, %v796_v11 }
  0xc8   :  { %v425_v6 = vsel %vm422_vm10, %v424_v53, %v420_v61  ;;  %vm2852_vm10 = vcmp.lt.s32.totalorder %v1574_v35, 0  ;;  %vm942_vm5 = vcmp.eq.s32.totalorder %v1786_v36, inf  ;;  %v376_v11 = vmul.f32 %v375_v22, %v1723_v31 }
  0xc9   :  { %v321_v20 = vadd.f32 -0.33333147, %v320_v44  ;;  %v851_v56 = vadd.f32 0.04247222, %v850_v32  ;;  %v1810_v8 = vmul.f32 %v425_v6, %v410_v46  ;;  %v2850_v44 = vmov 0.7853982   ;;  %vm1831_vm12 = vmand %vm941_vm13, %vm942_vm5 }
  0xca   :  { %v1815_v49 = vsel %vm2808_vm11, 2.3561945, %v2850_v44  ;;  %v798_v14 = vmul.f32 %v797_v59, %v1698_v62  ;;  %v1821_v2 = vsel %vm2852_vm10, 3.1415927, %v2851_v41  ;;  %v2853_v53 = vmov 0 }
  0xcb   :  { %v322_v13 = vmul.f32 %v321_v20, %v1643_v5  ;;  %v852_v46 = vmul.f32 %v851_v56, %v1773_v42  ;;  %v1829_v6 = vmul.f32 %v1810_v8, %v1810_v8  ;;  %v2854_v53 = vsel %vm1831_vm12, 4294967295, %v2853_v53  ;;  %v162_v20 = vpop.f32.mrf.mxu0 }
  0xcc   :  { %2855 = vst [vmem:[#allocation14_spill] sm:$0xff] %v2854_v53  ;;  %v799_v7 = vadd.f32 0.19993454, %v798_v14  ;;  %vm2856_vm10 = vcmp.lt.f32.partialorder %v1574_v35, 0.0  ;;  %v903_v59 = vand.u32 2147483648, %v1801_v12  ;;  %v1399_v53 = vpop.eup %1398  ;;  %v890_v14 = vmin.f32 %v1767_v60, %v1786_v36 }
  0xcd   :  { %v323_v5 = vmul.f32 %v322_v13, %v1633_v1  ;;  %v1840_v61 = vsel %vm2856_vm10, 2.3561945, %v2850_v44  ;;  %v377_v22 = vadd.f32 -0.14207031, %v376_v11  ;;  %v853_v56 = vadd.f32 -0.074975304, %v852_v46 }
  0xce   :  { %v428_v9 = vmul.f32 0.002785687, %v1829_v6  ;;  %v800_v63 = vmul.f32 %v799_v7, %v1698_v62  ;;  %vm897_vm13 = vweird.f32 %v1801_v12  ;;  %v1850_v32 = vadd.f32 %v1527_v18, %v162_v20 }
  0xcf   :  { %v324_v13 = vadd.f32 %v323_v5, %v1633_v1  ;;  %v378_v3 = vmul.f32 %v377_v22, %v1723_v31  ;;  %v854_v1 = vmul.f32 %v853_v56, %v1773_v42  ;;  %v893_v46 = vmul.f32 %v1399_v53, %v1801_v12 }
  0xd0   :  { %v429_v5 = vadd.f32 -0.015866, %v428_v9  ;;  %v801_v11 = vadd.f32 -0.33333147, %v800_v63  ;;  %v904_v7 = vor.u32 1.1754944e-38, %v903_v59  ;;  %vm898_vm11 = vweird.f32 %v1399_v53 }
  0xd1   :  { %v326_v38 = vsub.f32 1.5707964, %v324_v13  ;;  %v379_v20 = vadd.f32 0.19993454, %v378_v3  ;;  %v855_v60 = vadd.f32 0.1064488, %v854_v1 }
  0xd2   :  { %v430_v22 = vmul.f32 %v429_v5, %v1829_v6  ;;  %v802_v63 = vmul.f32 %v801_v11, %v1698_v62  ;;  %v894_v9 = vsub.f32 1.0, %v893_v46  ;;  %v1864_v27 = vand.u32 2147483647, %v1850_v32 }
  0xd3   :  { %v327_v36 = vsel %vm325_vm2, %v326_v38, %v324_v13  ;;  %v380_v59 = vmul.f32 %v379_v20, %v1723_v31  ;;  %vm871_vm2 = vcmp.lt.s32.totalorder %v1618_v55, 0  ;;  %v856_v24 = vmul.f32 %v855_v60, %v1773_v42 }
  0xd4   :  { %v329_v56 = vsub.f32 3.1415927, %v327_v36  ;;  %v431_v25 = vadd.f32 0.04247222, %v430_v22  ;;  %vm2857_vm5 = vcmp.lt.f32.partialorder %v1535_v21, 0.0  ;;  %v803_v3 = vmul.f32 %v802_v63, %v1689_v52 }
  0xd5   :  { %v895_v62 = vmul.f32 %v1399_v53, %v894_v9  ;;  %v1874_v13 = vadd.f32 %v1532_v19, %v255_v28  ;;  %vm813_vm10 = vcmp.eq.f32.partialorder %v1571_v34, 0.0  ;;  %v381_v5 = vadd.f32 -0.33333147, %v380_v59 }
  0xd6   :  { %v330_v38 = vsel %vm2857_vm5, %v329_v56, %v327_v36  ;;  %v857_v11 = vadd.f32 -0.14207031, %v856_v24  ;;  %v432_v60 = vmul.f32 %v431_v25, %v1829_v6  ;;  %v804_v36 = vadd.f32 %v803_v3, %v1689_v52 }
  0xd7   :  { %v334_v1 = vsel %vm333_vm15, %v1682_v48, %v330_v38  ;;  %v896_v46 = vadd.f32 %v1399_v53, %v895_v62  ;;  %v1885_v20 = vand.u32 2147483647, %v1874_v13  ;;  %v382_v48 = vmul.f32 %v381_v5, %v1723_v31  ;;  %vm899_vm15 = vmor %vm897_vm13, %vm898_vm11 }
  0xd8   :  { %v338_v21 = vsel %vm1550_vm3, nan, %v334_v1  ;;  %v858_v22 = vmul.f32 %v857_v11, %v1773_v42  ;;  %v433_v56 = vadd.f32 -0.074975304, %v432_v60  ;;  %v806_v63 = vsub.f32 1.5707964, %v804_v36 }
  0xd9   :  { %v344_v28 = vsel %vm1558_vm6, %v1687_v50, %v338_v21  ;;  %v900_v52 = vsel %vm899_vm15, %v1399_v53, %v896_v46  ;;  %vm902_vm3 = vcmp.eq.f32.partialorder %v901_v54, 8.507059e+37  ;;  %v383_v9 = vmul.f32 %v382_v48, %v1713_v15 }
  0xda   :  { %v345_v26 = vand.u32 2147483647, %v344_v28  ;;  %v859_v59 = vadd.f32 0.19993454, %v858_v22  ;;  %v434_v24 = vmul.f32 %v433_v56, %v1829_v6  ;;  %v905_v29 = vsel %vm902_vm3, %v904_v7, %v900_v52 }
  0xdb   :  { %v2858_v50 = vand.u32 2147483648, %v1538_v23  ;;  %vm2859_vm6 = vcmp.gt.f32.partialorder %v1577_v37, %v1566_v33  ;;  %vm393_vm5 = vcmp.eq.f32.partialorder %v1587_v40, 0.0  ;;  %v1903_v12 = vmul.f32 %v905_v29, %v890_v14 }
  0xdc   :  { %v807_v25 = vsel %vm2859_vm6, %v806_v63, %v804_v36  ;;  %v1907_v54 = vmax.f32 %v1864_v27, %v1885_v20  ;;  %v384_v38 = vadd.f32 %v383_v9, %v1713_v15  ;;  %v860_v7 = vmul.f32 %v859_v59, %v1773_v42 }
  0xdd   :  { %v347_v31 = vor.u32 %v2858_v50, %v345_v26  ;;  %v809_v53 = vsub.f32 3.1415927, %v807_v25  ;;  %v435_v3 = vadd.f32 0.1064488, %v434_v24  ;;  %vm385_vm11 = vcmp.gt.f32.partialorder %v1602_v47, %v1592_v43 }
  0xde   :  { %v406_v23 = vand.u32 2147483648, %v1587_v40  ;;  %v1919_v33 = vmul.f32 %v1903_v12, %v1903_v12  ;;  %1400 = vrcp.f32 %v1907_v54  ;;  %vm2860_vm13 = vcmp.lt.f32.partialorder %v1563_v30, 0.0  ;;  %v182_v40 = vpop.f32.mrf.mxu2 }
  0xdf   :  { %1248 = vst [vmem:[%s2785_s5] sm:$0xff] %v347_v31  ;;  %v810_v37 = vsel %vm2860_vm13, %v809_v53, %v807_v25  ;;  %v386_v15 = vsub.f32 1.5707964, %v384_v38  ;;  %v861_v14 = vadd.f32 -0.33333147, %v860_v7  ;;  %v436_v62 = vmul.f32 %v435_v3, %v1829_v6 }
  0xe0   :  { %v814_v1 = vsel %vm813_vm10, %v1754_v16, %v810_v37  ;;  %v872_v43 = vsel %vm871_vm2, 3.1415927, %v2851_v41  ;;  %vm2861_vm15 = vcmp.lt.f32.partialorder %v1618_v55, 0.0  ;;  %v908_v30 = vmul.f32 0.002785687, %v1919_v33 }
  0xe1   :  { %v1934_v47 = vsel %vm2861_vm15, 2.3561945, %v2850_v44  ;;  %v818_v5 = vsel %vm1581_vm9, nan, %v814_v1  ;;  %v387_v11 = vsel %vm385_vm11, %v386_v15, %v384_v38  ;;  %v862_v60 = vmul.f32 %v861_v14, %v1773_v42 }
  0xe2   :  { %v437_v21 = vadd.f32 -0.14207031, %v436_v62  ;;  %v824_v16 = vsel %vm1597_vm14, %v1815_v49, %v818_v5  ;;  %v389_v36 = vsub.f32 3.1415927, %v387_v11  ;;  %v909_v46 = vadd.f32 -0.015866, %v908_v30 }
  0xe3   :  { %vm515_vm10 = vcmp.ne.f32.partialorder %v1850_v32, %v1850_v32  ;;  %v825_v28 = vand.u32 2147483647, %v824_v16  ;;  %v863_v48 = vmul.f32 %v862_v60, %v1761_v17  ;;  %vm865_vm2 = vcmp.gt.f32.partialorder %v1639_v4, %v1631_v0  ;;  %v275_v4 = vpop.f32.mrf.mxu3 }
  0xe4   :  { %v438_v39 = vmul.f32 %v437_v21, %v1829_v6  ;;  %v1401_v22 = vpop.eup %1400  ;;  %vm2862_vm9 = vcmp.lt.f32.partialorder %v1574_v35, 0.0  ;;  %vm873_vm3 = vcmp.eq.f32.partialorder %v1626_v58, 0.0  ;;  %v910_v45 = vmul.f32 %v909_v46, %v1919_v33 }
  0xe5   :  { %v390_v42 = vsel %vm2862_vm9, %v389_v36, %v387_v11  ;;  %v481_v49 = vand.u32 2147483647, %v1907_v54  ;;  %vm516_vm14 = vcmp.ne.f32.partialorder %v1874_v13, %v1874_v13  ;;  %v2863_v56 = vand.u32 2147483648, %v1571_v34  ;;  %v2869_v36 = vld [vmem:[#allocation2_spill] sm:$0xff] }
  0xe6   :  { %v394_v63 = vsel %vm393_vm5, %v1821_v2, %v390_v42  ;;  %v864_v52 = vadd.f32 %v863_v48, %v1761_v17  ;;  %v439_v35 = vadd.f32 0.19993454, %v438_v39  ;;  %vm1965_vm6 = vmor %vm515_vm10, %vm516_vm14  ;;  %v911_v24 = vadd.f32 0.04247222, %v910_v45  ;;  %v2873_v45 = vld [vmem:[#allocation6_spill] sm:$0xff] }
  0xe7   :  { %v827_v26 = vor.u32 %v2863_v56, %v825_v28  ;;  %v398_v59 = vsel %vm1606_vm1, nan, %v394_v63  ;;  %v473_v34 = vmul.f32 %v1401_v22, %v1907_v54  ;;  %v483_v29 = vand.u32 2147483648, %v1907_v54 }
  0xe8   :  { %v404_v17 = vsel %vm1621_vm7, %v1840_v61, %v398_v59  ;;  %v866_v2 = vsub.f32 1.5707964, %v864_v52  ;;  %v440_v50 = vmul.f32 %v439_v35, %v1829_v6  ;;  %vm521_vm5 = vcmp.eq.s32.totalorder %v1864_v27, inf }
  0xe9   :  { %1256 = vst [vmem:[%s2785_s5 + $0x40] sm:$0xff] %v827_v26  ;;  %v405_v51 = vand.u32 2147483647, %v404_v17  ;;  %v912_v31 = vmul.f32 %v911_v24, %v1919_v33  ;;  %v474_v25 = vsub.f32 1.0, %v473_v34  ;;  %vm522_vm1 = vcmp.eq.s32.totalorder %v1885_v20, inf }
  0xea   :  { %v867_v53 = vsel %vm865_vm2, %v866_v2, %v864_v52  ;;  %v441_v38 = vadd.f32 -0.33333147, %v440_v50  ;;  %vm478_vm11 = vweird.f32 %v1401_v22  ;;  %vm1986_vm13 = vmand %vm521_vm5, %vm522_vm1  ;;  %v1991_v61 = vadd.f32 %v1527_v18, %v182_v40  ;;  %v2878_v2 = vld [vmem:[#allocation4_spill] sm:$0xff] }
  0xeb   :  { %v407_v7 = vor.u32 %v406_v23, %v405_v51  ;;  %v869_v3 = vsub.f32 3.1415927, %v867_v53  ;;  %v913_v37 = vadd.f32 -0.074975304, %v912_v31  ;;  %v475_v15 = vmul.f32 %v1401_v22, %v474_v25 }
  0xec   :  { %v886_v14 = vand.u32 2147483648, %v1626_v58  ;;  %v442_v62 = vmul.f32 %v441_v38, %v1829_v6  ;;  %v470_v0 = vmin.f32 %v1864_v27, %v1885_v20  ;;  %vm477_vm7 = vweird.f32 %v1907_v54 }
  0xed   :  { %1249 = vst [vmem:[%s2785_s5 + $0x8] sm:$0xff] %v407_v7  ;;  %v870_v23 = vsel %vm2861_vm15, %v869_v3, %v867_v53  ;;  %v914_v1 = vmul.f32 %v913_v37, %v1919_v33  ;;  %v476_v30 = vadd.f32 %v1401_v22, %v475_v15  ;;  %vm482_vm10 = vcmp.eq.f32.partialorder %v481_v49, 8.507059e+37  ;;  %vm479_vm2 = vmor %vm477_vm7, %vm478_vm11  ;;  %v258_v53 = vpop.f32.mrf.mxu1 }
  0xee   :  { %v874_v6 = vsel %vm873_vm3, %v872_v43, %v870_v23  ;;  %v443_v5 = vmul.f32 %v442_v62, %v1810_v8  ;;  %v484_v54 = vor.u32 1.1754944e-38, %v483_v29  ;;  %v2009_v11 = vand.u32 2147483647, %v1991_v61  ;;  %v165_v29 = vpop.f32.mrf.mxu0 }
  0xef   :  { %vm2868_vm9 = vnez %v2827_v10  ;;  %v915_v55 = vadd.f32 0.1064488, %v914_v1  ;;  %v480_v21 = vsel %vm479_vm2, %v1401_v22, %v476_v30  ;;  %v2014_v16 = vadd.f32 %v1532_v19, %v275_v4  ;;  %v2871_v22 = vld [vmem:[#allocation3_spill] sm:$0xff] }
  0xf0   :  { %v878_v60 = vsel %vm2868_vm9, nan, %v874_v6  ;;  %vm2870_vm14 = vnez %v2869_v36  ;;  %v444_v43 = vadd.f32 %v443_v5, %v1810_v8  ;;  %v485_v46 = vsel %vm482_vm10, %v484_v54, %v480_v21  ;;  %v2881_v5 = vld [vmem:[#allocation8_spill] sm:$0xff] }
  0xf1   :  { %v884_v58 = vsel %vm2870_vm14, %v1934_v47, %v878_v60  ;;  %vm995_vm3 = vcmp.ne.f32.partialorder %v1991_v61, %v1991_v61  ;;  %v916_v48 = vmul.f32 %v915_v55, %v1919_v33  ;;  %v2023_v10 = vmul.f32 %v485_v46, %v470_v0  ;;  %v2872_v47 = vld [vmem:[#allocation5_spill] sm:$0xff] }
  0xf2   :  { %v885_v28 = vand.u32 2147483647, %v884_v58  ;;  %v2026_v39 = vand.u32 2147483647, %v2014_v16  ;;  %vm451_vm5 = vcmp.lt.s32.totalorder %v2871_v22, 0  ;;  %vm996_vm1 = vcmp.ne.f32.partialorder %v2014_v16, %v2014_v16  ;;  %v185_v58 = vpop.f32.mrf.mxu2 }
  0xf3   :  { %v446_v42 = vsub.f32 1.5707964, %v444_v43  ;;  %vm1001_vm11 = vcmp.eq.s32.totalorder %v2009_v11, inf  ;;  %vm445_vm7 = vcmp.gt.f32.partialorder %v2873_v45, %v2872_v47  ;;  %v917_v49 = vadd.f32 -0.14207031, %v916_v48  ;;  %vm2038_vm15 = vmor %vm995_vm3, %vm996_vm1 }
  0xf4   :  { %v887_v8 = vor.u32 %v886_v14, %v885_v28  ;;  %v2036_v56 = vmul.f32 %v2023_v10, %v2023_v10  ;;  %v2044_v52 = vmax.f32 %v2009_v11, %v2026_v39  ;;  %vm1002_vm10 = vcmp.eq.s32.totalorder %v2026_v39, inf }
  0xf5   :  { %v447_v63 = vsel %vm445_vm7, %v446_v42, %v444_v43  ;;  %v918_v59 = vmul.f32 %v917_v49, %v1919_v33  ;;  %vm2052_vm2 = vmand %vm1001_vm11, %vm1002_vm10  ;;  %vm448_vm9 = vcmp.lt.f32.partialorder %v2871_v22, 0.0  ;;  %v452_v40 = vsel %vm451_vm5, 3.1415927, %v2851_v41  ;;  %v278_v22 = vpop.f32.mrf.mxu3 }
  0xf6   :  { %1257 = vst [vmem:[%s2785_s5 + $0x48] sm:$0xff] %v887_v8  ;;  %v449_v35 = vsub.f32 3.1415927, %v447_v63  ;;  %v488_v24 = vmul.f32 0.002785687, %v2036_v56  ;;  %1402 = vrcp.f32 %v2044_v52  ;;  %vm453_vm14 = vcmp.eq.f32.partialorder %v2878_v2, 0.0 }
  0xf7   :  { %v919_v50 = vadd.f32 0.19993454, %v918_v59  ;;  %v2063_v25 = vadd.f32 %v1527_v18, %v165_v29  ;;  %v460_v38 = vsel %vm448_vm9, 2.3561945, %v2850_v44  ;;  %v466_v0 = vand.u32 2147483648, %v2878_v2  ;;  %v2886_v29 = vld [vmem:[#allocation10_spill] sm:$0xff] }
  0xf8   :  { %v450_v17 = vsel %vm448_vm9, %v449_v35, %v447_v63  ;;  %v489_v51 = vadd.f32 -0.015866, %v488_v24  ;;  %v2074_v30 = vadd.f32 %v1532_v19, %v258_v53  ;;  %vm928_vm3 = vcmp.lt.f32.partialorder %v2881_v5, 0.0 }
  0xf9   :  { %v454_v31 = vsel %vm453_vm14, %v452_v40, %v450_v17  ;;  %v920_v37 = vmul.f32 %v919_v50, %v1919_v33  ;;  %v2078_v54 = vand.u32 2147483647, %v2063_v25  ;;  %v961_v48 = vand.u32 2147483647, %v2044_v52  ;;  %v2887_v40 = vld [vmem:[#allocation12_spill] sm:$0xff] }
  0xfa   :  { %v458_v3 = vsel %vm1736_vm4, nan, %v454_v31  ;;  %v490_v15 = vmul.f32 %v489_v51, %v2036_v56  ;;  %vm575_vm4 = vcmp.ne.f32.partialorder %v2063_v25, %v2063_v25  ;;  %v2087_v43 = vand.u32 2147483647, %v2074_v30 }
  0xfb   :  { %v464_v62 = vsel %vm1747_vm0, %v460_v38, %v458_v3  ;;  %v921_v23 = vadd.f32 -0.33333147, %v920_v37  ;;  %vm931_vm0 = vcmp.lt.s32.totalorder %v2881_v5, 0  ;;  %vm576_vm5 = vcmp.ne.f32.partialorder %v2074_v30, %v2074_v30 }
  0xfc   :  { %v465_v4 = vand.u32 2147483647, %v464_v62  ;;  %v491_v1 = vadd.f32 0.04247222, %v490_v15  ;;  %v1403_v6 = vpop.eup %1402  ;;  %vm581_vm1 = vcmp.eq.s32.totalorder %v2078_v54, inf  ;;  %v963_v42 = vand.u32 2147483648, %v2044_v52  ;;  %vm2105_vm11 = vmor %vm575_vm4, %vm576_vm5 }
  0xfd   :  { %v922_v55 = vmul.f32 %v921_v23, %v1919_v33  ;;  %v953_v36 = vmul.f32 %v1403_v6, %v2044_v52  ;;  %v2100_v8 = vmax.f32 %v2078_v54, %v2087_v43  ;;  %vm582_vm7 = vcmp.eq.s32.totalorder %v2087_v43, inf  ;;  %v2888_v62 = vld [vmem:[#allocation11_spill] sm:$0xff] }
  0xfe   :  { %v467_v60 = vor.u32 %v466_v0, %v465_v4  ;;  %v492_v21 = vmul.f32 %v491_v1, %v2036_v56  ;;  %v2111_v45 = vadd.f32 %v1527_v18, %v185_v58  ;;  %vm958_vm10 = vweird.f32 %v1403_v6  ;;  %vm2117_vm9 = vmand %vm581_vm1, %vm582_vm7 }
  0xff   :  { %v923_v33 = vmul.f32 %v922_v55, %v1903_v12  ;;  %v954_v28 = vsub.f32 1.0, %v953_v36  ;;  %v932_v24 = vsel %vm931_vm0, 3.1415927, %v2851_v41  ;;  %vm925_vm14 = vcmp.gt.f32.partialorder %v2887_v40, %v2886_v29 }
 0x100   :  { %1250 = vst [vmem:[%s2785_s5 + $0x10] sm:$0xff] %v467_v60  ;;  %v493_v46 = vadd.f32 -0.074975304, %v492_v21  ;;  %1404 = vrcp.f32 %v2100_v8  ;;  %vm957_vm4 = vweird.f32 %v2044_v52  ;;  %v950_v51 = vmin.f32 %v2009_v11, %v2026_v39 }
 0x101   :  { %v924_v49 = vadd.f32 %v923_v33, %v1903_v12  ;;  %v955_v35 = vmul.f32 %v1403_v6, %v954_v28  ;;  %v2128_v12 = vadd.f32 %v1532_v19, %v278_v22  ;;  %vm959_vm5 = vmor %vm957_vm4, %vm958_vm10  ;;  %vm962_vm1 = vcmp.eq.f32.partialorder %v961_v48, 8.507059e+37  ;;  %v167_v19 = vpop.f32.mrf.mxu0 }
 0x102   :  { %v494_v63 = vmul.f32 %v493_v46, %v2036_v56  ;;  %v964_v31 = vor.u32 1.1754944e-38, %v963_v42  ;;  %v2134_v53 = vand.u32 2147483647, %v2111_v45  ;;  %vm1055_vm0 = vcmp.ne.f32.partialorder %v2111_v45, %v2111_v45 }
 0x103   :  { %v926_v17 = vsub.f32 1.5707964, %v924_v49  ;;  %v956_v50 = vadd.f32 %v1403_v6, %v955_v35  ;;  %v940_v52 = vsel %vm928_vm3, 2.3561945, %v2850_v44  ;;  %v2143_v14 = vand.u32 2147483647, %v2128_v12 }
 0x104   :  { %v495_v2 = vadd.f32 0.1064488, %v494_v63  ;;  %vm933_vm7 = vcmp.eq.f32.partialorder %v2888_v62, 0.0  ;;  %vm1056_vm10 = vcmp.ne.f32.partialorder %v2128_v12, %v2128_v12  ;;  %v2162_v21 = vadd.f32 %v1527_v18, %v167_v19 }
 0x105   :  { %v927_v38 = vsel %vm925_vm14, %v926_v17, %v924_v49  ;;  %v960_v3 = vsel %vm959_vm5, %v1403_v6, %v956_v50  ;;  %v946_v6 = vand.u32 2147483648, %v2888_v62  ;;  %v2155_v60 = vmax.f32 %v2134_v53, %v2143_v14  ;;  %vm2157_vm14 = vmor %vm1055_vm0, %vm1056_vm10 }
 0x106   :  { %v496_v7 = vmul.f32 %v495_v2, %v2036_v56  ;;  %v929_v37 = vsub.f32 3.1415927, %v927_v38  ;;  %v965_v15 = vsel %vm962_vm1, %v964_v31, %v960_v3  ;;  %v1405_v23 = vpop.eup %1404  ;;  %v541_v48 = vand.u32 2147483647, %v2100_v8  ;;  %v260_v2 = vpop.f32.mrf.mxu1 }
 0x107   :  { %v2146_v4 = vmul.f32 %v965_v15, %v950_v51  ;;  %v533_v33 = vmul.f32 %v1405_v23, %v2100_v8  ;;  %1406 = vrcp.f32 %v2155_v60  ;;  %vm538_vm4 = vweird.f32 %v1405_v23  ;;  %v2203_v15 = vld [vmem:[%s2784_s4] ss:$0 sm:$0xff] }
 0x108   :  { %v497_v0 = vadd.f32 -0.14207031, %v496_v7  ;;  %v930_v1 = vsel %vm928_vm3, %v929_v37, %v927_v38  ;;  %vm537_vm3 = vweird.f32 %v2100_v8  ;;  %vm1061_vm5 = vcmp.eq.s32.totalorder %v2134_v53, inf }
 0x109   :  { %v934_v36 = vsel %vm933_vm7, %v932_v24, %v930_v1  ;;  %v2167_v5 = vmul.f32 %v2146_v4, %v2146_v4  ;;  %v534_v63 = vsub.f32 1.0, %v533_v33  ;;  %v543_v24 = vand.u32 2147483648, %v2100_v8  ;;  %vm539_vm7 = vmor %vm537_vm3, %vm538_vm4 }
 0x10a   :  { %v498_v58 = vmul.f32 %v497_v0, %v2036_v56  ;;  %v938_v28 = vsel %vm1791_vm8, nan, %v934_v36  ;;  %vm1062_vm8 = vcmp.eq.s32.totalorder %v2143_v14, inf  ;;  %v530_v7 = vmin.f32 %v2078_v54, %v2087_v43 }
 0x10b   :  { %v944_v22 = vsel %vm1831_vm12, %v940_v52, %v938_v28  ;;  %v968_v49 = vmul.f32 0.002785687, %v2167_v5  ;;  %v535_v17 = vmul.f32 %v1405_v23, %v534_v63  ;;  %vm2182_vm1 = vmand %vm1061_vm5, %vm1062_vm8  ;;  %vm542_vm10 = vcmp.eq.f32.partialorder %v541_v48, 8.507059e+37 }
 0x10c   :  { %v499_v42 = vadd.f32 0.19993454, %v498_v58  ;;  %v945_v35 = vand.u32 2147483647, %v944_v22  ;;  %v544_v52 = vor.u32 1.1754944e-38, %v543_v24  ;;  %v2206_v62 = vadd.f32 %v2203_v15, %v260_v2 }
 0x10d   :  { %v969_v40 = vadd.f32 -0.015866, %v968_v49  ;;  %v536_v3 = vadd.f32 %v1405_v23, %v535_v17  ;;  %v1407_v19 = vpop.eup %1406  ;;  %v2198_v37 = vand.u32 2147483647, %v2162_v21  ;;  %v1021_v58 = vand.u32 2147483647, %v2155_v60 }
 0x10e   :  { %v500_v29 = vmul.f32 %v499_v42, %v2036_v56  ;;  %v947_v50 = vor.u32 %v946_v6, %v945_v35  ;;  %v1013_v8 = vmul.f32 %v1407_v19, %v2155_v60  ;;  %v1023_v33 = vand.u32 2147483648, %v2155_v60 }
 0x10f   :  { %v970_v38 = vmul.f32 %v969_v40, %v2167_v5  ;;  %v540_v6 = vsel %vm539_vm7, %v1405_v23, %v536_v3  ;;  %vm635_vm3 = vcmp.ne.f32.partialorder %v2162_v21, %v2162_v21  ;;  %vm1018_vm4 = vweird.f32 %v1407_v19 }
 0x110   :  { %v501_v31 = vadd.f32 -0.33333147, %v500_v29  ;;  %1258 = vst [vmem:[%s2785_s5 + $0x50] sm:$0xff] %v947_v50  ;;  %v545_v36 = vsel %vm542_vm10, %v544_v52, %v540_v6  ;;  %v1014_v18 = vsub.f32 1.0, %v1013_v8  ;;  %vm636_vm5 = vcmp.ne.f32.partialorder %v2206_v62, %v2206_v62 }
 0x111   :  { %v971_v1 = vadd.f32 0.04247222, %v970_v38  ;;  %v2216_v48 = vmul.f32 %v545_v36, %v530_v7  ;;  %vm641_vm8 = vcmp.eq.s32.totalorder %v2198_v37, inf  ;;  %vm2229_vm7 = vmor %vm635_vm3, %vm636_vm5  ;;  %v2895_v63 = vmov 0  ;;  %v187_v38 = vpop.f32.mrf.mxu2 }
 0x112   :  { %v502_v0 = vmul.f32 %v501_v31, %v2036_v56  ;;  %v2219_v56 = vand.u32 2147483647, %v2206_v62  ;;  %v1015_v49 = vmul.f32 %v1407_v19, %v1014_v18  ;;  %v2896_v63 = vsel %vm2229_vm7, 4294967295, %v2895_v63 }
 0x113   :  { %v972_v28 = vmul.f32 %v971_v1, %v2167_v5  ;;  %v2227_v42 = vmul.f32 %v2216_v48, %v2216_v48  ;;  %vm505_vm10 = vcmp.gt.f32.partialorder %v1885_v20, %v1864_v27  ;;  %vm1017_vm12 = vweird.f32 %v2155_v60 }
 0x114   :  { %v503_v46 = vmul.f32 %v502_v0, %v2023_v10  ;;  %v2238_v35 = vmax.f32 %v2198_v37, %v2219_v56  ;;  %vm642_vm0 = vcmp.eq.s32.totalorder %v2219_v56, inf  ;;  %v1016_v40 = vadd.f32 %v1407_v19, %v1015_v49  ;;  %vm1019_vm5 = vmor %vm1017_vm12, %vm1018_vm4 }
 0x115   :  { %v973_v22 = vadd.f32 -0.074975304, %v972_v28  ;;  %v548_v29 = vmul.f32 0.002785687, %v2227_v42  ;;  %vm2243_vm3 = vmand %vm641_vm8, %vm642_vm0  ;;  %v1010_v27 = vmin.f32 %v2134_v53, %v2143_v14  ;;  %vm1022_vm7 = vcmp.eq.f32.partialorder %v1021_v58, 8.507059e+37 }
 0x116   :  { %v504_v23 = vadd.f32 %v503_v46, %v2023_v10  ;;  %v1024_v20 = vor.u32 1.1754944e-38, %v1023_v33  ;;  %1408 = vrcp.f32 %v2238_v35  ;;  %v1020_v31 = vsel %vm1019_vm5, %v1407_v19, %v1016_v40  ;;  %v280_v19 = vpop.f32.mrf.mxu3  ;;  %v2269_v58 = vld [vmem:[%s2782_s3] ss:$0 sm:$0xff] }
 0x117   :  { %v974_v24 = vmul.f32 %v973_v22, %v2167_v5  ;;  %v549_v50 = vadd.f32 -0.015866, %v548_v29  ;;  %vm2899_vm0 = vcmp.lt.s32.totalorder %v1850_v32, 0  ;;  %vm2900_vm8 = vcmp.lt.f32.partialorder %v1850_v32, 0.0 }
 0x118   :  { %v506_v10 = vsub.f32 1.5707964, %v504_v23  ;;  %v512_v7 = vsel %vm2899_vm0, 3.1415927, %v2851_v41  ;;  %v520_v3 = vsel %vm2900_vm8, 2.3561945, %v2850_v44  ;;  %v1025_v0 = vsel %vm1022_vm7, %v1024_v20, %v1020_v31  ;;  %vm2901_vm4 = vmmov %vm2900_vm8 }
 0x119   :  { %v975_v2 = vadd.f32 0.1064488, %v974_v24  ;;  %vm991_vm12 = vcmp.lt.s32.totalorder %v1991_v61, 0  ;;  %v550_v6 = vmul.f32 %v549_v50, %v2227_v42  ;;  %v2260_v8 = vmul.f32 %v1025_v0, %v1010_v27 }
 0x11a   :  { %v507_v60 = vsel %vm505_vm10, %v506_v10, %v504_v23  ;;  %vm513_vm10 = vcmp.eq.f32.partialorder %v1874_v13, 0.0  ;;  %vm2809_vm5 = vcmp.lt.f32.partialorder %v1991_v61, 0.0  ;;  %v2272_v33 = vadd.f32 %v2269_v58, %v187_v38 }
 0x11b   :  { %v509_v52 = vsub.f32 3.1415927, %v507_v60  ;;  %v976_v1 = vmul.f32 %v975_v2, %v2167_v5  ;;  %v551_v18 = vadd.f32 0.04247222, %v550_v6  ;;  %v2276_v23 = vmul.f32 %v2260_v8, %v2260_v8 }
 0x11c   :  { %v1409_v32 = vpop.eup %1408  ;;  %v526_v49 = vand.u32 2147483648, %v1874_v13  ;;  %v2284_v10 = vsel %vm991_vm12, 3.1415927, %v2851_v41  ;;  %v2287_v24 = vadd.f32 %v2203_v15, %v280_v19  ;;  %v2297_v13 = vsel %vm2809_vm5, 2.3561945, %v2850_v44 }
 0x11d   :  { %v510_v36 = vsel %vm2901_vm4, %v509_v52, %v507_v60  ;;  %v977_v28 = vadd.f32 -0.14207031, %v976_v1  ;;  %v552_v27 = vmul.f32 %v551_v18, %v2227_v42  ;;  %v1028_v9 = vmul.f32 0.002785687, %v2276_v23 }
 0x11e   :  { %v514_v46 = vsel %vm513_vm10, %v512_v7, %v510_v36  ;;  %v593_v60 = vmul.f32 %v1409_v32, %v2238_v35  ;;  %v2301_v2 = vand.u32 2147483647, %v2272_v33  ;;  %v2305_v52 = vand.u32 2147483647, %v2287_v24 }
 0x11f   :  { %v518_v22 = vsel %vm1965_vm6, nan, %v514_v46  ;;  %v978_v40 = vmul.f32 %v977_v28, %v2167_v5  ;;  %v553_v57 = vadd.f32 -0.074975304, %v552_v27  ;;  %v1029_v31 = vadd.f32 -0.015866, %v1028_v9 }
 0x120   :  { %v524_v29 = vsel %vm1986_vm13, %v520_v3, %v518_v22  ;;  %v594_v7 = vsub.f32 1.0, %v593_v60  ;;  %v603_v3 = vand.u32 2147483648, %v2238_v35  ;;  %vm1115_vm6 = vcmp.ne.f32.partialorder %v2272_v33, %v2272_v33 }
 0x121   :  { %v525_v20 = vand.u32 2147483647, %v524_v29  ;;  %v979_v50 = vadd.f32 0.19993454, %v978_v40  ;;  %v554_v1 = vmul.f32 %v553_v57, %v2227_v42  ;;  %v1030_v6 = vmul.f32 %v1029_v31, %v2276_v23 }
 0x122   :  { %v595_v19 = vmul.f32 %v1409_v32, %v594_v7  ;;  %vm598_vm13 = vweird.f32 %v1409_v32  ;;  %v601_v36 = vand.u32 2147483647, %v2238_v35  ;;  %v2318_v46 = vmax.f32 %v2301_v2, %v2305_v52 }
 0x123   :  { %v527_v38 = vor.u32 %v526_v49, %v525_v20  ;;  %v980_v0 = vmul.f32 %v979_v50, %v2167_v5  ;;  %v555_v18 = vadd.f32 0.1064488, %v554_v1  ;;  %v1031_v22 = vadd.f32 0.04247222, %v1030_v6  ;;  %v170_v50 = vpop.f32.mrf.mxu0 }
 0x124   :  { %vm1116_vm7 = vcmp.ne.f32.partialorder %v2287_v24, %v2287_v24  ;;  %v590_v49 = vmin.f32 %v2198_v37, %v2219_v56  ;;  %v596_v29 = vadd.f32 %v1409_v32, %v595_v19  ;;  %vm597_vm0 = vweird.f32 %v2238_v35 }
 0x125   :  { %1251 = vst [vmem:[%s2785_s5 + $0x18] sm:$0xff] %v527_v38  ;;  %v981_v28 = vadd.f32 -0.33333147, %v980_v0  ;;  %1410 = vrcp.f32 %v2318_v46  ;;  %vm2326_vm8 = vmor %vm1115_vm6, %vm1116_vm7  ;;  %v2902_v40 = vmov 0  ;;  %v556_v9 = vmul.f32 %v555_v18, %v2227_v42 }
 0x126   :  { %v2903_v40 = vsel %vm2326_vm8, 4294967295, %v2902_v40  ;;  %v1032_v20 = vmul.f32 %v1031_v22, %v2276_v23  ;;  %vm599_vm12 = vmor %vm597_vm0, %vm598_vm13  ;;  %v604_v60 = vor.u32 1.1754944e-38, %v603_v3  ;;  %vm602_vm4 = vcmp.eq.f32.partialorder %v601_v36, 8.507059e+37 }
 0x127   :  { %2904 = vst [vmem:[#allocation2_spill] sm:$0xff] %v2903_v40  ;;  %v982_v27 = vmul.f32 %v981_v28, %v2167_v5  ;;  %v600_v57 = vsel %vm599_vm12, %v1409_v32, %v596_v29  ;;  %vm1121_vm10 = vcmp.eq.s32.totalorder %v2301_v2, inf  ;;  %vm1122_vm5 = vcmp.eq.s32.totalorder %v2305_v52, inf  ;;  %v263_v28 = vpop.f32.mrf.mxu1 }
 0x128   :  { %v557_v31 = vadd.f32 -0.14207031, %v556_v9  ;;  %v1033_v38 = vadd.f32 -0.074975304, %v1032_v20  ;;  %v605_v7 = vsel %vm602_vm4, %v604_v60, %v600_v57  ;;  %vm2337_vm6 = vmand %vm1121_vm10, %vm1122_vm5  ;;  %v2905_v5 = vmov 0 }
 0x129   :  { %v983_v35 = vmul.f32 %v982_v27, %v2146_v4  ;;  %v2906_v5 = vsel %vm2337_vm6, 4294967295, %v2905_v5  ;;  %vm985_vm13 = vcmp.gt.f32.partialorder %v2026_v39, %v2009_v11  ;;  %vm993_vm7 = vcmp.eq.f32.partialorder %v2014_v16, 0.0 }
 0x12a   :  { %2907 = vst [vmem:[#allocation3_spill] sm:$0xff] %v2906_v5  ;;  %v1006_v32 = vand.u32 2147483648, %v2014_v16  ;;  %v2345_v3 = vmul.f32 %v605_v7, %v590_v49  ;;  %v2348_v0 = vadd.f32 %v2269_v58, %v170_v50  ;;  %v558_v6 = vmul.f32 %v557_v31, %v2227_v42 }
 0x12b   :  { %v984_v1 = vadd.f32 %v983_v35, %v2146_v4  ;;  %v1034_v19 = vmul.f32 %v1033_v38, %v2276_v23  ;;  %v1070_v36 = vmin.f32 %v2301_v2, %v2305_v52  ;;  %v1411_v18 = vpop.eup %1410  ;;  %v1081_v4 = vand.u32 2147483647, %v2318_v46 }
 0x12c   :  { %2908 = vst [vmem:[#allocation5_spill] sm:$0xff] %v2348_v0  ;;  %v2359_v22 = vmul.f32 %v2345_v3, %v2345_v3  ;;  %v1083_v49 = vand.u32 2147483648, %v2318_v46  ;;  %v559_v27 = vadd.f32 0.19993454, %v558_v6  ;;  %v1073_v20 = vmul.f32 %v1411_v18, %v2318_v46 }
 0x12d   :  { %v986_v29 = vsub.f32 1.5707964, %v984_v1  ;;  %v1035_v9 = vadd.f32 0.1064488, %v1034_v19  ;;  %v2367_v50 = vand.u32 2147483647, %v2348_v0  ;;  %vm695_vm4 = vcmp.ne.f32.partialorder %v2348_v0, %v2348_v0 }
 0x12e   :  { %v608_v60 = vmul.f32 0.002785687, %v2359_v22  ;;  %v2372_v57 = vadd.f32 %v2203_v15, %v263_v28  ;;  %v560_v31 = vmul.f32 %v559_v27, %v2227_v42  ;;  %v1074_v7 = vsub.f32 1.0, %v1073_v20 }
 0x12f   :  { %v987_v35 = vsel %vm985_vm13, %v986_v29, %v984_v1  ;;  %v1036_v38 = vmul.f32 %v1035_v9, %v2276_v23  ;;  %vm1078_vm5 = vweird.f32 %v1411_v18  ;;  %vm2911_vm13 = vcmp.lt.f32.partialorder %v1991_v61, 0.0 }
 0x130   :  { %v989_v6 = vsub.f32 3.1415927, %v987_v35  ;;  %v609_v19 = vadd.f32 -0.015866, %v608_v60  ;;  %v2380_v5 = vand.u32 2147483647, %v2372_v57  ;;  %vm696_vm10 = vcmp.ne.f32.partialorder %v2372_v57, %v2372_v57 }
 0x131   :  { %v561_v0 = vadd.f32 -0.33333147, %v560_v31  ;;  %v1037_v28 = vadd.f32 -0.14207031, %v1036_v38  ;;  %v1075_v40 = vmul.f32 %v1411_v18, %v1074_v7  ;;  %vm2384_vm0 = vmor %vm695_vm4, %vm696_vm10  ;;  %vm2391_vm12 = vcmp.eq.f32.partialorder %v1081_v4, 8.507059e+37 }
 0x132   :  { %v990_v39 = vsel %vm2911_vm13, %v989_v6, %v987_v35  ;;  %v610_v1 = vmul.f32 %v609_v19, %v2359_v22  ;;  %v2397_v27 = vmax.f32 %v2367_v50, %v2380_v5  ;;  %vm2914_vm4 = vweird.f32 %v2318_v46 }
 0x133   :  { %v994_v9 = vsel %vm993_vm7, %v2284_v10, %v990_v39  ;;  %v562_v20 = vmul.f32 %v561_v0, %v2227_v42  ;;  %v1038_v60 = vmul.f32 %v1037_v28, %v2276_v23  ;;  %v1076_v61 = vadd.f32 %v1411_v18, %v1075_v40  ;;  %vm1079_vm10 = vmor %vm2914_vm4, %vm1078_vm5 }
 0x134   :  { %v998_v35 = vsel %vm2038_vm15, nan, %v994_v9  ;;  %v611_v4 = vadd.f32 0.04247222, %v610_v1  ;;  %v1084_v31 = vor.u32 1.1754944e-38, %v1083_v49  ;;  %1412 = vrcp.f32 %v2397_v27 }
 0x135   :  { %v1004_v16 = vsel %vm2052_vm2, %v2297_v13, %v998_v35  ;;  %v563_v10 = vmul.f32 %v562_v20, %v2216_v48  ;;  %v1039_v42 = vadd.f32 0.19993454, %v1038_v60  ;;  %v1080_v0 = vsel %vm1079_vm10, %v1411_v18, %v1076_v61  ;;  %v283_v60 = vpop.f32.mrf.mxu3 }
 0x136   :  { %v1005_v38 = vand.u32 2147483647, %v1004_v16  ;;  %vm2915_vm7 = vcmp.lt.s32.totalorder %v2063_v25, 0  ;;  %v612_v40 = vmul.f32 %v611_v4, %v2359_v22  ;;  %v1085_v46 = vsel %vm2391_vm12, %v1084_v31, %v1080_v0 }
 0x137   :  { %v572_v26 = vsel %vm2915_vm7, 3.1415927, %v2851_v41  ;;  %vm2916_vm15 = vcmp.lt.f32.partialorder %v2063_v25, 0.0  ;;  %v564_v34 = vadd.f32 %v563_v10, %v2216_v48  ;;  %v1040_v13 = vmul.f32 %v1039_v42, %v2276_v23  ;;  %v190_v48 = vpop.f32.mrf.mxu2 }
 0x138   :  { %v580_v49 = vsel %vm2916_vm15, 2.3561945, %v2850_v44  ;;  %v2424_v7 = vmul.f32 %v1085_v46, %v1070_v36  ;;  %v1007_v18 = vor.u32 %v1006_v32, %v1005_v38  ;;  %vm573_vm2 = vcmp.eq.f32.partialorder %v2074_v30, 0.0 }
 0x139   :  { %v586_v6 = vand.u32 2147483648, %v2074_v30  ;;  %v613_v19 = vadd.f32 -0.074975304, %v612_v40  ;;  %vm565_vm5 = vcmp.gt.f32.partialorder %v2087_v43, %v2078_v54  ;;  %v566_v28 = vsub.f32 1.5707964, %v564_v34 }
 0x13a   :  { %v1041_v39 = vadd.f32 -0.33333147, %v1040_v13  ;;  %v2432_v1 = vmul.f32 %v2424_v7, %v2424_v7  ;;  %v1413_v29 = vpop.eup %1412  ;;  %1259 = vst [vmem:[%s2785_s5 + $0x58] sm:$0xff] %v1007_v18  ;;  %vm1045_vm13 = vcmp.gt.f32.partialorder %v2143_v14, %v2134_v53  ;;  %vm657_vm4 = vweird.f32 %v2397_v27 }
 0x13b   :  { %v614_v32 = vmul.f32 %v613_v19, %v2359_v22  ;;  %vm701_vm10 = vcmp.eq.s32.totalorder %v2367_v50, inf  ;;  %vm702_vm7 = vcmp.eq.s32.totalorder %v2380_v5, inf  ;;  %v567_v54 = vsel %vm565_vm5, %v566_v28, %v564_v34 }
 0x13c   :  { %vm1048_vm15 = vcmp.lt.f32.partialorder %v2111_v45, 0.0  ;;  %v1042_v43 = vmul.f32 %v1041_v39, %v2276_v23  ;;  %v1088_v36 = vmul.f32 0.002785687, %v2432_v1  ;;  %v653_v9 = vmul.f32 %v1413_v29, %v2397_v27  ;;  %vm2448_vm12 = vmand %vm701_vm10, %vm702_vm7 }
 0x13d   :  { %v569_v61 = vsub.f32 3.1415927, %v567_v54  ;;  %v615_v35 = vadd.f32 0.1064488, %v614_v32  ;;  %v661_v4 = vand.u32 2147483647, %v2397_v27  ;;  %v2454_v31 = vadd.f32 %v2269_v58, %v190_v48 }
 0x13e   :  { %v1043_v16 = vmul.f32 %v1042_v43, %v2260_v8  ;;  %v1089_v10 = vadd.f32 -0.015866, %v1088_v36  ;;  %v654_v23 = vsub.f32 1.0, %v653_v9  ;;  %v663_v42 = vand.u32 2147483648, %v2397_v27 }
 0x13f   :  { %vm2919_vm5 = vcmp.lt.f32.partialorder %v2063_v25, 0.0  ;;  %v616_v38 = vmul.f32 %v615_v35, %v2359_v22  ;;  %vm658_vm10 = vweird.f32 %v1413_v29  ;;  %v2462_v40 = vadd.f32 %v2203_v15, %v283_v60 }
 0x140   :  { %v570_v0 = vsel %vm2919_vm5, %v569_v61, %v567_v54  ;;  %v1044_v34 = vadd.f32 %v1043_v16, %v2260_v8  ;;  %v1090_v13 = vmul.f32 %v1089_v10, %v2432_v1  ;;  %v655_v18 = vmul.f32 %v1413_v29, %v654_v23 }
 0x141   :  { %v574_v46 = vsel %vm573_vm2, %v572_v26, %v570_v0  ;;  %v617_v28 = vadd.f32 -0.14207031, %v616_v38  ;;  %v650_v25 = vmin.f32 %v2367_v50, %v2380_v5  ;;  %v2473_v39 = vand.u32 2147483647, %v2454_v31 }
 0x142   :  { %v578_v19 = vsel %vm2105_vm11, nan, %v574_v46  ;;  %v1046_v30 = vsub.f32 1.5707964, %v1044_v34  ;;  %v1091_v26 = vadd.f32 0.04247222, %v1090_v13  ;;  %v656_v32 = vadd.f32 %v1413_v29, %v655_v18  ;;  %vm659_vm11 = vmor %vm657_vm4, %vm658_vm10 }
 0x143   :  { %v584_v48 = vsel %vm2117_vm9, %v580_v49, %v578_v19  ;;  %v618_v54 = vmul.f32 %v617_v28, %v2359_v22  ;;  %vm662_vm2 = vcmp.eq.f32.partialorder %v661_v4, 8.507059e+37  ;;  %v664_v47 = vor.u32 1.1754944e-38, %v663_v42  ;;  %v172_v19 = vpop.f32.mrf.mxu0 }
 0x144   :  { %v585_v8 = vand.u32 2147483647, %v584_v48  ;;  %v1047_v43 = vsel %vm1045_vm13, %v1046_v30, %v1044_v34  ;;  %v1092_v36 = vmul.f32 %v1091_v26, %v2432_v1  ;;  %v660_v59 = vsel %vm659_vm11, %v1413_v29, %v656_v32  ;;  %v265_v30 = vpop.f32.mrf.mxu1 }
 0x145   :  { %v2486_v49 = vand.u32 2147483647, %v2462_v40  ;;  %v1049_v60 = vsub.f32 3.1415927, %v1047_v43  ;;  %v619_v61 = vadd.f32 0.19993454, %v618_v54  ;;  %v665_v35 = vsel %vm662_vm2, %v664_v47, %v660_v59 }
 0x146   :  { %v587_v9 = vor.u32 %v586_v6, %v585_v8  ;;  %vm2920_vm9 = vcmp.lt.s32.totalorder %v2111_v45, 0  ;;  %v1093_v4 = vadd.f32 -0.074975304, %v1092_v36  ;;  %v2491_v16 = vmul.f32 %v665_v35, %v650_v25 }
 0x147   :  { %v1052_v27 = vsel %vm2920_vm9, 3.1415927, %v2851_v41  ;;  %v2495_v53 = vmax.f32 %v2473_v39, %v2486_v49  ;;  %v1060_v14 = vsel %vm1048_vm15, 2.3561945, %v2850_v44  ;;  %v1050_v6 = vsel %vm1048_vm15, %v1049_v60, %v1047_v43 }
 0x148   :  { %1252 = vst [vmem:[%s2785_s5 + $0x20] sm:$0xff] %v587_v9  ;;  %vm1053_vm13 = vcmp.eq.f32.partialorder %v2128_v12, 0.0  ;;  %v620_v29 = vmul.f32 %v619_v61, %v2359_v22  ;;  %v1094_v23 = vmul.f32 %v1093_v4, %v2432_v1  ;;  %v2510_v42 = vmul.f32 %v2491_v16, %v2491_v16 }
 0x149   :  { %v1054_v10 = vsel %vm1053_vm13, %v1052_v27, %v1050_v6  ;;  %1414 = vrcp.f32 %v2495_v53  ;;  %vm631_vm4 = vcmp.lt.s32.totalorder %v2162_v21, 0  ;;  %vm1175_vm7 = vcmp.ne.f32.partialorder %v2454_v31, %v2454_v31 }
 0x14a   :  { %v1058_v0 = vsel %vm2157_vm14, nan, %v1054_v10  ;;  %v621_v45 = vadd.f32 -0.33333147, %v620_v29  ;;  %vm628_vm15 = vcmp.lt.f32.partialorder %v2162_v21, 0.0  ;;  %v1095_v46 = vadd.f32 0.1064488, %v1094_v23 }
 0x14b   :  { %v1064_v38 = vsel %vm2182_vm1, %v1060_v14, %v1058_v0  ;;  %v668_v34 = vmul.f32 0.002785687, %v2510_v42  ;;  %v1066_v18 = vand.u32 2147483648, %v2128_v12  ;;  %vm1176_vm14 = vcmp.ne.f32.partialorder %v2462_v40, %v2462_v40 }
 0x14c   :  { %v1065_v13 = vand.u32 2147483647, %v1064_v38  ;;  %v622_v55 = vmul.f32 %v621_v45, %v2359_v22  ;;  %v632_v28 = vsel %vm631_vm4, 3.1415927, %v2851_v41  ;;  %v1096_v25 = vmul.f32 %v1095_v46, %v2432_v1  ;;  %vm2528_vm1 = vmor %vm1175_vm7, %vm1176_vm14 }
 0x14d   :  { %v669_v51 = vadd.f32 -0.015866, %v668_v34  ;;  %vm1181_vm5 = vcmp.eq.s32.totalorder %v2473_v39, inf  ;;  %v640_v12 = vsel %vm628_vm15, 2.3561945, %v2850_v44  ;;  %vm1182_vm10 = vcmp.eq.s32.totalorder %v2486_v49, inf }
 0x14e   :  { %v1067_v26 = vor.u32 %v1066_v18, %v1065_v13  ;;  %v623_v22 = vmul.f32 %v622_v55, %v2345_v3  ;;  %vm633_vm11 = vcmp.eq.f32.partialorder %v2206_v62, 0.0  ;;  %v1097_v8 = vadd.f32 -0.14207031, %v1096_v25  ;;  %vm2540_vm2 = vmand %vm1181_vm5, %vm1182_vm10 }
 0x14f   :  { %v1415_v32 = vpop.eup %1414  ;;  %v670_v54 = vmul.f32 %v669_v51, %v2510_v42  ;;  %v2923_v47 = vmov 0  ;;  %v2545_v43 = vadd.f32 %v2269_v58, %v172_v19  ;;  %vm625_vm9 = vcmp.gt.f32.partialorder %v2219_v56, %v2198_v37 }
 0x150   :  { %v2924_v47 = vsel %vm2540_vm2, 4294967295, %v2923_v47  ;;  %1260 = vst [vmem:[%s2785_s5 + $0x60] sm:$0xff] %v1067_v26  ;;  %v624_v36 = vadd.f32 %v623_v22, %v2345_v3  ;;  %v1133_v59 = vmul.f32 %v1415_v32, %v2495_v53  ;;  %v2555_v9 = vadd.f32 %v2203_v15, %v265_v30 }
 0x151   :  { %v646_v60 = vand.u32 2147483648, %v2206_v62  ;;  %v1098_v61 = vmul.f32 %v1097_v8, %v2432_v1  ;;  %v671_v35 = vadd.f32 0.04247222, %v670_v54  ;;  %v1141_v27 = vand.u32 2147483647, %v2495_v53  ;;  %v192_v54 = vpop.f32.mrf.mxu2 }
 0x152   :  { %v626_v4 = vsub.f32 1.5707964, %v624_v36  ;;  %v1130_v14 = vmin.f32 %v2473_v39, %v2486_v49  ;;  %v1134_v3 = vsub.f32 1.0, %v1133_v59  ;;  %v2563_v6 = vand.u32 2147483647, %v2545_v43 }
 0x153   :  { %v1099_v37 = vadd.f32 0.19993454, %v1098_v61  ;;  %v672_v56 = vmul.f32 %v671_v35, %v2510_v42  ;;  %v1143_v29 = vand.u32 2147483648, %v2495_v53  ;;  %vm755_vm13 = vcmp.ne.f32.partialorder %v2545_v43, %v2545_v43 }
 0x154   :  { %v627_v10 = vsel %vm625_vm9, %v626_v4, %v624_v36  ;;  %v1135_v23 = vmul.f32 %v1415_v32, %v1134_v3  ;;  %vm1138_vm4 = vweird.f32 %v1415_v32  ;;  %v2570_v0 = vand.u32 2147483647, %v2555_v9  ;;  %v285_v4 = vpop.f32.mrf.mxu3 }
 0x155   :  { %v629_v45 = vsub.f32 3.1415927, %v627_v10  ;;  %v1100_v38 = vmul.f32 %v1099_v37, %v2432_v1  ;;  %v673_v46 = vadd.f32 -0.074975304, %v672_v56  ;;  %vm756_vm7 = vcmp.ne.f32.partialorder %v2555_v9, %v2555_v9 }
 0x156   :  { %v1136_v34 = vadd.f32 %v1415_v32, %v1135_v23  ;;  %vm1137_vm14 = vweird.f32 %v2495_v53  ;;  %vm1142_vm5 = vcmp.eq.f32.partialorder %v1141_v27, 8.507059e+37  ;;  %v2578_v13 = vmax.f32 %v2563_v6, %v2570_v0  ;;  %vm2580_vm10 = vmor %vm755_vm13, %vm756_vm7 }
 0x157   :  { %v630_v55 = vsel %vm628_vm15, %v629_v45, %v627_v10  ;;  %v1101_v19 = vadd.f32 -0.33333147, %v1100_v38  ;;  %v674_v25 = vmul.f32 %v673_v46, %v2510_v42  ;;  %vm1139_vm9 = vmor %vm1137_vm14, %vm1138_vm4  ;;  %v1144_v51 = vor.u32 1.1754944e-38, %v1143_v29 }
 0x158   :  { %v634_v53 = vsel %vm633_vm11, %v632_v28, %v630_v55  ;;  %v1140_v30 = vsel %vm1139_vm9, %v1415_v32, %v1136_v34  ;;  %1416 = vrcp.f32 %v2578_v13  ;;  %vm761_vm2 = vcmp.eq.s32.totalorder %v2563_v6, inf }
 0x159   :  { %vm2927_vm13 = vnez %v2896_v63  ;;  %v1102_v22 = vmul.f32 %v1101_v19, %v2432_v1  ;;  %v675_v21 = vadd.f32 0.1064488, %v674_v25  ;;  %v1145_v8 = vsel %vm1142_vm5, %v1144_v51, %v1140_v30 }
 0x15a   :  { %v638_v26 = vsel %vm2927_vm13, nan, %v634_v53  ;;  %vm1108_vm15 = vcmp.lt.f32.partialorder %v2272_v33, 0.0  ;;  %vm1111_vm11 = vcmp.lt.s32.totalorder %v2272_v33, 0  ;;  %v2598_v62 = vmul.f32 %v1145_v8, %v1130_v14 }
 0x15b   :  { %v644_v36 = vsel %vm2243_vm3, %v640_v12, %v638_v26  ;;  %v1103_v32 = vmul.f32 %v1102_v22, %v2424_v7  ;;  %v676_v63 = vmul.f32 %v675_v21, %v2510_v42  ;;  %vm762_vm4 = vcmp.eq.s32.totalorder %v2570_v0, inf }
 0x15c   :  { %v645_v28 = vand.u32 2147483647, %v644_v36  ;;  %v2605_v1 = vmul.f32 %v2598_v62, %v2598_v62  ;;  %vm2609_vm3 = vmand %vm761_vm2, %vm762_vm4  ;;  %v2614_v12 = vadd.f32 %v2269_v58, %v192_v54  ;;  %v1112_v61 = vsel %vm1111_vm11, 3.1415927, %v2851_v41 }
 0x15d   :  { %v1104_v35 = vadd.f32 %v1103_v32, %v2424_v7  ;;  %v677_v27 = vadd.f32 -0.14207031, %v676_v63  ;;  %v1120_v3 = vsel %vm1108_vm15, 2.3561945, %v2850_v44  ;;  %vm1105_vm2 = vcmp.gt.f32.partialorder %v2305_v52, %v2301_v2 }
 0x15e   :  { %v647_v59 = vor.u32 %v646_v60, %v645_v28  ;;  %v1417_v14 = vpop.eup %1416  ;;  %vm1113_vm7 = vcmp.eq.f32.partialorder %v2287_v24, 0.0  ;;  %v1148_v58 = vmul.f32 0.002785687, %v2605_v1  ;;  %v710_v37 = vmin.f32 %v2563_v6, %v2570_v0 }
 0x15f   :  { %v1106_v60 = vsub.f32 1.5707964, %v1104_v35  ;;  %v678_v7 = vmul.f32 %v677_v27, %v2510_v42  ;;  %v713_v56 = vmul.f32 %v1417_v14, %v2578_v13  ;;  %v721_v10 = vand.u32 2147483647, %v2578_v13 }
 0x160   :  { %1253 = vst [vmem:[%s2785_s5 + $0x28] sm:$0xff] %v647_v59  ;;  %v1149_v29 = vadd.f32 -0.015866, %v1148_v58  ;;  %v2634_v2 = vand.u32 2147483647, %v2614_v12  ;;  %v2637_v52 = vadd.f32 %v2203_v15, %v285_v4  ;;  %vm1235_vm14 = vcmp.ne.f32.partialorder %v2614_v12, %v2614_v12 }
 0x161   :  { %v1107_v23 = vsel %vm1105_vm2, %v1106_v60, %v1104_v35  ;;  %v679_v45 = vadd.f32 0.19993454, %v678_v7  ;;  %v714_v38 = vsub.f32 1.0, %v713_v56  ;;  %v723_v55 = vand.u32 2147483648, %v2578_v13 }
 0x162   :  { %v1109_v46 = vsub.f32 3.1415927, %v1107_v23  ;;  %v1150_v34 = vmul.f32 %v1149_v29, %v2605_v1  ;;  %v2644_v19 = vand.u32 2147483647, %v2637_v52  ;;  %vm718_vm5 = vweird.f32 %v1417_v14 }
 0x163   :  { %v680_v25 = vmul.f32 %v679_v45, %v2510_v42  ;;  %v715_v51 = vmul.f32 %v1417_v14, %v714_v38  ;;  %vm1236_vm9 = vcmp.ne.f32.partialorder %v2637_v52, %v2637_v52  ;;  %vm717_vm13 = vweird.f32 %v2578_v13 }
 0x164   :  { %v1110_v15 = vsel %vm1108_vm15, %v1109_v46, %v1107_v23  ;;  %v1151_v53 = vadd.f32 0.04247222, %v1150_v34  ;;  %v2654_v30 = vmax.f32 %v2634_v2, %v2644_v19  ;;  %vm2656_vm11 = vmor %vm1235_vm14, %vm1236_vm9  ;;  %vm722_vm4 = vcmp.eq.f32.partialorder %v721_v10, 8.507059e+37 }
 0x165   :  { %v1114_v22 = vsel %vm1113_vm7, %v1112_v61, %v1110_v15  ;;  %v681_v21 = vadd.f32 -0.33333147, %v680_v25  ;;  %v716_v8 = vadd.f32 %v1417_v14, %v715_v51  ;;  %vm719_vm15 = vmor %vm717_vm13, %vm718_vm5  ;;  %v724_v13 = vor.u32 1.1754944e-38, %v723_v55 }
 0x166   :  { %v1118_v33 = vsel %vm2326_vm8, nan, %v1114_v22  ;;  %v1152_v36 = vmul.f32 %v1151_v53, %v2605_v1  ;;  %1418 = vrcp.f32 %v2654_v30  ;;  %vm1241_vm2 = vcmp.eq.s32.totalorder %v2634_v2, inf }
 0x167   :  { %v1124_v32 = vsel %vm2337_vm6, %v1120_v3, %v1118_v33  ;;  %v682_v63 = vmul.f32 %v681_v21, %v2510_v42  ;;  %v720_v59 = vsel %vm719_vm15, %v1417_v14, %v716_v8  ;;  %v1126_v35 = vand.u32 2147483648, %v2287_v24 }
 0x168   :  { %v1125_v61 = vand.u32 2147483647, %v1124_v32  ;;  %v1153_v27 = vadd.f32 -0.074975304, %v1152_v36  ;;  %v725_v4 = vsel %vm722_vm4, %v724_v13, %v720_v59  ;;  %vm1242_vm8 = vcmp.eq.s32.totalorder %v2644_v19, inf }
 0x169   :  { %v683_v58 = vmul.f32 %v682_v63, %v2491_v16  ;;  %v2672_v60 = vmul.f32 %v725_v4, %v710_v37  ;;  %vm2676_vm6 = vmand %vm1241_vm2, %vm1242_vm8  ;;  %v2936_v37 = vld [vmem:[#allocation5_spill] sm:$0xff]  ;;  %vm685_vm5 = vcmp.gt.f32.partialorder %v2380_v5, %v2367_v50  ;;  %v1203_v15 = vand.u32 2147483648, %v2654_v30 }
 0x16a   :  { %v1127_v7 = vor.u32 %v1126_v35, %v1125_v61  ;;  %v1154_v56 = vmul.f32 %v1153_v27, %v2605_v1  ;;  %vm688_vm7 = vcmp.lt.f32.partialorder %v2936_v37, 0.0  ;;  %vm691_vm14 = vcmp.lt.s32.totalorder %v2936_v37, 0 }
 0x16b   :  { %v684_v42 = vadd.f32 %v683_v58, %v2491_v16  ;;  %v2683_v24 = vmul.f32 %v2672_v60, %v2672_v60  ;;  %v700_v38 = vsel %vm688_vm7, 2.3561945, %v2850_v44  ;;  %v1201_v21 = vand.u32 2147483647, %v2654_v30 }
 0x16c   :  { %v1419_v14 = vpop.eup %1418  ;;  %1261 = vst [vmem:[%s2785_s5 + $0x68] sm:$0xff] %v1127_v7  ;;  %v1155_v29 = vadd.f32 0.1064488, %v1154_v56  ;;  %v692_v5 = vsel %vm691_vm14, 3.1415927, %v2851_v41  ;;  %vm693_vm13 = vcmp.eq.f32.partialorder %v2372_v57, 0.0  ;;  %vm1197_vm4 = vweird.f32 %v2654_v30 }
 0x16d   :  { %v686_v10 = vsub.f32 1.5707964, %v684_v42  ;;  %v728_v23 = vmul.f32 0.002785687, %v2683_v24  ;;  %v1193_v45 = vmul.f32 %v1419_v14, %v2654_v30  ;;  %vm1198_vm9 = vweird.f32 %v1419_v14 }
 0x16e   :  { %v1156_v16 = vmul.f32 %v1155_v29, %v2605_v1  ;;  %v1190_v32 = vmin.f32 %v2634_v2, %v2644_v19  ;;  %vm1199_vm15 = vmor %vm1197_vm4, %vm1198_vm9  ;;  %v1204_v63 = vor.u32 1.1754944e-38, %v1203_v15  ;;  %vm1202_vm2 = vcmp.eq.f32.partialorder %v1201_v21, 8.507059e+37 }
 0x16f   :  { %v687_v46 = vsel %vm685_vm5, %v686_v10, %v684_v42  ;;  %v729_v34 = vadd.f32 -0.015866, %v728_v23  ;;  %v1194_v55 = vsub.f32 1.0, %v1193_v45  ;;  %v706_v4 = vand.u32 2147483648, %v2372_v57 }
 0x170   :  { %v689_v25 = vsub.f32 3.1415927, %v687_v46  ;;  %v1157_v51 = vadd.f32 -0.14207031, %v1156_v16  ;;  %vm1168_vm8 = vcmp.lt.f32.partialorder %v2454_v31, 0.0  ;;  %vm2937_vm14 = vnez %v2924_v47 }
 0x171   :  { %v730_v53 = vmul.f32 %v729_v34, %v2683_v24  ;;  %v1195_v22 = vmul.f32 %v1419_v14, %v1194_v55  ;;  %vm751_vm5 = vcmp.lt.s32.totalorder %v2545_v43, 0  ;;  %vm748_vm9 = vcmp.lt.f32.partialorder %v2545_v43, 0.0 }
 0x172   :  { %v690_v50 = vsel %vm688_vm7, %v689_v25, %v687_v46  ;;  %v1158_v8 = vmul.f32 %v1157_v51, %v2605_v1  ;;  %vm1173_vm7 = vcmp.eq.f32.partialorder %v2462_v40, 0.0  ;;  %v766_v43 = vand.u32 2147483648, %v2555_v9 }
 0x173   :  { %v694_v54 = vsel %vm693_vm13, %v692_v5, %v690_v50  ;;  %v731_v33 = vadd.f32 0.04247222, %v730_v53  ;;  %v1196_v36 = vadd.f32 %v1419_v14, %v1195_v22  ;;  %vm753_vm13 = vcmp.eq.f32.partialorder %v2555_v9, 0.0 }
 0x174   :  { %v698_v13 = vsel %vm2384_vm0, nan, %v694_v54  ;;  %v1159_v28 = vadd.f32 0.19993454, %v1158_v8  ;;  %vm1171_vm0 = vcmp.lt.s32.totalorder %v2454_v31, 0  ;;  %vm1231_vm4 = vcmp.lt.s32.totalorder %v2614_v12, 0 }
 0x175   :  { %v704_v59 = vsel %vm2448_vm12, %v700_v38, %v698_v13  ;;  %v732_v61 = vmul.f32 %v731_v33, %v2683_v24  ;;  %v1200_v35 = vsel %vm1199_vm15, %v1419_v14, %v1196_v36  ;;  %vm1165_vm12 = vcmp.gt.f32.partialorder %v2486_v49, %v2473_v39 }
 0x176   :  { %v705_v27 = vand.u32 2147483647, %v704_v59  ;;  %v1160_v30 = vmul.f32 %v1159_v28, %v2605_v1  ;;  %v1205_v11 = vsel %vm1202_vm2, %v1204_v63, %v1200_v35  ;;  %v1172_v22 = vsel %vm1171_vm0, 3.1415927, %v2851_v41 }
 0x177   :  { %v733_v58 = vadd.f32 -0.074975304, %v732_v61  ;;  %v2716_v7 = vmul.f32 %v1205_v11, %v1190_v32  ;;  %v1180_v39 = vsel %vm1168_vm8, 2.3561945, %v2850_v44  ;;  %v1186_v36 = vand.u32 2147483648, %v2462_v40 }
 0x178   :  { %v707_v56 = vor.u32 %v706_v4, %v705_v27  ;;  %v1161_v42 = vadd.f32 -0.33333147, %v1160_v30  ;;  %v752_v30 = vsel %vm751_vm5, 3.1415927, %v2851_v41  ;;  %v1232_v9 = vsel %vm1231_vm4, 3.1415927, %v2851_v41 }
 0x179   :  { %v734_v37 = vmul.f32 %v733_v58, %v2683_v24  ;;  %v1207_v20 = vmul.f32 %v2716_v7, %v2716_v7  ;;  %vm1233_vm15 = vcmp.eq.f32.partialorder %v2637_v52, 0.0 }
 0x17a   :  { %1254 = vst [vmem:[%s2785_s5 + $0x30] sm:$0xff] %v707_v56  ;;  %v1162_v14 = vmul.f32 %v1161_v42, %v2605_v1  ;;  %v760_v56 = vsel %vm748_vm9, 2.3561945, %v2850_v44 }
 0x17b   :  { %v735_v57 = vadd.f32 0.1064488, %v734_v37  ;;  %v1208_v29 = vmul.f32 0.002785687, %v1207_v20 }
 0x17c   :  { %v1163_v10 = vmul.f32 %v1162_v14, %v2598_v62 }
 0x17d   :  { %v736_v23 = vmul.f32 %v735_v57, %v2683_v24  ;;  %v1209_v45 = vadd.f32 -0.015866, %v1208_v29 }
 0x17e   :  { %v1164_v16 = vadd.f32 %v1163_v10, %v2598_v62 }
 0x17f   :  { %v737_v38 = vadd.f32 -0.14207031, %v736_v23  ;;  %v1210_v46 = vmul.f32 %v1209_v45, %v1207_v20 }
 0x180   :  { %v1166_v34 = vsub.f32 1.5707964, %v1164_v16 }
 0x181   :  { %v738_v55 = vmul.f32 %v737_v38, %v2683_v24  ;;  %v1211_v1 = vadd.f32 0.04247222, %v1210_v46 }
 0x182   :  { %v1167_v25 = vsel %vm1165_vm12, %v1166_v34, %v1164_v16  ;;  %v1246_v16 = vand.u32 2147483648, %v2637_v52 }
 0x183   :  { %v1169_v51 = vsub.f32 3.1415927, %v1167_v25  ;;  %v739_v15 = vadd.f32 0.19993454, %v738_v55  ;;  %v1212_v53 = vmul.f32 %v1211_v1, %v1207_v20 }
 0x185   :  { %v1170_v62 = vsel %vm1168_vm8, %v1169_v51, %v1167_v25  ;;  %v740_v21 = vmul.f32 %v739_v15, %v2683_v24  ;;  %v1213_v5 = vadd.f32 -0.074975304, %v1212_v53 }
 0x186   :  { %v1174_v50 = vsel %vm1173_vm7, %v1172_v22, %v1170_v62 }
 0x187   :  { %v1178_v49 = vsel %vm2528_vm1, nan, %v1174_v50  ;;  %v741_v8 = vadd.f32 -0.33333147, %v740_v21  ;;  %v1214_v54 = vmul.f32 %v1213_v5, %v1207_v20  ;;  %vm745_vm1 = vcmp.gt.f32.partialorder %v2570_v0, %v2563_v6 }
 0x188   :  { %v1184_v33 = vsel %vm2937_vm14, %v1180_v39, %v1178_v49 }
 0x189   :  { %v1185_v31 = vand.u32 2147483647, %v1184_v33  ;;  %v742_v13 = vmul.f32 %v741_v8, %v2683_v24  ;;  %v1215_v28 = vadd.f32 0.1064488, %v1214_v54 }
 0x18b   :  { %v1187_v32 = vor.u32 %v1186_v36, %v1185_v31  ;;  %v743_v63 = vmul.f32 %v742_v13, %v2672_v60  ;;  %v1216_v59 = vmul.f32 %v1215_v28, %v1207_v20 }
 0x18d   :  { %1262 = vst [vmem:[%s2785_s5 + $0x70] sm:$0xff] %v1187_v32  ;;  %v744_v48 = vadd.f32 %v743_v63, %v2672_v60  ;;  %v1217_v61 = vadd.f32 -0.14207031, %v1216_v59 }
 0x18f   :  { %v746_v35 = vsub.f32 1.5707964, %v744_v48  ;;  %v1218_v47 = vmul.f32 %v1217_v61, %v1207_v20 }
 0x191   :  { %v747_v40 = vsel %vm745_vm1, %v746_v35, %v744_v48  ;;  %v1219_v24 = vadd.f32 0.19993454, %v1218_v47 }
 0x192   :  { %v749_v27 = vsub.f32 3.1415927, %v747_v40 }
 0x193   :  { %v1220_v4 = vmul.f32 %v1219_v24, %v1207_v20 }
 0x194   :  { %v750_v11 = vsel %vm748_vm9, %v749_v27, %v747_v40 }
 0x195   :  { %v754_v60 = vsel %vm753_vm13, %v752_v30, %v750_v11  ;;  %v1221_v58 = vadd.f32 -0.33333147, %v1220_v4 }
 0x196   :  { %v758_v6 = vsel %vm2580_vm10, nan, %v754_v60  ;;  %vm1225_vm10 = vcmp.gt.f32.partialorder %v2644_v19, %v2634_v2 }
 0x197   :  { %v764_v0 = vsel %vm2609_vm3, %v760_v56, %v758_v6  ;;  %v1222_v42 = vmul.f32 %v1221_v58, %v1207_v20  ;;  %vm1228_vm3 = vcmp.lt.f32.partialorder %v2614_v12, 0.0 }
 0x198   :  { %v765_v37 = vand.u32 2147483647, %v764_v0  ;;  %v1240_v23 = vsel %vm1228_vm3, 2.3561945, %v2850_v44 }
 0x199   :  { %v1223_v14 = vmul.f32 %v1222_v42, %v2716_v7 }
 0x19a   :  { %v767_v57 = vor.u32 %v766_v43, %v765_v37 }
 0x19b   :  { %v1224_v29 = vadd.f32 %v1223_v14, %v2716_v7 }
 0x19c   :  { %1255 = vst [vmem:[%s2785_s5 + $0x38] sm:$0xff] %v767_v57 }
 0x19d   :  { %v1226_v10 = vsub.f32 1.5707964, %v1224_v29 }
 0x19f   :  { %v1227_v18 = vsel %vm1225_vm10, %v1226_v10, %v1224_v29 }
 0x1a0   :  { %v1229_v17 = vsub.f32 3.1415927, %v1227_v18 }
 0x1a2   :  { %v1230_v20 = vsel %vm1228_vm3, %v1229_v17, %v1227_v18 }
 0x1a3   :  { %v1234_v7 = vsel %vm1233_vm15, %v1232_v9, %v1230_v20 }
 0x1a4   :  { %v1238_v45 = vsel %vm2656_vm11, nan, %v1234_v7 }
 0x1a5   :  { %v1244_v2 = vsel %vm2676_vm6, %v1240_v23, %v1238_v45 }
 0x1a6   :  { %v1245_v19 = vand.u32 2147483647, %v1244_v2 }
 0x1a8   :  { %v1247_v38 = vor.u32 %v1246_v16, %v1245_v19 }
 0x1aa   :  { %1263 = vst [vmem:[%s2785_s5 + $0x78] sm:$0xff] %v1247_v38 }

</bundles_post_ra>
